<compile_context>
chip_gen: v5e
topology: v5e:2x2
jax: 0.10.0
libtpu: 0.0.40
codegen_flags: <defaults>
</compile_context>

<pallas_src>
import math

import jax
import jax.numpy as jnp
import numpy as np
from jax import lax
from jax.experimental import pallas as pl
from jax.experimental.pallas import tpu as pltpu


def _round_up(x, m):
    return ((x + m - 1) // m) * m


def _largest_divisor_leq(n, cap):
    cap = max(1, min(n, cap))
    for d in range(cap, 0, -1):
        if n % d == 0:
            return d
    return 1


def _make_conv_stats_kernel(tm, m_valid, need_mask):
    """Per-tile: 4 phase matmuls (bf16 MXU, f32 acc) + bias, bf16 y store, partial stats."""

    def kernel(p_ref, w_ref, b_ref, y_ref, stats_ref):
        bias = b_ref[...]                                              # (1, Cout) f32
        if need_mask:
            row = lax.broadcasted_iota(jnp.int32, (tm, 1), 0) + pl.program_id(0) * tm
            mask = (row < m_valid).astype(jnp.float32)                 # (tm, 1)
        s = jnp.zeros_like(bias)
        ss = jnp.zeros_like(bias)
        for q in range(4):                                             # static unroll over phases
            y = jnp.dot(p_ref[q], w_ref[q], preferred_element_type=jnp.float32) + bias
            y_ref[q] = y.astype(y_ref.dtype)
            ym = y * mask if need_mask else y
            s = s + jnp.sum(ym, axis=0, keepdims=True)
            ss = ss + jnp.sum(ym * ym, axis=0, keepdims=True)
        stats_ref[...] = jnp.concatenate([s, ss], axis=0)[None]        # (1, 2, Cout)

    return kernel


def _bn_prelu_kernel(y_ref, prm_ref, o_ref):
    # y_ref: (tr, L) bf16 lane-dense view.  prm_ref: (3, L) = [scale; shift; alpha] per lane.
    y = y_ref[...].astype(jnp.float32)                                 # f32 elementwise (v5e VPU)
    prm = prm_ref[...]
    z = y * prm[0:1, :] + prm[1:2, :]
    o_ref[...] = jnp.where(z >= 0, z, prm[2:3, :] * z)


def deconvlayer_forward(x, W, b, gamma, beta, prelu_a, *, tm=512):
    """x: (N, Cin, H, W) NCHW.  W: (Cin, Cout, 4, 4) (PyTorch ConvTranspose2d layout)."""
    N, Cin, H, Wd = x.shape
    Cout = W.shape[1]
    Hout, Wout = 2 * H, 2 * Wd
    K4 = 4 * Cin                       # contraction per phase (2x2 window x Cin)
    M4 = N * H * Wd                    # rows per phase

    # Lane-dense flat layout for the elementwise pass needs Cout | 128; else fall back.
    lane_dense = (128 % Cout == 0)
    L = 128 if lane_dense else Cout
    reps = L // Cout

    # Row-tile quantum: sublane-aligned, and (lane-dense path) tm*Cout % 256 == 0 so the
    # kernel-2 row tiles stay sublane aligned too.
    quantum = max(8, 256 // math.gcd(Cout, 256)) if lane_dense else 8
    tm = max(quantum, (min(tm, _round_up(M4, quantum)) // quantum) * quantum)
    M4p = _round_up(M4, tm)
    n_tiles = M4p // tm

    # ---- glue: sub-pixel (phase) decomposition of ConvTranspose2d(k=4, s=2, p=1) -------
    #   out[n, co, 2h+ph, 2w+pw] = sum_{dh,dw,ci} x[n, ci, h+ph+dh-1, w+pw+dw-1]
    #                                             * W[ci, co, 3-ph-2dh, 3-pw-2dw]
    # i.e. 4 independent 2x2 convs on x — no zero-upsampled image, no 75%-zero im2col.
    x_nhwc = jnp.transpose(x, (0, 2, 3, 1))                            # (N, H, W, Cin)
    x_pad = jnp.pad(x_nhwc, ((0, 0), (1, 1), (1, 1), (0, 0)))
    p_list, w_list = [], []
    for ph in (0, 1):
        for pw in (0, 1):
            slabs = [x_pad[:, ph + dh:ph + dh + H, pw + dw:pw + dw + Wd, :]
                     for dh in (0, 1) for dw in (0, 1)]
            pq = jnp.stack(slabs, axis=3).reshape(M4, K4)              # (M4, 4*Cin)
            p_list.append(pq)
            w_sel = W[:, :, [3 - ph, 1 - ph], :][:, :, :, [3 - pw, 1 - pw]]   # (Cin,Cout,2,2)
            w_list.append(jnp.transpose(w_sel, (2, 3, 0, 1)).reshape(K4, Cout))
    patches = jnp.stack(p_list, axis=0)                                # (4, M4, K4)
    if M4p != M4:
        patches = jnp.pad(patches, ((0, 0), (0, M4p - M4), (0, 0)))
    patches = patches.astype(jnp.bfloat16)                             # bf16 MXU operands
    w_mat = jnp.stack(w_list, axis=0).astype(jnp.bfloat16)             # (4, K4, Cout)
    b_row = b.reshape(1, Cout).astype(jnp.float32)

    cparams = pltpu.CompilerParams(dimension_semantics=("parallel",),
                                   vmem_limit_bytes=32 * 1024 * 1024)

    # ---- Pallas kernel 1: 4-phase matmul + bias, bf16 y, per-tile (sum, sumsq) partials --
    kern1 = _make_conv_stats_kernel(tm, M4, M4p != M4)
    y, part = pl.pallas_call(
        kern1,
        out_shape=(jax.ShapeDtypeStruct((4, M4p, Cout), jnp.bfloat16),
                   jax.ShapeDtypeStruct((n_tiles, 2, Cout), jnp.float32)),
        grid=(n_tiles,),
        in_specs=[pl.BlockSpec((4, tm, K4), lambda i: (0, i, 0)),
                  pl.BlockSpec((4, K4, Cout), lambda i: (0, 0, 0)),
                  pl.BlockSpec((1, Cout), lambda i: (0, 0))],
        out_specs=(pl.BlockSpec((4, tm, Cout), lambda i: (0, i, 0)),
                   pl.BlockSpec((1, 2, Cout), lambda i: (i, 0, 0))),
        compiler_params=cparams,
    )(patches, w_mat, b_row)

    # BatchNorm2d training-mode forward: biased batch statistics over (N, Hout, Wout).
    # TODO(synk): running_mean/running_var momentum bookkeeping (training state) not modeled.
    stats = jnp.sum(part, axis=0)                                      # (2, Cout)
    count = float(N * Hout * Wout)
    mean = stats[0] / count
    # TODO(synk): single-pass E[x^2]-E[x]^2 in f32; switch to per-tile Welford combine if M gets huge.
    var = stats[1] / count - mean * mean
    eps = 1e-5
    scale = gamma.astype(jnp.float32) / jnp.sqrt(var + eps)
    shift = beta.astype(jnp.float32) - mean * scale
    alpha = jnp.full((Cout,), prelu_a, jnp.float32)                    # PReLU single shared param
    prm = jnp.stack([jnp.tile(scale, reps), jnp.tile(shift, reps), jnp.tile(alpha, reps)],
                    axis=0)                                            # (3, L), channel = lane % Cout

    # ---- Pallas kernel 2: fused BN affine + PReLU on a lane-dense (rows, L) view of y ----
    rows_total = (4 * M4p * Cout) // L
    base = (4 * tm * Cout) // L                                        # rows produced per m-tile
    cap = max(1, (8 * 1024 * 1024) // (base * L * 6))                  # ~<=8 MB per grid step
    tr2 = base * _largest_divisor_leq(n_tiles, cap)
    y_flat = y.reshape(rows_total, L)

    out_flat = pl.pallas_call(
        _bn_prelu_kernel,
        out_shape=jax.ShapeDtypeStruct((rows_total, L), jnp.float32),
        grid=(rows_total // tr2,),
        in_specs=[pl.BlockSpec((tr2, L), lambda i: (i, 0)),
                  pl.BlockSpec((3, L), lambda i: (0, 0))],
        out_specs=pl.BlockSpec((tr2, L), lambda i: (i, 0)),
        compiler_params=cparams,
    )(y_flat, prm)

    # ---- pixel-shuffle the 4 phases back to NCHW --------------------------------------
    # TODO(synk): phase->NCHW rearrangement stays in XLA (not a rectangular BlockSpec tiling);
    # downstream consumers that accept NHWC/phase layout could skip this pass.
    out = out_flat.reshape(4, M4p, Cout)[:, :M4, :]
    out = out.reshape(2, 2, N, H, Wd, Cout)
    out = jnp.transpose(out, (2, 5, 3, 0, 4, 1)).reshape(N, Cout, Hout, Wout)
    return out


def _reference(x, W, b, gamma, beta, prelu_a, k=4, p=1, s=2):
    """Direct numpy implementation of ConvTranspose2d + BatchNorm2d(train) + PReLU."""
    x = np.asarray(x, np.float32); W = np.asarray(W, np.float32); b = np.asarray(b, np.float32)
    N, Cin, H, Wd = x.shape
    Cout = W.shape[1]
    Hout = (H - 1) * s - 2 * p + k
    Wout = (Wd - 1) * s - 2 * p + k
    y = np.zeros((N, Cout, Hout, Wout), np.float32) + b[None, :, None, None]
    ihs = np.arange(H); iws = np.arange(Wd)
    for kh in range(k):
        ohs = ihs * s - p + kh
        mh = (ohs >= 0) & (ohs < Hout)
        for kw in range(k):
            ows = iws * s - p + kw
            mw = (ows >= 0) & (ows < Wout)
            contrib = np.einsum('nchw,cd->ndhw', x, W[:, :, kh, kw])
            y[np.ix_(np.arange(N), np.arange(Cout), ohs[mh], ows[mw])] += \
                contrib[np.ix_(np.arange(N), np.arange(Cout), ihs[mh], iws[mw])]
    mean = y.mean(axis=(0, 2, 3), keepdims=True)
    var = y.var(axis=(0, 2, 3), keepdims=True)   # biased, as in PyTorch BN forward
    z = (y - mean) / np.sqrt(var + 1e-5)
    z = z * np.asarray(gamma, np.float32)[None, :, None, None] + \
        np.asarray(beta, np.float32)[None, :, None, None]
    return np.where(z >= 0, z, prelu_a * z)


if __name__ == "__main__":
    key = jax.random.PRNGKey(0)
    kx, kw, kb = jax.random.split(key, 3)

    N, nIn, nOut, H = 2, 4, 8, 16         # Hout = Wout = 32  ->  N*Hout*Wout = 2048 rows
    x = jax.random.normal(kx, (N, nIn, H, H), jnp.float32)
    W = jax.random.normal(kw, (nIn, nOut, 4, 4), jnp.float32) * 0.1   # ConvTranspose2d weight
    b = jax.random.normal(kb, (nOut,), jnp.float32) * 0.1             # ConvTranspose2d bias
    gamma = jnp.ones((nOut,), jnp.float32)                            # BatchNorm2d weight
    beta = jnp.zeros((nOut,), jnp.float32)                            # BatchNorm2d bias
    prelu_a = 0.25                                                    # PReLU default init

    out = deconvlayer_forward(x, W, b, gamma, beta, prelu_a)
    out = jax.block_until_ready(out)

    ref = _reference(x, W, b, gamma, beta, prelu_a)
    assert out.shape == (N, nOut, 2 * H, 2 * H)
    np.testing.assert_allclose(np.asarray(out), ref, rtol=3e-2, atol=3e-2)
    print("KERNEL_OK")
</pallas_src>

<mosaic_0001>
module attributes {stable_mosaic.version = 11 : i64} {
  func.func @kernel(%arg0: i32, %arg1: memref<4x512x16xbf16, #tpu.memory_space<vmem>>, %arg2: memref<4x16x8xbf16, #tpu.memory_space<vmem>>, %arg3: memref<1x8xf32, #tpu.memory_space<vmem>>, %arg4: memref<4x512x8xbf16, #tpu.memory_space<vmem>>, %arg5: memref<1x2x8xf32, #tpu.memory_space<vmem>>) attributes {dimension_semantics = [#tpu.dimension_semantics<parallel>], iteration_bounds = array<i64: 1>, scalar_prefetch = 0 : i64, scratch_operands = 0 : i64, tpu.core_type = #tpu.core_type<tc>, window_params = [{transform_indices = @transform_0, window_bounds = array<i64: 4, 512, 16>}, {pipeline_mode = #tpu.pipeline_mode<synchronous>, transform_indices = @transform_1, window_bounds = array<i64: 4, 16, 8>}, {pipeline_mode = #tpu.pipeline_mode<synchronous>, transform_indices = @transform_2, window_bounds = array<i64: 1, 8>}, {transform_indices = @transform_3, window_bounds = array<i64: 4, 512, 8>}, {transform_indices = @transform_4, window_bounds = array<i64: 1, 2, 8>}]} {
    %c0 = arith.constant 0 : index
    %c0_0 = arith.constant 0 : index
    %0 = vector.load %arg3[%c0, %c0_0] : memref<1x8xf32, #tpu.memory_space<vmem>>, vector<1x8xf32>
    %cst = arith.constant 0.000000e+00 : f32
    %1 = vector.broadcast %cst : f32 to vector<1x8xf32>
    %cst_1 = arith.constant 0.000000e+00 : f32
    %2 = vector.broadcast %cst_1 : f32 to vector<1x8xf32>
    %c0_2 = arith.constant 0 : index
    %c0_3 = arith.constant 0 : index
    %c0_4 = arith.constant 0 : index
    %3 = vector.load %arg1[%c0_2, %c0_3, %c0_4] : memref<4x512x16xbf16, #tpu.memory_space<vmem>>, vector<1x512x16xbf16>
    %4 = vector.shape_cast %3 : vector<1x512x16xbf16> to vector<512x16xbf16>
    %c0_5 = arith.constant 0 : index
    %c0_6 = arith.constant 0 : index
    %c0_7 = arith.constant 0 : index
    %5 = vector.load %arg2[%c0_5, %c0_6, %c0_7] : memref<4x16x8xbf16, #tpu.memory_space<vmem>>, vector<1x16x8xbf16>
    %6 = vector.shape_cast %5 : vector<1x16x8xbf16> to vector<16x8xbf16>
    %cst_8 = arith.constant dense<0.000000e+00> : vector<512x8xf32>
    %7 = tpu.matmul %4, %6, %cst_8 {dimension_numbers = #tpu.dot_dimension_numbers<[1], [0], [0], [1], [0, 0, 1, 1], [], []>} : vector<512x16xbf16>, vector<16x8xbf16>, vector<512x8xf32> -> vector<512x8xf32>
    %8 = vector.broadcast %0 : vector<1x8xf32> to vector<512x8xf32>
    %9 = arith.addf %7, %8 : vector<512x8xf32>
    %10 = arith.truncf %9 : vector<512x8xf32> to vector<512x8xbf16>
    %c0_9 = arith.constant 0 : index
    %c0_10 = arith.constant 0 : index
    %c0_11 = arith.constant 0 : index
    %11 = vector.load %arg4[%c0_9, %c0_10, %c0_11] : memref<4x512x8xbf16, #tpu.memory_space<vmem>>, vector<1x512x8xbf16>
    %12 = vector.shape_cast %11 : vector<1x512x8xbf16> to vector<512x8xbf16>
    %13 = vector.shape_cast %10 : vector<512x8xbf16> to vector<1x512x8xbf16>
    tpu.vector_store %arg4[%c0_9, %c0_10, %c0_11], %13 {strides = array<i32>} : memref<4x512x8xbf16, #tpu.memory_space<vmem>>, vector<1x512x8xbf16>,
    %cst_12 = arith.constant dense<0.000000e+00> : vector<8xf32>
    %14 = vector.multi_reduction <add>, %9, %cst_12 [0] : vector<512x8xf32> to vector<8xf32>
    %15 = vector.shape_cast %14 : vector<8xf32> to vector<1x8xf32>
    %16 = arith.addf %1, %15 : vector<1x8xf32>
    %17 = arith.mulf %9, %9 : vector<512x8xf32>
    %cst_13 = arith.constant dense<0.000000e+00> : vector<8xf32>
    %18 = vector.multi_reduction <add>, %17, %cst_13 [0] : vector<512x8xf32> to vector<8xf32>
    %19 = vector.shape_cast %18 : vector<8xf32> to vector<1x8xf32>
    %20 = arith.addf %2, %19 : vector<1x8xf32>
    %c1 = arith.constant 1 : index
    %c0_14 = arith.constant 0 : index
    %c0_15 = arith.constant 0 : index
    %21 = vector.load %arg1[%c1, %c0_14, %c0_15] : memref<4x512x16xbf16, #tpu.memory_space<vmem>>, vector<1x512x16xbf16>
    %22 = vector.shape_cast %21 : vector<1x512x16xbf16> to vector<512x16xbf16>
    %c1_16 = arith.constant 1 : index
    %c0_17 = arith.constant 0 : index
    %c0_18 = arith.constant 0 : index
    %23 = vector.load %arg2[%c1_16, %c0_17, %c0_18] : memref<4x16x8xbf16, #tpu.memory_space<vmem>>, vector<1x16x8xbf16>
    %24 = vector.shape_cast %23 : vector<1x16x8xbf16> to vector<16x8xbf16>
    %cst_19 = arith.constant dense<0.000000e+00> : vector<512x8xf32>
    %25 = tpu.matmul %22, %24, %cst_19 {dimension_numbers = #tpu.dot_dimension_numbers<[1], [0], [0], [1], [0, 0, 1, 1], [], []>} : vector<512x16xbf16>, vector<16x8xbf16>, vector<512x8xf32> -> vector<512x8xf32>
    %26 = vector.broadcast %0 : vector<1x8xf32> to vector<512x8xf32>
    %27 = arith.addf %25, %26 : vector<512x8xf32>
    %28 = arith.truncf %27 : vector<512x8xf32> to vector<512x8xbf16>
    %c1_20 = arith.constant 1 : index
    %c0_21 = arith.constant 0 : index
    %c0_22 = arith.constant 0 : index
    %29 = vector.load %arg4[%c1_20, %c0_21, %c0_22] : memref<4x512x8xbf16, #tpu.memory_space<vmem>>, vector<1x512x8xbf16>
    %30 = vector.shape_cast %29 : vector<1x512x8xbf16> to vector<512x8xbf16>
    %31 = vector.shape_cast %28 : vector<512x8xbf16> to vector<1x512x8xbf16>
    tpu.vector_store %arg4[%c1_20, %c0_21, %c0_22], %31 {strides = array<i32>} : memref<4x512x8xbf16, #tpu.memory_space<vmem>>, vector<1x512x8xbf16>,
    %cst_23 = arith.constant dense<0.000000e+00> : vector<8xf32>
    %32 = vector.multi_reduction <add>, %27, %cst_23 [0] : vector<512x8xf32> to vector<8xf32>
    %33 = vector.shape_cast %32 : vector<8xf32> to vector<1x8xf32>
    %34 = arith.addf %16, %33 : vector<1x8xf32>
    %35 = arith.mulf %27, %27 : vector<512x8xf32>
    %cst_24 = arith.constant dense<0.000000e+00> : vector<8xf32>
    %36 = vector.multi_reduction <add>, %35, %cst_24 [0] : vector<512x8xf32> to vector<8xf32>
    %37 = vector.shape_cast %36 : vector<8xf32> to vector<1x8xf32>
    %38 = arith.addf %20, %37 : vector<1x8xf32>
    %c2 = arith.constant 2 : index
    %c0_25 = arith.constant 0 : index
    %c0_26 = arith.constant 0 : index
    %39 = vector.load %arg1[%c2, %c0_25, %c0_26] : memref<4x512x16xbf16, #tpu.memory_space<vmem>>, vector<1x512x16xbf16>
    %40 = vector.shape_cast %39 : vector<1x512x16xbf16> to vector<512x16xbf16>
    %c2_27 = arith.constant 2 : index
    %c0_28 = arith.constant 0 : index
    %c0_29 = arith.constant 0 : index
    %41 = vector.load %arg2[%c2_27, %c0_28, %c0_29] : memref<4x16x8xbf16, #tpu.memory_space<vmem>>, vector<1x16x8xbf16>
    %42 = vector.shape_cast %41 : vector<1x16x8xbf16> to vector<16x8xbf16>
    %cst_30 = arith.constant dense<0.000000e+00> : vector<512x8xf32>
    %43 = tpu.matmul %40, %42, %cst_30 {dimension_numbers = #tpu.dot_dimension_numbers<[1], [0], [0], [1], [0, 0, 1, 1], [], []>} : vector<512x16xbf16>, vector<16x8xbf16>, vector<512x8xf32> -> vector<512x8xf32>
    %44 = vector.broadcast %0 : vector<1x8xf32> to vector<512x8xf32>
    %45 = arith.addf %43, %44 : vector<512x8xf32>
    %46 = arith.truncf %45 : vector<512x8xf32> to vector<512x8xbf16>
    %c2_31 = arith.constant 2 : index
    %c0_32 = arith.constant 0 : index
    %c0_33 = arith.constant 0 : index
    %47 = vector.load %arg4[%c2_31, %c0_32, %c0_33] : memref<4x512x8xbf16, #tpu.memory_space<vmem>>, vector<1x512x8xbf16>
    %48 = vector.shape_cast %47 : vector<1x512x8xbf16> to vector<512x8xbf16>
    %49 = vector.shape_cast %46 : vector<512x8xbf16> to vector<1x512x8xbf16>
    tpu.vector_store %arg4[%c2_31, %c0_32, %c0_33], %49 {strides = array<i32>} : memref<4x512x8xbf16, #tpu.memory_space<vmem>>, vector<1x512x8xbf16>,
    %cst_34 = arith.constant dense<0.000000e+00> : vector<8xf32>
    %50 = vector.multi_reduction <add>, %45, %cst_34 [0] : vector<512x8xf32> to vector<8xf32>
    %51 = vector.shape_cast %50 : vector<8xf32> to vector<1x8xf32>
    %52 = arith.addf %34, %51 : vector<1x8xf32>
    %53 = arith.mulf %45, %45 : vector<512x8xf32>
    %cst_35 = arith.constant dense<0.000000e+00> : vector<8xf32>
    %54 = vector.multi_reduction <add>, %53, %cst_35 [0] : vector<512x8xf32> to vector<8xf32>
    %55 = vector.shape_cast %54 : vector<8xf32> to vector<1x8xf32>
    %56 = arith.addf %38, %55 : vector<1x8xf32>
    %c3 = arith.constant 3 : index
    %c0_36 = arith.constant 0 : index
    %c0_37 = arith.constant 0 : index
    %57 = vector.load %arg1[%c3, %c0_36, %c0_37] : memref<4x512x16xbf16, #tpu.memory_space<vmem>>, vector<1x512x16xbf16>
    %58 = vector.shape_cast %57 : vector<1x512x16xbf16> to vector<512x16xbf16>
    %c3_38 = arith.constant 3 : index
    %c0_39 = arith.constant 0 : index
    %c0_40 = arith.constant 0 : index
    %59 = vector.load %arg2[%c3_38, %c0_39, %c0_40] : memref<4x16x8xbf16, #tpu.memory_space<vmem>>, vector<1x16x8xbf16>
    %60 = vector.shape_cast %59 : vector<1x16x8xbf16> to vector<16x8xbf16>
    %cst_41 = arith.constant dense<0.000000e+00> : vector<512x8xf32>
    %61 = tpu.matmul %58, %60, %cst_41 {dimension_numbers = #tpu.dot_dimension_numbers<[1], [0], [0], [1], [0, 0, 1, 1], [], []>} : vector<512x16xbf16>, vector<16x8xbf16>, vector<512x8xf32> -> vector<512x8xf32>
    %62 = vector.broadcast %0 : vector<1x8xf32> to vector<512x8xf32>
    %63 = arith.addf %61, %62 : vector<512x8xf32>
    %64 = arith.truncf %63 : vector<512x8xf32> to vector<512x8xbf16>
    %c3_42 = arith.constant 3 : index
    %c0_43 = arith.constant 0 : index
    %c0_44 = arith.constant 0 : index
    %65 = vector.load %arg4[%c3_42, %c0_43, %c0_44] : memref<4x512x8xbf16, #tpu.memory_space<vmem>>, vector<1x512x8xbf16>
    %66 = vector.shape_cast %65 : vector<1x512x8xbf16> to vector<512x8xbf16>
    %67 = vector.shape_cast %64 : vector<512x8xbf16> to vector<1x512x8xbf16>
    tpu.vector_store %arg4[%c3_42, %c0_43, %c0_44], %67 {strides = array<i32>} : memref<4x512x8xbf16, #tpu.memory_space<vmem>>, vector<1x512x8xbf16>,
    %cst_45 = arith.constant dense<0.000000e+00> : vector<8xf32>
    %68 = vector.multi_reduction <add>, %63, %cst_45 [0] : vector<512x8xf32> to vector<8xf32>
    %69 = vector.shape_cast %68 : vector<8xf32> to vector<1x8xf32>
    %70 = arith.addf %52, %69 : vector<1x8xf32>
    %71 = arith.mulf %63, %63 : vector<512x8xf32>
    %cst_46 = arith.constant dense<0.000000e+00> : vector<8xf32>
    %72 = vector.multi_reduction <add>, %71, %cst_46 [0] : vector<512x8xf32> to vector<8xf32>
    %73 = vector.shape_cast %72 : vector<8xf32> to vector<1x8xf32>
    %74 = arith.addf %56, %73 : vector<1x8xf32>
    %75 = tpu.concatenate %70, %74 in 0 : vector<1x8xf32>, vector<1x8xf32> -> vector<2x8xf32>
    %76 = vector.shape_cast %75 : vector<2x8xf32> to vector<1x2x8xf32>
    %c0_47 = arith.constant 0 : index
    %c0_48 = arith.constant 0 : index
    %c0_49 = arith.constant 0 : index
    %77 = vector.load %arg5[%c0_47, %c0_48, %c0_49] : memref<1x2x8xf32, #tpu.memory_space<vmem>>, vector<1x2x8xf32>
    tpu.vector_store %arg5[%c0_47, %c0_48, %c0_49], %76 {strides = array<i32>} : memref<1x2x8xf32, #tpu.memory_space<vmem>>, vector<1x2x8xf32>,
    return
  }
  func.func @transform_0(%arg0: i32) -> (i32, i32, i32) {
    %c0_i32 = arith.constant 0 : i32
    %c0_i32_0 = arith.constant 0 : i32
    %c0_i32_1 = arith.constant 0 : i32
    return %c0_i32, %arg0, %c0_i32_0 : i32, i32, i32
  }
  func.func @transform_1(%arg0: i32) -> (i32, i32, i32) {
    %c0_i32 = arith.constant 0 : i32
    %c0_i32_0 = arith.constant 0 : i32
    %c0_i32_1 = arith.constant 0 : i32
    %c0_i32_2 = arith.constant 0 : i32
    return %c0_i32, %c0_i32_0, %c0_i32_1 : i32, i32, i32
  }
  func.func @transform_2(%arg0: i32) -> (i32, i32) {
    %c0_i32 = arith.constant 0 : i32
    %c0_i32_0 = arith.constant 0 : i32
    %c0_i32_1 = arith.constant 0 : i32
    return %c0_i32, %c0_i32_0 : i32, i32
  }
  func.func @transform_3(%arg0: i32) -> (i32, i32, i32) {
    %c0_i32 = arith.constant 0 : i32
    %c0_i32_0 = arith.constant 0 : i32
    %c0_i32_1 = arith.constant 0 : i32
    return %c0_i32, %arg0, %c0_i32_0 : i32, i32, i32
  }
  func.func @transform_4(%arg0: i32) -> (i32, i32, i32) {
    %c0_i32 = arith.constant 0 : i32
    %c0_i32_0 = arith.constant 0 : i32
    %c0_i32_1 = arith.constant 0 : i32
    return %arg0, %c0_i32, %c0_i32_0 : i32, i32, i32
  }
}

</mosaic_0001>

<bundles_post_ra>
// kernel: tpu_custom_call.1
= control target key start
LH: loop header
LB: loop body
LE: loop exit
PB: predicated region body
PF: predicated region fallthrough
CT: control target
= control target key end

     0   :  { %vm254_vm0 = vcmask 130048   ;;  %s7501_s0 = inlined_call_operand.vmem [shape: bf16[4,512,16], index: 0, kind: input, shape index: {}]   ;;  %s7502_s1 = inlined_call_operand.vmem [shape: bf16[4,16,8], index: 1, kind: input, shape index: {}]   ;;  %s7503_s2 = inlined_call_operand.vmem [shape: f32[1,8], index: 2, kind: input, shape index: {}]   ;;  %s7504_s3 = inlined_call_operand.vmem [shape: bf16[4,512,8], index: 3, kind: output, shape index: {0}]   ;;  %s7505_s4 = inlined_call_operand.hbm [shape: f32[1,2,8], index: 4, kind: output, shape index: {1}]  }
   0x1   :  { %v4964_v0 = vld [vmem:[%s7502_s1] sm:$0xff]  ;;  %v4997_v1 = vld [vmem:[%s7502_s1 + $0x8] sm:$0xff]  ;;  %v5030_v2 = vld [vmem:[%s7502_s1 + $0x10] sm:$0xff] }
   0x2   :  { %v5063_v3 = vld [vmem:[%s7502_s1 + $0x18] sm:$0xff]  ;;  %v4932_v4 = vld [vmem:[%s7501_s0] sm:$0xff]  ;;  %358 = vmatpush.bf16.msra.mxu0 %v4964_v0  ;;  %1319 = vmatpush.bf16.msra.mxu1 %v4997_v1 }
   0x3   :  { %v4965_v5 = vld [vmem:[%s7501_s0 + $0x100] sm:$0xff]  ;;  %2279 = vmatpush.bf16.msra.mxu2 %v5030_v2  ;;  %3239 = vmatpush.bf16.msra.mxu3 %v5063_v3 }
   0x4   :  { %v4998_v6 = vld [vmem:[%s7501_s0 + $0x200] sm:$0xff] }
   0x5   :  { %v5031_v7 = vld [vmem:[%s7501_s0 + $0x300] sm:$0xff]  ;;  %4018 = vmatmul.msk.bf16.vlgmr.msra.gmra.mxu0 %vm254_vm0, %v4932_v4  ;;  %4248 = vmatmul.msk.bf16.vlgmr.msra.gmra.mxu1 %vm254_vm0, %v4965_v5 }
   0x6   :  { %10 = vsyncpa [#allocation3], 0  ;;  %4542 = vmatmul.msk.bf16.vlgmr.msra.gmra.mxu2 %vm254_vm0, %v4998_v6  ;;  %4836 = vmatmul.msk.bf16.vlgmr.msra.gmra.mxu3 %vm254_vm0, %v5031_v7  ;;  %v4933_v8 = vld [vmem:[%s7501_s0 + $0x8] sm:$0xff]  ;;  %v4934_v12 = vld [vmem:[%s7501_s0 + $0x10] sm:$0xff]  ;;  %vm584_vm1 = vcmask 60416   ;;  %vm649_vm2 = vcmask 64512  }
   0x7   :  { %v4966_v9 = vld [vmem:[%s7501_s0 + $0x108] sm:$0xff]  ;;  %v4967_v13 = vld [vmem:[%s7501_s0 + $0x110] sm:$0xff]  ;;  %v4935_v16 = vld [vmem:[%s7501_s0 + $0x18] sm:$0xff]  ;;  %vm3862_vm3 = vcmask 1040384   ;;  %vm3864_vm4 = vcmask 58368  }
   0x8   :  { %v4999_v10 = vld [vmem:[%s7501_s0 + $0x208] sm:$0xff]  ;;  %v5000_v14 = vld [vmem:[%s7501_s0 + $0x210] sm:$0xff]  ;;  %v4968_v17 = vld [vmem:[%s7501_s0 + $0x118] sm:$0xff] }
   0x9   :  { %v5032_v11 = vld [vmem:[%s7501_s0 + $0x308] sm:$0xff]  ;;  %v5033_v15 = vld [vmem:[%s7501_s0 + $0x310] sm:$0xff]  ;;  %v5001_v18 = vld [vmem:[%s7501_s0 + $0x218] sm:$0xff] }
   0xa   :  { %v5034_v19 = vld [vmem:[%s7501_s0 + $0x318] sm:$0xff]  ;;  %v4936_v20 = vld [vmem:[%s7501_s0 + $0x20] sm:$0xff]  ;;  %v4937_v24 = vld [vmem:[%s7501_s0 + $0x28] sm:$0xff] }
   0xb   :  { %v4969_v21 = vld [vmem:[%s7501_s0 + $0x120] sm:$0xff]  ;;  %v4970_v25 = vld [vmem:[%s7501_s0 + $0x128] sm:$0xff]  ;;  %v4938_v28 = vld [vmem:[%s7501_s0 + $0x30] sm:$0xff] }
   0xc   :  { %v5002_v22 = vld [vmem:[%s7501_s0 + $0x220] sm:$0xff]  ;;  %v5003_v26 = vld [vmem:[%s7501_s0 + $0x228] sm:$0xff]  ;;  %v4971_v29 = vld [vmem:[%s7501_s0 + $0x130] sm:$0xff] }
   0xd   :  { %v5035_v23 = vld [vmem:[%s7501_s0 + $0x320] sm:$0xff]  ;;  %v5036_v27 = vld [vmem:[%s7501_s0 + $0x328] sm:$0xff]  ;;  %v5004_v30 = vld [vmem:[%s7501_s0 + $0x230] sm:$0xff] }
   0xe   :  { %v5037_v31 = vld [vmem:[%s7501_s0 + $0x330] sm:$0xff]  ;;  %v4939_v32 = vld [vmem:[%s7501_s0 + $0x38] sm:$0xff]  ;;  %v5265_v36 = vld [vmem:[%s7503_s2] ss:$0 sm:$0xff] }
   0xf   :  { %v4972_v33 = vld [vmem:[%s7501_s0 + $0x138] sm:$0xff]  ;;  %v4940_v37 = vld [vmem:[%s7501_s0 + $0x40] sm:$0xff] }
  0x10   :  { %v5005_v34 = vld [vmem:[%s7501_s0 + $0x238] sm:$0xff]  ;;  %v4973_v38 = vld [vmem:[%s7501_s0 + $0x140] sm:$0xff] }
  0x11   :  { %v5038_v35 = vld [vmem:[%s7501_s0 + $0x338] sm:$0xff]  ;;  %v5006_v41 = vld [vmem:[%s7501_s0 + $0x240] sm:$0xff] }
  0x12   :  { %v5039_v42 = vld [vmem:[%s7501_s0 + $0x340] sm:$0xff] }
  0x15   :  { %4019 = vmatmul.msk.bf16.gmra.mxu0 %vm254_vm0, %v4933_v8  ;;  %4249 = vmatmul.msk.bf16.gmra.mxu1 %vm254_vm0, %v4966_v9  ;;  %v4941_v9 = vld [vmem:[%s7501_s0 + $0x48] sm:$0xff] }
  0x16   :  { %4543 = vmatmul.msk.bf16.gmra.mxu2 %vm254_vm0, %v4999_v10  ;;  %4837 = vmatmul.msk.bf16.gmra.mxu3 %vm254_vm0, %v5032_v11 }
  0x25   :  { %4020 = vmatmul.msk.bf16.gmra.mxu0 %vm254_vm0, %v4934_v12  ;;  %4250 = vmatmul.msk.bf16.gmra.mxu1 %vm254_vm0, %v4967_v13 }
  0x26   :  { %4544 = vmatmul.msk.bf16.gmra.mxu2 %vm254_vm0, %v5000_v14  ;;  %4838 = vmatmul.msk.bf16.gmra.mxu3 %vm254_vm0, %v5033_v15 }
  0x35   :  { %4021 = vmatmul.msk.bf16.gmra.mxu0 %vm254_vm0, %v4935_v16  ;;  %4251 = vmatmul.msk.bf16.gmra.mxu1 %vm254_vm0, %v4968_v17  ;;  %v4974_v16 = vld [vmem:[%s7501_s0 + $0x148] sm:$0xff] }
  0x36   :  { %4545 = vmatmul.msk.bf16.gmra.mxu2 %vm254_vm0, %v5001_v18  ;;  %4839 = vmatmul.msk.bf16.gmra.mxu3 %vm254_vm0, %v5034_v19 }
  0x45   :  { %4022 = vmatmul.msk.bf16.gmra.mxu0 %vm254_vm0, %v4936_v20  ;;  %4252 = vmatmul.msk.bf16.gmra.mxu1 %vm254_vm0, %v4969_v21 }
  0x46   :  { %4546 = vmatmul.msk.bf16.gmra.mxu2 %vm254_vm0, %v5002_v22  ;;  %4840 = vmatmul.msk.bf16.gmra.mxu3 %vm254_vm0, %v5035_v23  ;;  %v5007_v23 = vld [vmem:[%s7501_s0 + $0x248] sm:$0xff] }
  0x55   :  { %4023 = vmatmul.msk.bf16.gmra.mxu0 %vm254_vm0, %v4937_v24  ;;  %4253 = vmatmul.msk.bf16.gmra.mxu1 %vm254_vm0, %v4970_v25  ;;  %v5040_v24 = vld [vmem:[%s7501_s0 + $0x348] sm:$0xff] }
  0x56   :  { %4547 = vmatmul.msk.bf16.gmra.mxu2 %vm254_vm0, %v5003_v26  ;;  %4841 = vmatmul.msk.bf16.gmra.mxu3 %vm254_vm0, %v5036_v27 }
  0x65   :  { %4024 = vmatmul.msk.bf16.gmra.mxu0 %vm254_vm0, %v4938_v28  ;;  %4254 = vmatmul.msk.bf16.gmra.mxu1 %vm254_vm0, %v4971_v29 }
  0x66   :  { %4548 = vmatmul.msk.bf16.gmra.mxu2 %vm254_vm0, %v5004_v30  ;;  %4842 = vmatmul.msk.bf16.gmra.mxu3 %vm254_vm0, %v5037_v31 }
  0x75   :  { %4025 = vmatmul.msk.bf16.gmra.mxu0 %vm254_vm0, %v4939_v32  ;;  %4255 = vmatmul.msk.bf16.gmra.mxu1 %vm254_vm0, %v4972_v33 }
  0x76   :  { %4549 = vmatmul.msk.bf16.gmra.mxu2 %vm254_vm0, %v5005_v34  ;;  %4843 = vmatmul.msk.bf16.gmra.mxu3 %vm254_vm0, %v5038_v35 }
  0x82   :  { %v360_v39 = vpop.f32.mrf.mxu0  ;;  %v1321_v40 = vpop.f32.mrf.mxu1 }
  0x83   :  { %v361_v43 = vadd.f32 %v5265_v36, %v360_v39  ;;  %v1322_v44 = vadd.f32 %v5265_v36, %v1321_v40 }
  0x85   :  { %v520_v45 = vpack.c.bf16 %v361_v43, %v361_v43  ;;  %v1481_v46 = vpack.c.bf16 %v1322_v44, %v1322_v44  ;;  %4026 = vmatmul.msk.bf16.gmra.mxu0 %vm254_vm0, %v4940_v37  ;;  %4256 = vmatmul.msk.bf16.gmra.mxu1 %vm254_vm0, %v4973_v38  ;;  %v784_v55 = vmul.f32 %v361_v43, %v361_v43  ;;  %v650_v58 = vsel %vm649_vm2, %v361_v43, 0.0 }
  0x86   :  { %4550 = vmatmul.msk.bf16.gmra.mxu2 %vm254_vm0, %v5006_v41  ;;  %4844 = vmatmul.msk.bf16.gmra.mxu3 %vm254_vm0, %v5039_v42  ;;  %v1744_v59 = vmul.f32 %v1322_v44, %v1322_v44  ;;  %v1610_v62 = vsel %vm649_vm2, %v1322_v44, 0.0 }
  0x87   :  { %585 = vst.msk [vmem:[%s7504_s3] sm:$0xf] %vm584_vm1, %v520_v45  ;;  %v848_v6 = vsel %vm649_vm2, %v784_v55, 0.0 }
  0x88   :  { %4280 = vst.msk [vmem:[%s7504_s3 + $0x100] sm:$0xf] %vm584_vm1, %v1481_v46  ;;  %v1808_v10 = vsel %vm649_vm2, %v1744_v59, 0.0 }
  0x89   :  { %v2281_v47 = vpop.f32.mrf.mxu2  ;;  %v3241_v48 = vpop.f32.mrf.mxu3 }
  0x8a   :  { %v2282_v49 = vadd.f32 %v5265_v36, %v2281_v47  ;;  %v3242_v50 = vadd.f32 %v5265_v36, %v3241_v48  ;;  %v362_v51 = vpop.f32.mrf.mxu0  ;;  %v1323_v52 = vpop.f32.mrf.mxu1 }
  0x8b   :  { %v363_v53 = vadd.f32 %v5265_v36, %v362_v51  ;;  %v1324_v54 = vadd.f32 %v5265_v36, %v1323_v52 }
  0x8c   :  { %v2441_v56 = vpack.c.bf16 %v2282_v49, %v2282_v49  ;;  %v3401_v57 = vpack.c.bf16 %v3242_v50, %v3242_v50  ;;  %v2704_v2 = vmul.f32 %v2282_v49, %v2282_v49  ;;  %v3664_v3 = vmul.f32 %v3242_v50, %v3242_v50 }
  0x8d   :  { %v521_v60 = vpack.c.bf16 %v363_v53, %v363_v53  ;;  %v651_v61 = vsel %vm649_vm2, %v363_v53, 0.0  ;;  %v785_v0 = vmul.f32 %v363_v53, %v363_v53  ;;  %v1482_v1 = vpack.c.bf16 %v1324_v54, %v1324_v54 }
  0x8e   :  { %4574 = vst.msk [vmem:[%s7504_s3 + $0x200] sm:$0xf] %vm584_vm1, %v2441_v56  ;;  %v652_v63 = vadd.f32 %v651_v61, %v650_v58  ;;  %v1611_v4 = vsel %vm649_vm2, %v1324_v54, 0.0  ;;  %v1745_v5 = vmul.f32 %v1324_v54, %v1324_v54  ;;  %v2570_v11 = vsel %vm649_vm2, %v2282_v49, 0.0 }
  0x8f   :  { %4868 = vst.msk [vmem:[%s7504_s3 + $0x300] sm:$0xf] %vm584_vm1, %v3401_v57  ;;  %v849_v7 = vsel %vm649_vm2, %v785_v0, 0.0  ;;  %v1612_v8 = vadd.f32 %v1611_v4, %v1610_v62  ;;  %v3530_v17 = vsel %vm649_vm2, %v3242_v50, 0.0  ;;  %v2768_v25 = vsel %vm649_vm2, %v2704_v2, 0.0 }
  0x90   :  { %586 = vst.msk [vmem:[%s7504_s3 + $0x4] sm:$0xf] %vm584_vm1, %v521_v60  ;;  %v850_v12 = vadd.f32 %v849_v7, %v848_v6  ;;  %v1809_v13 = vsel %vm649_vm2, %v1745_v5, 0.0  ;;  %v3728_v26 = vsel %vm649_vm2, %v3664_v3, 0.0 }
  0x91   :  { %4281 = vst.msk [vmem:[%s7504_s3 + $0x104] sm:$0xf] %vm584_vm1, %v1482_v1  ;;  %v2283_v14 = vpop.f32.mrf.mxu2  ;;  %v3243_v15 = vpop.f32.mrf.mxu3  ;;  %v1810_v18 = vadd.f32 %v1809_v13, %v1808_v10 }
  0x92   :  { %v2284_v19 = vadd.f32 %v5265_v36, %v2283_v14  ;;  %v3244_v20 = vadd.f32 %v5265_v36, %v3243_v15  ;;  %v365_v21 = vpop.f32.mrf.mxu0  ;;  %v1326_v22 = vpop.f32.mrf.mxu1 }
  0x93   :  { %v366_v27 = vadd.f32 %v5265_v36, %v365_v21  ;;  %v1327_v28 = vadd.f32 %v5265_v36, %v1326_v22  ;;  %v4942_v22 = vld [vmem:[%s7501_s0 + $0x50] sm:$0xff] }
  0x94   :  { %v2442_v29 = vpack.c.bf16 %v2284_v19, %v2284_v19  ;;  %v2571_v30 = vsel %vm649_vm2, %v2284_v19, 0.0  ;;  %v2705_v31 = vmul.f32 %v2284_v19, %v2284_v19  ;;  %v3402_v32 = vpack.c.bf16 %v3244_v20, %v3244_v20 }
  0x95   :  { %v2572_v33 = vadd.f32 %v2571_v30, %v2570_v11  ;;  %v3531_v34 = vsel %vm649_vm2, %v3244_v20, 0.0  ;;  %v3665_v35 = vmul.f32 %v3244_v20, %v3244_v20  ;;  %v522_v37 = vpack.c.bf16 %v366_v27, %v366_v27  ;;  %4027 = vmatmul.msk.bf16.gmra.mxu0 %vm254_vm0, %v4941_v9  ;;  %4257 = vmatmul.msk.bf16.gmra.mxu1 %vm254_vm0, %v4974_v16  ;;  %v5041_v30 = vld [vmem:[%s7501_s0 + $0x350] sm:$0xff] }
  0x96   :  { %4575 = vst.msk [vmem:[%s7504_s3 + $0x204] sm:$0xf] %vm584_vm1, %v2442_v29  ;;  %v2769_v38 = vsel %vm649_vm2, %v2705_v31, 0.0  ;;  %v3532_v39 = vadd.f32 %v3531_v34, %v3530_v17  ;;  %v653_v40 = vsel %vm649_vm2, %v366_v27, 0.0  ;;  %v786_v41 = vmul.f32 %v366_v27, %v366_v27  ;;  %4551 = vmatmul.msk.bf16.gmra.mxu2 %vm254_vm0, %v5007_v23  ;;  %4845 = vmatmul.msk.bf16.gmra.mxu3 %vm254_vm0, %v5040_v24  ;;  %v4975_v23 = vld [vmem:[%s7501_s0 + $0x150] sm:$0xff] }
  0x97   :  { %v2770_v42 = vadd.f32 %v2769_v38, %v2768_v25  ;;  %4869 = vst.msk [vmem:[%s7504_s3 + $0x304] sm:$0xf] %vm584_vm1, %v3402_v32  ;;  %v3729_v43 = vsel %vm649_vm2, %v3665_v35, 0.0  ;;  %v654_v44 = vadd.f32 %v653_v40, %v652_v63  ;;  %v1483_v45 = vpack.c.bf16 %v1327_v28, %v1327_v28  ;;  %v5008_v29 = vld [vmem:[%s7501_s0 + $0x250] sm:$0xff] }
  0x98   :  { %v3730_v46 = vadd.f32 %v3729_v43, %v3728_v26  ;;  %587 = vst.msk [vmem:[%s7504_s3 + $0x8] sm:$0xf] %vm584_vm1, %v522_v37  ;;  %v851_v47 = vsel %vm649_vm2, %v786_v41, 0.0  ;;  %v1613_v48 = vsel %vm649_vm2, %v1327_v28, 0.0  ;;  %v1746_v49 = vmul.f32 %v1327_v28, %v1327_v28 }
  0x99   :  { %v852_v50 = vadd.f32 %v851_v47, %v850_v12  ;;  %4282 = vst.msk [vmem:[%s7504_s3 + $0x108] sm:$0xf] %vm584_vm1, %v1483_v45  ;;  %v1614_v51 = vadd.f32 %v1613_v48, %v1612_v8  ;;  %v2286_v52 = vpop.f32.mrf.mxu2  ;;  %v3246_v53 = vpop.f32.mrf.mxu3 }
  0x9a   :  { %v1811_v54 = vsel %vm649_vm2, %v1746_v49, 0.0  ;;  %v2287_v55 = vadd.f32 %v5265_v36, %v2286_v52  ;;  %v3247_v56 = vadd.f32 %v5265_v36, %v3246_v53  ;;  %v367_v57 = vpop.f32.mrf.mxu0  ;;  %v1328_v58 = vpop.f32.mrf.mxu1 }
  0x9b   :  { %v1812_v59 = vadd.f32 %v1811_v54, %v1810_v18  ;;  %v368_v60 = vadd.f32 %v5265_v36, %v367_v57  ;;  %v1329_v61 = vadd.f32 %v5265_v36, %v1328_v58 }
  0x9c   :  { %v2443_v62 = vpack.c.bf16 %v2287_v55, %v2287_v55  ;;  %v2573_v63 = vsel %vm649_vm2, %v2287_v55, 0.0  ;;  %v2706_v0 = vmul.f32 %v2287_v55, %v2287_v55  ;;  %v3403_v1 = vpack.c.bf16 %v3247_v56, %v3247_v56 }
  0x9d   :  { %v2574_v2 = vadd.f32 %v2573_v63, %v2572_v33  ;;  %v3533_v3 = vsel %vm649_vm2, %v3247_v56, 0.0  ;;  %v3666_v4 = vmul.f32 %v3247_v56, %v3247_v56  ;;  %v523_v5 = vpack.c.bf16 %v368_v60, %v368_v60 }
  0x9e   :  { %4576 = vst.msk [vmem:[%s7504_s3 + $0x208] sm:$0xf] %vm584_vm1, %v2443_v62  ;;  %v2771_v6 = vsel %vm649_vm2, %v2706_v0, 0.0  ;;  %v3534_v7 = vadd.f32 %v3533_v3, %v3532_v39  ;;  %v655_v8 = vsel %vm649_vm2, %v368_v60, 0.0  ;;  %v787_v9 = vmul.f32 %v368_v60, %v368_v60 }
  0x9f   :  { %v2772_v10 = vadd.f32 %v2771_v6, %v2770_v42  ;;  %4870 = vst.msk [vmem:[%s7504_s3 + $0x308] sm:$0xf] %vm584_vm1, %v3403_v1  ;;  %v3731_v11 = vsel %vm649_vm2, %v3666_v4, 0.0  ;;  %v656_v12 = vadd.f32 %v655_v8, %v654_v44  ;;  %v1484_v13 = vpack.c.bf16 %v1329_v61, %v1329_v61 }
  0xa0   :  { %v3732_v14 = vadd.f32 %v3731_v11, %v3730_v46  ;;  %588 = vst.msk [vmem:[%s7504_s3 + $0xc] sm:$0xf] %vm584_vm1, %v523_v5  ;;  %v853_v15 = vsel %vm649_vm2, %v787_v9, 0.0  ;;  %v1615_v16 = vsel %vm649_vm2, %v1329_v61, 0.0  ;;  %v1747_v17 = vmul.f32 %v1329_v61, %v1329_v61 }
  0xa1   :  { %v854_v18 = vadd.f32 %v853_v15, %v852_v50  ;;  %4283 = vst.msk [vmem:[%s7504_s3 + $0x10c] sm:$0xf] %vm584_vm1, %v1484_v13  ;;  %v1616_v19 = vadd.f32 %v1615_v16, %v1614_v51  ;;  %v2288_v20 = vpop.f32.mrf.mxu2  ;;  %v3248_v21 = vpop.f32.mrf.mxu3 }
  0xa2   :  { %v1813_v24 = vsel %vm649_vm2, %v1747_v17, 0.0  ;;  %v2289_v25 = vadd.f32 %v5265_v36, %v2288_v20  ;;  %v3249_v26 = vadd.f32 %v5265_v36, %v3248_v21  ;;  %v370_v27 = vpop.f32.mrf.mxu0  ;;  %v1331_v28 = vpop.f32.mrf.mxu1 }
  0xa3   :  { %v1814_v31 = vadd.f32 %v1813_v24, %v1812_v59  ;;  %v371_v32 = vadd.f32 %v5265_v36, %v370_v27  ;;  %v1332_v33 = vadd.f32 %v5265_v36, %v1331_v28  ;;  %v4943_v27 = vld [vmem:[%s7501_s0 + $0x58] sm:$0xff] }
  0xa4   :  { %v2444_v34 = vpack.c.bf16 %v2289_v25, %v2289_v25  ;;  %v2575_v35 = vsel %vm649_vm2, %v2289_v25, 0.0  ;;  %v2707_v37 = vmul.f32 %v2289_v25, %v2289_v25  ;;  %v3404_v38 = vpack.c.bf16 %v3249_v26, %v3249_v26  ;;  %v4976_v28 = vld [vmem:[%s7501_s0 + $0x158] sm:$0xff] }
  0xa5   :  { %v2576_v39 = vadd.f32 %v2575_v35, %v2574_v2  ;;  %v3535_v40 = vsel %vm649_vm2, %v3249_v26, 0.0  ;;  %v3667_v41 = vmul.f32 %v3249_v26, %v3249_v26  ;;  %v524_v42 = vpack.c.bf16 %v371_v32, %v371_v32  ;;  %4028 = vmatmul.msk.bf16.gmra.mxu0 %vm254_vm0, %v4942_v22  ;;  %4258 = vmatmul.msk.bf16.gmra.mxu1 %vm254_vm0, %v4975_v23  ;;  %v5042_v35 = vld [vmem:[%s7501_s0 + $0x358] sm:$0xff] }
  0xa6   :  { %4577 = vst.msk [vmem:[%s7504_s3 + $0x20c] sm:$0xf] %vm584_vm1, %v2444_v34  ;;  %v2773_v43 = vsel %vm649_vm2, %v2707_v37, 0.0  ;;  %v3536_v44 = vadd.f32 %v3535_v40, %v3534_v7  ;;  %v657_v45 = vsel %vm649_vm2, %v371_v32, 0.0  ;;  %v788_v46 = vmul.f32 %v371_v32, %v371_v32  ;;  %4552 = vmatmul.msk.bf16.gmra.mxu2 %vm254_vm0, %v5008_v29  ;;  %4846 = vmatmul.msk.bf16.gmra.mxu3 %vm254_vm0, %v5041_v30  ;;  %v5009_v34 = vld [vmem:[%s7501_s0 + $0x258] sm:$0xff] }
  0xa7   :  { %v2774_v47 = vadd.f32 %v2773_v43, %v2772_v10  ;;  %4871 = vst.msk [vmem:[%s7504_s3 + $0x30c] sm:$0xf] %vm584_vm1, %v3404_v38  ;;  %v3733_v48 = vsel %vm649_vm2, %v3667_v41, 0.0  ;;  %v658_v49 = vadd.f32 %v657_v45, %v656_v12  ;;  %v1485_v50 = vpack.c.bf16 %v1332_v33, %v1332_v33 }
  0xa8   :  { %v3734_v51 = vadd.f32 %v3733_v48, %v3732_v14  ;;  %589 = vst.msk [vmem:[%s7504_s3 + $0x10] sm:$0xf] %vm584_vm1, %v524_v42  ;;  %v855_v52 = vsel %vm649_vm2, %v788_v46, 0.0  ;;  %v1617_v53 = vsel %vm649_vm2, %v1332_v33, 0.0  ;;  %v1748_v54 = vmul.f32 %v1332_v33, %v1332_v33 }
  0xa9   :  { %v856_v55 = vadd.f32 %v855_v52, %v854_v18  ;;  %4284 = vst.msk [vmem:[%s7504_s3 + $0x110] sm:$0xf] %vm584_vm1, %v1485_v50  ;;  %v1618_v56 = vadd.f32 %v1617_v53, %v1616_v19  ;;  %v2291_v57 = vpop.f32.mrf.mxu2  ;;  %v3251_v58 = vpop.f32.mrf.mxu3 }
  0xaa   :  { %v1815_v59 = vsel %vm649_vm2, %v1748_v54, 0.0  ;;  %v2292_v60 = vadd.f32 %v5265_v36, %v2291_v57  ;;  %v3252_v61 = vadd.f32 %v5265_v36, %v3251_v58  ;;  %v372_v62 = vpop.f32.mrf.mxu0  ;;  %v1333_v63 = vpop.f32.mrf.mxu1 }
  0xab   :  { %v1816_v0 = vadd.f32 %v1815_v59, %v1814_v31  ;;  %v373_v1 = vadd.f32 %v5265_v36, %v372_v62  ;;  %v1334_v2 = vadd.f32 %v5265_v36, %v1333_v63 }
  0xac   :  { %v2445_v3 = vpack.c.bf16 %v2292_v60, %v2292_v60  ;;  %v2577_v4 = vsel %vm649_vm2, %v2292_v60, 0.0  ;;  %v2708_v5 = vmul.f32 %v2292_v60, %v2292_v60  ;;  %v3405_v6 = vpack.c.bf16 %v3252_v61, %v3252_v61 }
  0xad   :  { %v2578_v7 = vadd.f32 %v2577_v4, %v2576_v39  ;;  %v3537_v8 = vsel %vm649_vm2, %v3252_v61, 0.0  ;;  %v3668_v9 = vmul.f32 %v3252_v61, %v3252_v61  ;;  %v525_v10 = vpack.c.bf16 %v373_v1, %v373_v1 }
  0xae   :  { %4578 = vst.msk [vmem:[%s7504_s3 + $0x210] sm:$0xf] %vm584_vm1, %v2445_v3  ;;  %v2775_v11 = vsel %vm649_vm2, %v2708_v5, 0.0  ;;  %v3538_v12 = vadd.f32 %v3537_v8, %v3536_v44  ;;  %v659_v13 = vsel %vm649_vm2, %v373_v1, 0.0  ;;  %v789_v14 = vmul.f32 %v373_v1, %v373_v1 }
  0xaf   :  { %v2776_v15 = vadd.f32 %v2775_v11, %v2774_v47  ;;  %4872 = vst.msk [vmem:[%s7504_s3 + $0x310] sm:$0xf] %vm584_vm1, %v3405_v6  ;;  %v3735_v16 = vsel %vm649_vm2, %v3668_v9, 0.0  ;;  %v660_v17 = vadd.f32 %v659_v13, %v658_v49  ;;  %v1486_v18 = vpack.c.bf16 %v1334_v2, %v1334_v2 }
  0xb0   :  { %v3736_v19 = vadd.f32 %v3735_v16, %v3734_v51  ;;  %590 = vst.msk [vmem:[%s7504_s3 + $0x14] sm:$0xf] %vm584_vm1, %v525_v10  ;;  %v857_v20 = vsel %vm649_vm2, %v789_v14, 0.0  ;;  %v1619_v21 = vsel %vm649_vm2, %v1334_v2, 0.0  ;;  %v1749_v22 = vmul.f32 %v1334_v2, %v1334_v2 }
  0xb1   :  { %v858_v23 = vadd.f32 %v857_v20, %v856_v55  ;;  %4285 = vst.msk [vmem:[%s7504_s3 + $0x114] sm:$0xf] %vm584_vm1, %v1486_v18  ;;  %v1620_v24 = vadd.f32 %v1619_v21, %v1618_v56  ;;  %v2293_v25 = vpop.f32.mrf.mxu2  ;;  %v3253_v26 = vpop.f32.mrf.mxu3 }
  0xb2   :  { %v1817_v29 = vsel %vm649_vm2, %v1749_v22, 0.0  ;;  %v2294_v30 = vadd.f32 %v5265_v36, %v2293_v25  ;;  %v3254_v31 = vadd.f32 %v5265_v36, %v3253_v26  ;;  %v375_v32 = vpop.f32.mrf.mxu0  ;;  %v1336_v33 = vpop.f32.mrf.mxu1 }
  0xb3   :  { %v1818_v37 = vadd.f32 %v1817_v29, %v1816_v0  ;;  %v376_v38 = vadd.f32 %v5265_v36, %v375_v32  ;;  %v1337_v39 = vadd.f32 %v5265_v36, %v1336_v33  ;;  %v4944_v32 = vld [vmem:[%s7501_s0 + $0x60] sm:$0xff] }
  0xb4   :  { %v2446_v40 = vpack.c.bf16 %v2294_v30, %v2294_v30  ;;  %v2579_v41 = vsel %vm649_vm2, %v2294_v30, 0.0  ;;  %v2709_v42 = vmul.f32 %v2294_v30, %v2294_v30  ;;  %v3406_v43 = vpack.c.bf16 %v3254_v31, %v3254_v31  ;;  %v4977_v33 = vld [vmem:[%s7501_s0 + $0x160] sm:$0xff] }
  0xb5   :  { %v2580_v44 = vadd.f32 %v2579_v41, %v2578_v7  ;;  %v3539_v45 = vsel %vm649_vm2, %v3254_v31, 0.0  ;;  %v3669_v46 = vmul.f32 %v3254_v31, %v3254_v31  ;;  %v526_v47 = vpack.c.bf16 %v376_v38, %v376_v38  ;;  %4029 = vmatmul.msk.bf16.gmra.mxu0 %vm254_vm0, %v4943_v27  ;;  %4259 = vmatmul.msk.bf16.gmra.mxu1 %vm254_vm0, %v4976_v28  ;;  %v5043_v41 = vld [vmem:[%s7501_s0 + $0x360] sm:$0xff] }
  0xb6   :  { %4579 = vst.msk [vmem:[%s7504_s3 + $0x214] sm:$0xf] %vm584_vm1, %v2446_v40  ;;  %v2777_v48 = vsel %vm649_vm2, %v2709_v42, 0.0  ;;  %v3540_v49 = vadd.f32 %v3539_v45, %v3538_v12  ;;  %v661_v50 = vsel %vm649_vm2, %v376_v38, 0.0  ;;  %v790_v51 = vmul.f32 %v376_v38, %v376_v38  ;;  %4553 = vmatmul.msk.bf16.gmra.mxu2 %vm254_vm0, %v5009_v34  ;;  %4847 = vmatmul.msk.bf16.gmra.mxu3 %vm254_vm0, %v5042_v35  ;;  %v5010_v40 = vld [vmem:[%s7501_s0 + $0x260] sm:$0xff] }
  0xb7   :  { %v2778_v52 = vadd.f32 %v2777_v48, %v2776_v15  ;;  %4873 = vst.msk [vmem:[%s7504_s3 + $0x314] sm:$0xf] %vm584_vm1, %v3406_v43  ;;  %v3737_v53 = vsel %vm649_vm2, %v3669_v46, 0.0  ;;  %v662_v54 = vadd.f32 %v661_v50, %v660_v17  ;;  %v1487_v55 = vpack.c.bf16 %v1337_v39, %v1337_v39 }
  0xb8   :  { %v3738_v56 = vadd.f32 %v3737_v53, %v3736_v19  ;;  %591 = vst.msk [vmem:[%s7504_s3 + $0x18] sm:$0xf] %vm584_vm1, %v526_v47  ;;  %v859_v57 = vsel %vm649_vm2, %v790_v51, 0.0  ;;  %v1621_v58 = vsel %vm649_vm2, %v1337_v39, 0.0  ;;  %v1750_v59 = vmul.f32 %v1337_v39, %v1337_v39 }
  0xb9   :  { %v860_v60 = vadd.f32 %v859_v57, %v858_v23  ;;  %4286 = vst.msk [vmem:[%s7504_s3 + $0x118] sm:$0xf] %vm584_vm1, %v1487_v55  ;;  %v1622_v61 = vadd.f32 %v1621_v58, %v1620_v24  ;;  %v2296_v62 = vpop.f32.mrf.mxu2  ;;  %v3256_v63 = vpop.f32.mrf.mxu3 }
  0xba   :  { %v1819_v0 = vsel %vm649_vm2, %v1750_v59, 0.0  ;;  %v2297_v1 = vadd.f32 %v5265_v36, %v2296_v62  ;;  %v3257_v2 = vadd.f32 %v5265_v36, %v3256_v63  ;;  %v377_v3 = vpop.f32.mrf.mxu0  ;;  %v1338_v4 = vpop.f32.mrf.mxu1 }
  0xbb   :  { %v1820_v5 = vadd.f32 %v1819_v0, %v1818_v37  ;;  %v378_v6 = vadd.f32 %v5265_v36, %v377_v3  ;;  %v1339_v7 = vadd.f32 %v5265_v36, %v1338_v4 }
  0xbc   :  { %v2447_v8 = vpack.c.bf16 %v2297_v1, %v2297_v1  ;;  %v2581_v9 = vsel %vm649_vm2, %v2297_v1, 0.0  ;;  %v2710_v10 = vmul.f32 %v2297_v1, %v2297_v1  ;;  %v3407_v11 = vpack.c.bf16 %v3257_v2, %v3257_v2 }
  0xbd   :  { %v2582_v12 = vadd.f32 %v2581_v9, %v2580_v44  ;;  %v3541_v13 = vsel %vm649_vm2, %v3257_v2, 0.0  ;;  %v3670_v14 = vmul.f32 %v3257_v2, %v3257_v2  ;;  %v527_v15 = vpack.c.bf16 %v378_v6, %v378_v6 }
  0xbe   :  { %4580 = vst.msk [vmem:[%s7504_s3 + $0x218] sm:$0xf] %vm584_vm1, %v2447_v8  ;;  %v2779_v16 = vsel %vm649_vm2, %v2710_v10, 0.0  ;;  %v3542_v17 = vadd.f32 %v3541_v13, %v3540_v49  ;;  %v663_v18 = vsel %vm649_vm2, %v378_v6, 0.0  ;;  %v791_v19 = vmul.f32 %v378_v6, %v378_v6 }
  0xbf   :  { %v2780_v20 = vadd.f32 %v2779_v16, %v2778_v52  ;;  %4874 = vst.msk [vmem:[%s7504_s3 + $0x318] sm:$0xf] %vm584_vm1, %v3407_v11  ;;  %v3739_v21 = vsel %vm649_vm2, %v3670_v14, 0.0  ;;  %v664_v22 = vadd.f32 %v663_v18, %v662_v54  ;;  %v1488_v23 = vpack.c.bf16 %v1339_v7, %v1339_v7 }
  0xc0   :  { %v3740_v24 = vadd.f32 %v3739_v21, %v3738_v56  ;;  %592 = vst.msk [vmem:[%s7504_s3 + $0x1c] sm:$0xf] %vm584_vm1, %v527_v15  ;;  %v861_v25 = vsel %vm649_vm2, %v791_v19, 0.0  ;;  %v1623_v26 = vsel %vm649_vm2, %v1339_v7, 0.0  ;;  %v1751_v27 = vmul.f32 %v1339_v7, %v1339_v7 }
  0xc1   :  { %v862_v28 = vadd.f32 %v861_v25, %v860_v60  ;;  %4287 = vst.msk [vmem:[%s7504_s3 + $0x11c] sm:$0xf] %vm584_vm1, %v1488_v23  ;;  %v1624_v29 = vadd.f32 %v1623_v26, %v1622_v61  ;;  %v2298_v30 = vpop.f32.mrf.mxu2  ;;  %v3258_v31 = vpop.f32.mrf.mxu3 }
  0xc2   :  { %v1821_v34 = vsel %vm649_vm2, %v1751_v27, 0.0  ;;  %v2299_v35 = vadd.f32 %v5265_v36, %v2298_v30  ;;  %v3259_v37 = vadd.f32 %v5265_v36, %v3258_v31  ;;  %v380_v38 = vpop.f32.mrf.mxu0  ;;  %v1341_v39 = vpop.f32.mrf.mxu1 }
  0xc3   :  { %v1822_v42 = vadd.f32 %v1821_v34, %v1820_v5  ;;  %v381_v43 = vadd.f32 %v5265_v36, %v380_v38  ;;  %v1342_v44 = vadd.f32 %v5265_v36, %v1341_v39  ;;  %v4945_v38 = vld [vmem:[%s7501_s0 + $0x68] sm:$0xff] }
  0xc4   :  { %v2448_v45 = vpack.c.bf16 %v2299_v35, %v2299_v35  ;;  %v2583_v46 = vsel %vm649_vm2, %v2299_v35, 0.0  ;;  %v2711_v47 = vmul.f32 %v2299_v35, %v2299_v35  ;;  %v3408_v48 = vpack.c.bf16 %v3259_v37, %v3259_v37  ;;  %v4978_v39 = vld [vmem:[%s7501_s0 + $0x168] sm:$0xff] }
  0xc5   :  { %v2584_v49 = vadd.f32 %v2583_v46, %v2582_v12  ;;  %v3543_v50 = vsel %vm649_vm2, %v3259_v37, 0.0  ;;  %v3671_v51 = vmul.f32 %v3259_v37, %v3259_v37  ;;  %v528_v52 = vpack.c.bf16 %v381_v43, %v381_v43  ;;  %4030 = vmatmul.msk.bf16.gmra.mxu0 %vm254_vm0, %v4944_v32  ;;  %4260 = vmatmul.msk.bf16.gmra.mxu1 %vm254_vm0, %v4977_v33  ;;  %v5044_v46 = vld [vmem:[%s7501_s0 + $0x368] sm:$0xff] }
  0xc6   :  { %4581 = vst.msk [vmem:[%s7504_s3 + $0x21c] sm:$0xf] %vm584_vm1, %v2448_v45  ;;  %v2781_v53 = vsel %vm649_vm2, %v2711_v47, 0.0  ;;  %v3544_v54 = vadd.f32 %v3543_v50, %v3542_v17  ;;  %v665_v55 = vsel %vm649_vm2, %v381_v43, 0.0  ;;  %v792_v56 = vmul.f32 %v381_v43, %v381_v43  ;;  %4554 = vmatmul.msk.bf16.gmra.mxu2 %vm254_vm0, %v5010_v40  ;;  %4848 = vmatmul.msk.bf16.gmra.mxu3 %vm254_vm0, %v5043_v41  ;;  %v5011_v45 = vld [vmem:[%s7501_s0 + $0x268] sm:$0xff] }
  0xc7   :  { %v2782_v57 = vadd.f32 %v2781_v53, %v2780_v20  ;;  %4875 = vst.msk [vmem:[%s7504_s3 + $0x31c] sm:$0xf] %vm584_vm1, %v3408_v48  ;;  %v3741_v58 = vsel %vm649_vm2, %v3671_v51, 0.0  ;;  %v666_v59 = vadd.f32 %v665_v55, %v664_v22  ;;  %v1489_v60 = vpack.c.bf16 %v1342_v44, %v1342_v44 }
  0xc8   :  { %v3742_v61 = vadd.f32 %v3741_v58, %v3740_v24  ;;  %593 = vst.msk [vmem:[%s7504_s3 + $0x20] sm:$0xf] %vm584_vm1, %v528_v52  ;;  %v863_v62 = vsel %vm649_vm2, %v792_v56, 0.0  ;;  %v1625_v63 = vsel %vm649_vm2, %v1342_v44, 0.0  ;;  %v1752_v0 = vmul.f32 %v1342_v44, %v1342_v44 }
  0xc9   :  { %v864_v1 = vadd.f32 %v863_v62, %v862_v28  ;;  %4288 = vst.msk [vmem:[%s7504_s3 + $0x120] sm:$0xf] %vm584_vm1, %v1489_v60  ;;  %v1626_v2 = vadd.f32 %v1625_v63, %v1624_v29  ;;  %v2301_v3 = vpop.f32.mrf.mxu2  ;;  %v3261_v4 = vpop.f32.mrf.mxu3 }
  0xca   :  { %v1823_v5 = vsel %vm649_vm2, %v1752_v0, 0.0  ;;  %v2302_v6 = vadd.f32 %v5265_v36, %v2301_v3  ;;  %v3262_v7 = vadd.f32 %v5265_v36, %v3261_v4  ;;  %v382_v8 = vpop.f32.mrf.mxu0  ;;  %v1343_v9 = vpop.f32.mrf.mxu1 }
  0xcb   :  { %v1824_v10 = vadd.f32 %v1823_v5, %v1822_v42  ;;  %v383_v11 = vadd.f32 %v5265_v36, %v382_v8  ;;  %v1344_v12 = vadd.f32 %v5265_v36, %v1343_v9 }
  0xcc   :  { %v2449_v13 = vpack.c.bf16 %v2302_v6, %v2302_v6  ;;  %v2585_v14 = vsel %vm649_vm2, %v2302_v6, 0.0  ;;  %v2712_v15 = vmul.f32 %v2302_v6, %v2302_v6  ;;  %v3409_v16 = vpack.c.bf16 %v3262_v7, %v3262_v7 }
  0xcd   :  { %v2586_v17 = vadd.f32 %v2585_v14, %v2584_v49  ;;  %v3545_v18 = vsel %vm649_vm2, %v3262_v7, 0.0  ;;  %v3672_v19 = vmul.f32 %v3262_v7, %v3262_v7  ;;  %v529_v20 = vpack.c.bf16 %v383_v11, %v383_v11 }
  0xce   :  { %4582 = vst.msk [vmem:[%s7504_s3 + $0x220] sm:$0xf] %vm584_vm1, %v2449_v13  ;;  %v2783_v21 = vsel %vm649_vm2, %v2712_v15, 0.0  ;;  %v3546_v22 = vadd.f32 %v3545_v18, %v3544_v54  ;;  %v667_v23 = vsel %vm649_vm2, %v383_v11, 0.0  ;;  %v793_v24 = vmul.f32 %v383_v11, %v383_v11 }
  0xcf   :  { %v2784_v25 = vadd.f32 %v2783_v21, %v2782_v57  ;;  %4876 = vst.msk [vmem:[%s7504_s3 + $0x320] sm:$0xf] %vm584_vm1, %v3409_v16  ;;  %v3743_v26 = vsel %vm649_vm2, %v3672_v19, 0.0  ;;  %v668_v27 = vadd.f32 %v667_v23, %v666_v59  ;;  %v1490_v28 = vpack.c.bf16 %v1344_v12, %v1344_v12 }
  0xd0   :  { %v3744_v29 = vadd.f32 %v3743_v26, %v3742_v61  ;;  %594 = vst.msk [vmem:[%s7504_s3 + $0x24] sm:$0xf] %vm584_vm1, %v529_v20  ;;  %v865_v30 = vsel %vm649_vm2, %v793_v24, 0.0  ;;  %v1627_v31 = vsel %vm649_vm2, %v1344_v12, 0.0  ;;  %v1753_v32 = vmul.f32 %v1344_v12, %v1344_v12 }
  0xd1   :  { %v866_v33 = vadd.f32 %v865_v30, %v864_v1  ;;  %4289 = vst.msk [vmem:[%s7504_s3 + $0x124] sm:$0xf] %vm584_vm1, %v1490_v28  ;;  %v1628_v34 = vadd.f32 %v1627_v31, %v1626_v2  ;;  %v2303_v35 = vpop.f32.mrf.mxu2  ;;  %v3263_v37 = vpop.f32.mrf.mxu3 }
  0xd2   :  { %v1825_v40 = vsel %vm649_vm2, %v1753_v32, 0.0  ;;  %v2304_v41 = vadd.f32 %v5265_v36, %v2303_v35  ;;  %v3264_v42 = vadd.f32 %v5265_v36, %v3263_v37  ;;  %v385_v43 = vpop.f32.mrf.mxu0  ;;  %v1346_v44 = vpop.f32.mrf.mxu1 }
  0xd3   :  { %v1826_v47 = vadd.f32 %v1825_v40, %v1824_v10  ;;  %v386_v48 = vadd.f32 %v5265_v36, %v385_v43  ;;  %v1347_v49 = vadd.f32 %v5265_v36, %v1346_v44  ;;  %v4946_v43 = vld [vmem:[%s7501_s0 + $0x70] sm:$0xff] }
  0xd4   :  { %v2450_v50 = vpack.c.bf16 %v2304_v41, %v2304_v41  ;;  %v2587_v51 = vsel %vm649_vm2, %v2304_v41, 0.0  ;;  %v2713_v52 = vmul.f32 %v2304_v41, %v2304_v41  ;;  %v3410_v53 = vpack.c.bf16 %v3264_v42, %v3264_v42  ;;  %v4979_v44 = vld [vmem:[%s7501_s0 + $0x170] sm:$0xff] }
  0xd5   :  { %v2588_v54 = vadd.f32 %v2587_v51, %v2586_v17  ;;  %v3547_v55 = vsel %vm649_vm2, %v3264_v42, 0.0  ;;  %v3673_v56 = vmul.f32 %v3264_v42, %v3264_v42  ;;  %v530_v57 = vpack.c.bf16 %v386_v48, %v386_v48  ;;  %4031 = vmatmul.msk.bf16.gmra.mxu0 %vm254_vm0, %v4945_v38  ;;  %4261 = vmatmul.msk.bf16.gmra.mxu1 %vm254_vm0, %v4978_v39  ;;  %v5045_v51 = vld [vmem:[%s7501_s0 + $0x370] sm:$0xff] }
  0xd6   :  { %4583 = vst.msk [vmem:[%s7504_s3 + $0x224] sm:$0xf] %vm584_vm1, %v2450_v50  ;;  %v2785_v58 = vsel %vm649_vm2, %v2713_v52, 0.0  ;;  %v3548_v59 = vadd.f32 %v3547_v55, %v3546_v22  ;;  %v669_v60 = vsel %vm649_vm2, %v386_v48, 0.0  ;;  %v794_v61 = vmul.f32 %v386_v48, %v386_v48  ;;  %4555 = vmatmul.msk.bf16.gmra.mxu2 %vm254_vm0, %v5011_v45  ;;  %4849 = vmatmul.msk.bf16.gmra.mxu3 %vm254_vm0, %v5044_v46  ;;  %v5012_v50 = vld [vmem:[%s7501_s0 + $0x270] sm:$0xff] }
  0xd7   :  { %v2786_v62 = vadd.f32 %v2785_v58, %v2784_v25  ;;  %4877 = vst.msk [vmem:[%s7504_s3 + $0x324] sm:$0xf] %vm584_vm1, %v3410_v53  ;;  %v3745_v63 = vsel %vm649_vm2, %v3673_v56, 0.0  ;;  %v670_v0 = vadd.f32 %v669_v60, %v668_v27  ;;  %v1491_v1 = vpack.c.bf16 %v1347_v49, %v1347_v49 }
  0xd8   :  { %v3746_v2 = vadd.f32 %v3745_v63, %v3744_v29  ;;  %595 = vst.msk [vmem:[%s7504_s3 + $0x28] sm:$0xf] %vm584_vm1, %v530_v57  ;;  %v867_v3 = vsel %vm649_vm2, %v794_v61, 0.0  ;;  %v1629_v4 = vsel %vm649_vm2, %v1347_v49, 0.0  ;;  %v1754_v5 = vmul.f32 %v1347_v49, %v1347_v49 }
  0xd9   :  { %v868_v6 = vadd.f32 %v867_v3, %v866_v33  ;;  %4290 = vst.msk [vmem:[%s7504_s3 + $0x128] sm:$0xf] %vm584_vm1, %v1491_v1  ;;  %v1630_v7 = vadd.f32 %v1629_v4, %v1628_v34  ;;  %v2306_v8 = vpop.f32.mrf.mxu2  ;;  %v3266_v9 = vpop.f32.mrf.mxu3 }
  0xda   :  { %v1827_v10 = vsel %vm649_vm2, %v1754_v5, 0.0  ;;  %v2307_v11 = vadd.f32 %v5265_v36, %v2306_v8  ;;  %v3267_v12 = vadd.f32 %v5265_v36, %v3266_v9  ;;  %v387_v13 = vpop.f32.mrf.mxu0  ;;  %v1348_v14 = vpop.f32.mrf.mxu1 }
  0xdb   :  { %v1828_v15 = vadd.f32 %v1827_v10, %v1826_v47  ;;  %v388_v16 = vadd.f32 %v5265_v36, %v387_v13  ;;  %v1349_v17 = vadd.f32 %v5265_v36, %v1348_v14 }
  0xdc   :  { %v2451_v18 = vpack.c.bf16 %v2307_v11, %v2307_v11  ;;  %v2589_v19 = vsel %vm649_vm2, %v2307_v11, 0.0  ;;  %v2714_v20 = vmul.f32 %v2307_v11, %v2307_v11  ;;  %v3411_v21 = vpack.c.bf16 %v3267_v12, %v3267_v12 }
  0xdd   :  { %v2590_v22 = vadd.f32 %v2589_v19, %v2588_v54  ;;  %v3549_v23 = vsel %vm649_vm2, %v3267_v12, 0.0  ;;  %v3674_v24 = vmul.f32 %v3267_v12, %v3267_v12  ;;  %v531_v25 = vpack.c.bf16 %v388_v16, %v388_v16 }
  0xde   :  { %4584 = vst.msk [vmem:[%s7504_s3 + $0x228] sm:$0xf] %vm584_vm1, %v2451_v18  ;;  %v2787_v26 = vsel %vm649_vm2, %v2714_v20, 0.0  ;;  %v3550_v27 = vadd.f32 %v3549_v23, %v3548_v59  ;;  %v671_v28 = vsel %vm649_vm2, %v388_v16, 0.0  ;;  %v795_v29 = vmul.f32 %v388_v16, %v388_v16 }
  0xdf   :  { %v2788_v30 = vadd.f32 %v2787_v26, %v2786_v62  ;;  %4878 = vst.msk [vmem:[%s7504_s3 + $0x328] sm:$0xf] %vm584_vm1, %v3411_v21  ;;  %v3747_v31 = vsel %vm649_vm2, %v3674_v24, 0.0  ;;  %v672_v32 = vadd.f32 %v671_v28, %v670_v0  ;;  %v1492_v33 = vpack.c.bf16 %v1349_v17, %v1349_v17 }
  0xe0   :  { %v3748_v34 = vadd.f32 %v3747_v31, %v3746_v2  ;;  %596 = vst.msk [vmem:[%s7504_s3 + $0x2c] sm:$0xf] %vm584_vm1, %v531_v25  ;;  %v869_v35 = vsel %vm649_vm2, %v795_v29, 0.0  ;;  %v1631_v37 = vsel %vm649_vm2, %v1349_v17, 0.0  ;;  %v1755_v38 = vmul.f32 %v1349_v17, %v1349_v17 }
  0xe1   :  { %v870_v39 = vadd.f32 %v869_v35, %v868_v6  ;;  %4291 = vst.msk [vmem:[%s7504_s3 + $0x12c] sm:$0xf] %vm584_vm1, %v1492_v33  ;;  %v1632_v40 = vadd.f32 %v1631_v37, %v1630_v7  ;;  %v2308_v41 = vpop.f32.mrf.mxu2  ;;  %v3268_v42 = vpop.f32.mrf.mxu3 }
  0xe2   :  { %v1829_v45 = vsel %vm649_vm2, %v1755_v38, 0.0  ;;  %v2309_v46 = vadd.f32 %v5265_v36, %v2308_v41  ;;  %v3269_v47 = vadd.f32 %v5265_v36, %v3268_v42  ;;  %v390_v48 = vpop.f32.mrf.mxu0  ;;  %v1351_v49 = vpop.f32.mrf.mxu1 }
  0xe3   :  { %v1830_v52 = vadd.f32 %v1829_v45, %v1828_v15  ;;  %v391_v53 = vadd.f32 %v5265_v36, %v390_v48  ;;  %v1352_v54 = vadd.f32 %v5265_v36, %v1351_v49  ;;  %v4980_v48 = vld [vmem:[%s7501_s0 + $0x178] sm:$0xff] }
  0xe4   :  { %v2452_v55 = vpack.c.bf16 %v2309_v46, %v2309_v46  ;;  %v2591_v56 = vsel %vm649_vm2, %v2309_v46, 0.0  ;;  %v2715_v57 = vmul.f32 %v2309_v46, %v2309_v46  ;;  %v3412_v58 = vpack.c.bf16 %v3269_v47, %v3269_v47 }
  0xe5   :  { %v2592_v59 = vadd.f32 %v2591_v56, %v2590_v22  ;;  %v3551_v60 = vsel %vm649_vm2, %v3269_v47, 0.0  ;;  %v3675_v61 = vmul.f32 %v3269_v47, %v3269_v47  ;;  %v532_v62 = vpack.c.bf16 %v391_v53, %v391_v53  ;;  %4032 = vmatmul.msk.bf16.gmra.mxu0 %vm254_vm0, %v4946_v43  ;;  %4262 = vmatmul.msk.bf16.gmra.mxu1 %vm254_vm0, %v4979_v44  ;;  %v4947_v47 = vld [vmem:[%s7501_s0 + $0x78] sm:$0xff] }
  0xe6   :  { %4585 = vst.msk [vmem:[%s7504_s3 + $0x22c] sm:$0xf] %vm584_vm1, %v2452_v55  ;;  %v2789_v63 = vsel %vm649_vm2, %v2715_v57, 0.0  ;;  %v3552_v0 = vadd.f32 %v3551_v60, %v3550_v27  ;;  %v673_v1 = vsel %vm649_vm2, %v391_v53, 0.0  ;;  %v796_v2 = vmul.f32 %v391_v53, %v391_v53  ;;  %4556 = vmatmul.msk.bf16.gmra.mxu2 %vm254_vm0, %v5012_v50  ;;  %4850 = vmatmul.msk.bf16.gmra.mxu3 %vm254_vm0, %v5045_v51  ;;  %v5766_v50 = vld [vmem:[%s7503_s2] ss:$0 sm:$0xff] }
  0xe7   :  { %v2790_v3 = vadd.f32 %v2789_v63, %v2788_v30  ;;  %4879 = vst.msk [vmem:[%s7504_s3 + $0x32c] sm:$0xf] %vm584_vm1, %v3412_v58  ;;  %v3749_v4 = vsel %vm649_vm2, %v3675_v61, 0.0  ;;  %v674_v5 = vadd.f32 %v673_v1, %v672_v32  ;;  %v1493_v6 = vpack.c.bf16 %v1352_v54, %v1352_v54  ;;  %v5013_v55 = vld [vmem:[%s7501_s0 + $0x278] sm:$0xff] }
  0xe8   :  { %v3750_v7 = vadd.f32 %v3749_v4, %v3748_v34  ;;  %597 = vst.msk [vmem:[%s7504_s3 + $0x30] sm:$0xf] %vm584_vm1, %v532_v62  ;;  %v871_v8 = vsel %vm649_vm2, %v796_v2, 0.0  ;;  %v1633_v9 = vsel %vm649_vm2, %v1352_v54, 0.0  ;;  %v1756_v10 = vmul.f32 %v1352_v54, %v1352_v54  ;;  %v5046_v56 = vld [vmem:[%s7501_s0 + $0x378] sm:$0xff] }
  0xe9   :  { %v872_v11 = vadd.f32 %v871_v8, %v870_v39  ;;  %4292 = vst.msk [vmem:[%s7504_s3 + $0x130] sm:$0xf] %vm584_vm1, %v1493_v6  ;;  %v1634_v12 = vadd.f32 %v1633_v9, %v1632_v40  ;;  %v2311_v13 = vpop.f32.mrf.mxu2  ;;  %v3271_v14 = vpop.f32.mrf.mxu3 }
  0xea   :  { %v1831_v15 = vsel %vm649_vm2, %v1756_v10, 0.0  ;;  %v2312_v16 = vadd.f32 %v5265_v36, %v2311_v13  ;;  %v3272_v17 = vadd.f32 %v5265_v36, %v3271_v14  ;;  %v392_v18 = vpop.f32.mrf.mxu0  ;;  %v1353_v19 = vpop.f32.mrf.mxu1 }
  0xeb   :  { %v1832_v20 = vadd.f32 %v1831_v15, %v1830_v52  ;;  %v393_v21 = vadd.f32 %v5265_v36, %v392_v18  ;;  %v1354_v22 = vadd.f32 %v5265_v36, %v1353_v19 }
  0xec   :  { %v2453_v23 = vpack.c.bf16 %v2312_v16, %v2312_v16  ;;  %v2593_v24 = vsel %vm649_vm2, %v2312_v16, 0.0  ;;  %v2716_v25 = vmul.f32 %v2312_v16, %v2312_v16  ;;  %v3413_v26 = vpack.c.bf16 %v3272_v17, %v3272_v17 }
  0xed   :  { %v2594_v27 = vadd.f32 %v2593_v24, %v2592_v59  ;;  %v3553_v28 = vsel %vm649_vm2, %v3272_v17, 0.0  ;;  %v3676_v29 = vmul.f32 %v3272_v17, %v3272_v17  ;;  %v533_v30 = vpack.c.bf16 %v393_v21, %v393_v21 }
  0xee   :  { %4586 = vst.msk [vmem:[%s7504_s3 + $0x230] sm:$0xf] %vm584_vm1, %v2453_v23  ;;  %v2791_v31 = vsel %vm649_vm2, %v2716_v25, 0.0  ;;  %v3554_v32 = vadd.f32 %v3553_v28, %v3552_v0  ;;  %v675_v36 = vsel %vm649_vm2, %v393_v21, 0.0  ;;  %v797_v33 = vmul.f32 %v393_v21, %v393_v21 }
  0xef   :  { %v2792_v34 = vadd.f32 %v2791_v31, %v2790_v3  ;;  %4880 = vst.msk [vmem:[%s7504_s3 + $0x330] sm:$0xf] %vm584_vm1, %v3413_v26  ;;  %v3751_v35 = vsel %vm649_vm2, %v3676_v29, 0.0  ;;  %v676_v37 = vadd.f32 %v675_v36, %v674_v5  ;;  %v1494_v38 = vpack.c.bf16 %v1354_v22, %v1354_v22 }
  0xf0   :  { %v3752_v39 = vadd.f32 %v3751_v35, %v3750_v7  ;;  %598 = vst.msk [vmem:[%s7504_s3 + $0x34] sm:$0xf] %vm584_vm1, %v533_v30  ;;  %v873_v40 = vsel %vm649_vm2, %v797_v33, 0.0  ;;  %v1635_v41 = vsel %vm649_vm2, %v1354_v22, 0.0  ;;  %v1757_v42 = vmul.f32 %v1354_v22, %v1354_v22 }
  0xf1   :  { %v874_v43 = vadd.f32 %v873_v40, %v872_v11  ;;  %4293 = vst.msk [vmem:[%s7504_s3 + $0x134] sm:$0xf] %vm584_vm1, %v1494_v38  ;;  %v1636_v44 = vadd.f32 %v1635_v41, %v1634_v12  ;;  %v2313_v45 = vpop.f32.mrf.mxu2  ;;  %v3273_v46 = vpop.f32.mrf.mxu3 }
  0xf2   :  { %v1833_v49 = vsel %vm649_vm2, %v1757_v42, 0.0  ;;  %v2314_v51 = vadd.f32 %v5766_v50, %v2313_v45  ;;  %v3274_v52 = vadd.f32 %v5766_v50, %v3273_v46  ;;  %v395_v53 = vpop.f32.mrf.mxu0  ;;  %v1356_v54 = vpop.f32.mrf.mxu1 }
  0xf3   :  { %v1834_v57 = vadd.f32 %v1833_v49, %v1832_v20  ;;  %v396_v58 = vadd.f32 %v5766_v50, %v395_v53  ;;  %v1357_v59 = vadd.f32 %v5766_v50, %v1356_v54  ;;  %v4948_v53 = vld [vmem:[%s7501_s0 + $0x80] sm:$0xff] }
  0xf4   :  { %v2454_v60 = vpack.c.bf16 %v2314_v51, %v2314_v51  ;;  %v2595_v61 = vsel %vm649_vm2, %v2314_v51, 0.0  ;;  %v2717_v62 = vmul.f32 %v2314_v51, %v2314_v51  ;;  %v3414_v63 = vpack.c.bf16 %v3274_v52, %v3274_v52  ;;  %v4981_v54 = vld [vmem:[%s7501_s0 + $0x180] sm:$0xff] }
  0xf5   :  { %v2596_v0 = vadd.f32 %v2595_v61, %v2594_v27  ;;  %v3555_v1 = vsel %vm649_vm2, %v3274_v52, 0.0  ;;  %v3677_v2 = vmul.f32 %v3274_v52, %v3274_v52  ;;  %v534_v3 = vpack.c.bf16 %v396_v58, %v396_v58  ;;  %4033 = vmatmul.msk.bf16.gmra.mxu0 %vm254_vm0, %v4947_v47  ;;  %4263 = vmatmul.msk.bf16.gmra.mxu1 %vm254_vm0, %v4980_v48  ;;  %v5047_v61 = vld [vmem:[%s7501_s0 + $0x380] sm:$0xff] }
  0xf6   :  { %4587 = vst.msk [vmem:[%s7504_s3 + $0x234] sm:$0xf] %vm584_vm1, %v2454_v60  ;;  %v2793_v4 = vsel %vm649_vm2, %v2717_v62, 0.0  ;;  %v3556_v5 = vadd.f32 %v3555_v1, %v3554_v32  ;;  %v677_v6 = vsel %vm649_vm2, %v396_v58, 0.0  ;;  %v798_v7 = vmul.f32 %v396_v58, %v396_v58  ;;  %4557 = vmatmul.msk.bf16.gmra.mxu2 %vm254_vm0, %v5013_v55  ;;  %4851 = vmatmul.msk.bf16.gmra.mxu3 %vm254_vm0, %v5046_v56  ;;  %v5014_v60 = vld [vmem:[%s7501_s0 + $0x280] sm:$0xff] }
  0xf7   :  { %v2794_v8 = vadd.f32 %v2793_v4, %v2792_v34  ;;  %4881 = vst.msk [vmem:[%s7504_s3 + $0x334] sm:$0xf] %vm584_vm1, %v3414_v63  ;;  %v3753_v9 = vsel %vm649_vm2, %v3677_v2, 0.0  ;;  %v678_v10 = vadd.f32 %v677_v6, %v676_v37  ;;  %v1495_v11 = vpack.c.bf16 %v1357_v59, %v1357_v59 }
  0xf8   :  { %v3754_v12 = vadd.f32 %v3753_v9, %v3752_v39  ;;  %599 = vst.msk [vmem:[%s7504_s3 + $0x38] sm:$0xf] %vm584_vm1, %v534_v3  ;;  %v875_v13 = vsel %vm649_vm2, %v798_v7, 0.0  ;;  %v1637_v14 = vsel %vm649_vm2, %v1357_v59, 0.0  ;;  %v1758_v15 = vmul.f32 %v1357_v59, %v1357_v59 }
  0xf9   :  { %v876_v16 = vadd.f32 %v875_v13, %v874_v43  ;;  %4294 = vst.msk [vmem:[%s7504_s3 + $0x138] sm:$0xf] %vm584_vm1, %v1495_v11  ;;  %v1638_v17 = vadd.f32 %v1637_v14, %v1636_v44  ;;  %v2316_v18 = vpop.f32.mrf.mxu2  ;;  %v3276_v19 = vpop.f32.mrf.mxu3 }
  0xfa   :  { %v1835_v20 = vsel %vm649_vm2, %v1758_v15, 0.0  ;;  %v2317_v21 = vadd.f32 %v5766_v50, %v2316_v18  ;;  %v3277_v22 = vadd.f32 %v5766_v50, %v3276_v19  ;;  %v397_v23 = vpop.f32.mrf.mxu0  ;;  %v1358_v24 = vpop.f32.mrf.mxu1 }
  0xfb   :  { %v1836_v25 = vadd.f32 %v1835_v20, %v1834_v57  ;;  %v398_v26 = vadd.f32 %v5766_v50, %v397_v23  ;;  %v1359_v27 = vadd.f32 %v5766_v50, %v1358_v24 }
  0xfc   :  { %v2455_v28 = vpack.c.bf16 %v2317_v21, %v2317_v21  ;;  %v2597_v29 = vsel %vm649_vm2, %v2317_v21, 0.0  ;;  %v2718_v30 = vmul.f32 %v2317_v21, %v2317_v21  ;;  %v3415_v31 = vpack.c.bf16 %v3277_v22, %v3277_v22 }
  0xfd   :  { %v2598_v32 = vadd.f32 %v2597_v29, %v2596_v0  ;;  %v3557_v36 = vsel %vm649_vm2, %v3277_v22, 0.0  ;;  %v3678_v33 = vmul.f32 %v3277_v22, %v3277_v22  ;;  %v535_v34 = vpack.c.bf16 %v398_v26, %v398_v26 }
  0xfe   :  { %4588 = vst.msk [vmem:[%s7504_s3 + $0x238] sm:$0xf] %vm584_vm1, %v2455_v28  ;;  %v2795_v35 = vsel %vm649_vm2, %v2718_v30, 0.0  ;;  %v3558_v37 = vadd.f32 %v3557_v36, %v3556_v5  ;;  %v679_v38 = vsel %vm649_vm2, %v398_v26, 0.0  ;;  %v799_v39 = vmul.f32 %v398_v26, %v398_v26 }
  0xff   :  { %v2796_v40 = vadd.f32 %v2795_v35, %v2794_v8  ;;  %4882 = vst.msk [vmem:[%s7504_s3 + $0x338] sm:$0xf] %vm584_vm1, %v3415_v31  ;;  %v3755_v41 = vsel %vm649_vm2, %v3678_v33, 0.0  ;;  %v680_v42 = vadd.f32 %v679_v38, %v678_v10  ;;  %v1496_v43 = vpack.c.bf16 %v1359_v27, %v1359_v27 }
 0x100   :  { %v3756_v44 = vadd.f32 %v3755_v41, %v3754_v12  ;;  %600 = vst.msk [vmem:[%s7504_s3 + $0x3c] sm:$0xf] %vm584_vm1, %v535_v34  ;;  %v877_v45 = vsel %vm649_vm2, %v799_v39, 0.0  ;;  %v1639_v46 = vsel %vm649_vm2, %v1359_v27, 0.0  ;;  %v1759_v47 = vmul.f32 %v1359_v27, %v1359_v27 }
 0x101   :  { %v878_v48 = vadd.f32 %v877_v45, %v876_v16  ;;  %4295 = vst.msk [vmem:[%s7504_s3 + $0x13c] sm:$0xf] %vm584_vm1, %v1496_v43  ;;  %v1640_v49 = vadd.f32 %v1639_v46, %v1638_v17  ;;  %v2318_v51 = vpop.f32.mrf.mxu2  ;;  %v3278_v52 = vpop.f32.mrf.mxu3 }
 0x102   :  { %v1837_v55 = vsel %vm649_vm2, %v1759_v47, 0.0  ;;  %v2319_v56 = vadd.f32 %v5766_v50, %v2318_v51  ;;  %v3279_v57 = vadd.f32 %v5766_v50, %v3278_v52  ;;  %v400_v58 = vpop.f32.mrf.mxu0  ;;  %v1361_v59 = vpop.f32.mrf.mxu1 }
 0x103   :  { %v1838_v62 = vadd.f32 %v1837_v55, %v1836_v25  ;;  %v401_v63 = vadd.f32 %v5766_v50, %v400_v58  ;;  %v1362_v0 = vadd.f32 %v5766_v50, %v1361_v59  ;;  %v4949_v58 = vld [vmem:[%s7501_s0 + $0x88] sm:$0xff] }
 0x104   :  { %v2456_v1 = vpack.c.bf16 %v2319_v56, %v2319_v56  ;;  %v2599_v2 = vsel %vm649_vm2, %v2319_v56, 0.0  ;;  %v2719_v3 = vmul.f32 %v2319_v56, %v2319_v56  ;;  %v3416_v4 = vpack.c.bf16 %v3279_v57, %v3279_v57  ;;  %v4982_v59 = vld [vmem:[%s7501_s0 + $0x188] sm:$0xff] }
 0x105   :  { %v2600_v5 = vadd.f32 %v2599_v2, %v2598_v32  ;;  %v3559_v6 = vsel %vm649_vm2, %v3279_v57, 0.0  ;;  %v3679_v7 = vmul.f32 %v3279_v57, %v3279_v57  ;;  %v536_v8 = vpack.c.bf16 %v401_v63, %v401_v63  ;;  %4034 = vmatmul.msk.bf16.gmra.mxu0 %vm254_vm0, %v4948_v53  ;;  %4264 = vmatmul.msk.bf16.gmra.mxu1 %vm254_vm0, %v4981_v54  ;;  %v5048_v2 = vld [vmem:[%s7501_s0 + $0x388] sm:$0xff] }
 0x106   :  { %4589 = vst.msk [vmem:[%s7504_s3 + $0x23c] sm:$0xf] %vm584_vm1, %v2456_v1  ;;  %v2797_v9 = vsel %vm649_vm2, %v2719_v3, 0.0  ;;  %v3560_v10 = vadd.f32 %v3559_v6, %v3558_v37  ;;  %v681_v11 = vsel %vm649_vm2, %v401_v63, 0.0  ;;  %v800_v12 = vmul.f32 %v401_v63, %v401_v63  ;;  %4558 = vmatmul.msk.bf16.gmra.mxu2 %vm254_vm0, %v5014_v60  ;;  %4852 = vmatmul.msk.bf16.gmra.mxu3 %vm254_vm0, %v5047_v61  ;;  %v5015_v1 = vld [vmem:[%s7501_s0 + $0x288] sm:$0xff] }
 0x107   :  { %v2798_v13 = vadd.f32 %v2797_v9, %v2796_v40  ;;  %4883 = vst.msk [vmem:[%s7504_s3 + $0x33c] sm:$0xf] %vm584_vm1, %v3416_v4  ;;  %v3757_v14 = vsel %vm649_vm2, %v3679_v7, 0.0  ;;  %v682_v15 = vadd.f32 %v681_v11, %v680_v42  ;;  %v1497_v16 = vpack.c.bf16 %v1362_v0, %v1362_v0 }
 0x108   :  { %v3758_v17 = vadd.f32 %v3757_v14, %v3756_v44  ;;  %601 = vst.msk [vmem:[%s7504_s3 + $0x40] sm:$0xf] %vm584_vm1, %v536_v8  ;;  %v879_v18 = vsel %vm649_vm2, %v800_v12, 0.0  ;;  %v1641_v19 = vsel %vm649_vm2, %v1362_v0, 0.0  ;;  %v1760_v20 = vmul.f32 %v1362_v0, %v1362_v0 }
 0x109   :  { %v880_v21 = vadd.f32 %v879_v18, %v878_v48  ;;  %4296 = vst.msk [vmem:[%s7504_s3 + $0x140] sm:$0xf] %vm584_vm1, %v1497_v16  ;;  %v1642_v22 = vadd.f32 %v1641_v19, %v1640_v49  ;;  %v2321_v23 = vpop.f32.mrf.mxu2  ;;  %v3281_v24 = vpop.f32.mrf.mxu3 }
 0x10a   :  { %v1839_v25 = vsel %vm649_vm2, %v1760_v20, 0.0  ;;  %v2322_v26 = vadd.f32 %v5766_v50, %v2321_v23  ;;  %v3282_v27 = vadd.f32 %v5766_v50, %v3281_v24  ;;  %v402_v28 = vpop.f32.mrf.mxu0  ;;  %v1363_v29 = vpop.f32.mrf.mxu1 }
 0x10b   :  { %v1840_v30 = vadd.f32 %v1839_v25, %v1838_v62  ;;  %v403_v31 = vadd.f32 %v5766_v50, %v402_v28  ;;  %v1364_v32 = vadd.f32 %v5766_v50, %v1363_v29 }
 0x10c   :  { %v2457_v36 = vpack.c.bf16 %v2322_v26, %v2322_v26  ;;  %v2601_v33 = vsel %vm649_vm2, %v2322_v26, 0.0  ;;  %v2720_v34 = vmul.f32 %v2322_v26, %v2322_v26  ;;  %v3417_v35 = vpack.c.bf16 %v3282_v27, %v3282_v27 }
 0x10d   :  { %v2602_v37 = vadd.f32 %v2601_v33, %v2600_v5  ;;  %v3561_v38 = vsel %vm649_vm2, %v3282_v27, 0.0  ;;  %v3680_v39 = vmul.f32 %v3282_v27, %v3282_v27  ;;  %v537_v40 = vpack.c.bf16 %v403_v31, %v403_v31 }
 0x10e   :  { %4590 = vst.msk [vmem:[%s7504_s3 + $0x240] sm:$0xf] %vm584_vm1, %v2457_v36  ;;  %v2799_v41 = vsel %vm649_vm2, %v2720_v34, 0.0  ;;  %v3562_v42 = vadd.f32 %v3561_v38, %v3560_v10  ;;  %v683_v43 = vsel %vm649_vm2, %v403_v31, 0.0  ;;  %v801_v44 = vmul.f32 %v403_v31, %v403_v31 }
 0x10f   :  { %v2800_v45 = vadd.f32 %v2799_v41, %v2798_v13  ;;  %4884 = vst.msk [vmem:[%s7504_s3 + $0x340] sm:$0xf] %vm584_vm1, %v3417_v35  ;;  %v3759_v46 = vsel %vm649_vm2, %v3680_v39, 0.0  ;;  %v684_v47 = vadd.f32 %v683_v43, %v682_v15  ;;  %v1498_v48 = vpack.c.bf16 %v1364_v32, %v1364_v32 }
 0x110   :  { %v3760_v49 = vadd.f32 %v3759_v46, %v3758_v17  ;;  %602 = vst.msk [vmem:[%s7504_s3 + $0x44] sm:$0xf] %vm584_vm1, %v537_v40  ;;  %v881_v51 = vsel %vm649_vm2, %v801_v44, 0.0  ;;  %v1643_v52 = vsel %vm649_vm2, %v1364_v32, 0.0  ;;  %v1761_v53 = vmul.f32 %v1364_v32, %v1364_v32 }
 0x111   :  { %v882_v54 = vadd.f32 %v881_v51, %v880_v21  ;;  %4297 = vst.msk [vmem:[%s7504_s3 + $0x144] sm:$0xf] %vm584_vm1, %v1498_v48  ;;  %v1644_v55 = vadd.f32 %v1643_v52, %v1642_v22  ;;  %v2323_v56 = vpop.f32.mrf.mxu2  ;;  %v3283_v57 = vpop.f32.mrf.mxu3 }
 0x112   :  { %v1841_v60 = vsel %vm649_vm2, %v1761_v53, 0.0  ;;  %v2324_v61 = vadd.f32 %v5766_v50, %v2323_v56  ;;  %v3284_v62 = vadd.f32 %v5766_v50, %v3283_v57  ;;  %v405_v63 = vpop.f32.mrf.mxu0  ;;  %v1366_v0 = vpop.f32.mrf.mxu1 }
 0x113   :  { %v1842_v3 = vadd.f32 %v1841_v60, %v1840_v30  ;;  %v406_v4 = vadd.f32 %v5766_v50, %v405_v63  ;;  %v1367_v5 = vadd.f32 %v5766_v50, %v1366_v0  ;;  %v4950_v63 = vld [vmem:[%s7501_s0 + $0x90] sm:$0xff] }
 0x114   :  { %v2458_v6 = vpack.c.bf16 %v2324_v61, %v2324_v61  ;;  %v2603_v7 = vsel %vm649_vm2, %v2324_v61, 0.0  ;;  %v2721_v8 = vmul.f32 %v2324_v61, %v2324_v61  ;;  %v3418_v9 = vpack.c.bf16 %v3284_v62, %v3284_v62  ;;  %v4983_v0 = vld [vmem:[%s7501_s0 + $0x190] sm:$0xff] }
 0x115   :  { %v2604_v10 = vadd.f32 %v2603_v7, %v2602_v37  ;;  %v3563_v11 = vsel %vm649_vm2, %v3284_v62, 0.0  ;;  %v3681_v12 = vmul.f32 %v3284_v62, %v3284_v62  ;;  %v538_v13 = vpack.c.bf16 %v406_v4, %v406_v4  ;;  %4035 = vmatmul.msk.bf16.gmra.mxu0 %vm254_vm0, %v4949_v58  ;;  %4265 = vmatmul.msk.bf16.gmra.mxu1 %vm254_vm0, %v4982_v59  ;;  %v5049_v7 = vld [vmem:[%s7501_s0 + $0x390] sm:$0xff] }
 0x116   :  { %4591 = vst.msk [vmem:[%s7504_s3 + $0x244] sm:$0xf] %vm584_vm1, %v2458_v6  ;;  %v2801_v14 = vsel %vm649_vm2, %v2721_v8, 0.0  ;;  %v3564_v15 = vadd.f32 %v3563_v11, %v3562_v42  ;;  %v685_v16 = vsel %vm649_vm2, %v406_v4, 0.0  ;;  %v802_v17 = vmul.f32 %v406_v4, %v406_v4  ;;  %4559 = vmatmul.msk.bf16.gmra.mxu2 %vm254_vm0, %v5015_v1  ;;  %4853 = vmatmul.msk.bf16.gmra.mxu3 %vm254_vm0, %v5048_v2  ;;  %v5016_v6 = vld [vmem:[%s7501_s0 + $0x290] sm:$0xff] }
 0x117   :  { %v2802_v18 = vadd.f32 %v2801_v14, %v2800_v45  ;;  %4885 = vst.msk [vmem:[%s7504_s3 + $0x344] sm:$0xf] %vm584_vm1, %v3418_v9  ;;  %v3761_v19 = vsel %vm649_vm2, %v3681_v12, 0.0  ;;  %v686_v20 = vadd.f32 %v685_v16, %v684_v47  ;;  %v1499_v21 = vpack.c.bf16 %v1367_v5, %v1367_v5 }
 0x118   :  { %v3762_v22 = vadd.f32 %v3761_v19, %v3760_v49  ;;  %603 = vst.msk [vmem:[%s7504_s3 + $0x48] sm:$0xf] %vm584_vm1, %v538_v13  ;;  %v883_v23 = vsel %vm649_vm2, %v802_v17, 0.0  ;;  %v1645_v24 = vsel %vm649_vm2, %v1367_v5, 0.0  ;;  %v1762_v25 = vmul.f32 %v1367_v5, %v1367_v5 }
 0x119   :  { %v884_v26 = vadd.f32 %v883_v23, %v882_v54  ;;  %4298 = vst.msk [vmem:[%s7504_s3 + $0x148] sm:$0xf] %vm584_vm1, %v1499_v21  ;;  %v1646_v27 = vadd.f32 %v1645_v24, %v1644_v55  ;;  %v2326_v28 = vpop.f32.mrf.mxu2  ;;  %v3286_v29 = vpop.f32.mrf.mxu3 }
 0x11a   :  { %v1843_v30 = vsel %vm649_vm2, %v1762_v25, 0.0  ;;  %v2327_v31 = vadd.f32 %v5766_v50, %v2326_v28  ;;  %v3287_v32 = vadd.f32 %v5766_v50, %v3286_v29  ;;  %v407_v36 = vpop.f32.mrf.mxu0  ;;  %v1368_v33 = vpop.f32.mrf.mxu1 }
 0x11b   :  { %v1844_v34 = vadd.f32 %v1843_v30, %v1842_v3  ;;  %v408_v35 = vadd.f32 %v5766_v50, %v407_v36  ;;  %v1369_v37 = vadd.f32 %v5766_v50, %v1368_v33 }
 0x11c   :  { %v2459_v38 = vpack.c.bf16 %v2327_v31, %v2327_v31  ;;  %v2605_v39 = vsel %vm649_vm2, %v2327_v31, 0.0  ;;  %v2722_v40 = vmul.f32 %v2327_v31, %v2327_v31  ;;  %v3419_v41 = vpack.c.bf16 %v3287_v32, %v3287_v32 }
 0x11d   :  { %v2606_v42 = vadd.f32 %v2605_v39, %v2604_v10  ;;  %v3565_v43 = vsel %vm649_vm2, %v3287_v32, 0.0  ;;  %v3682_v44 = vmul.f32 %v3287_v32, %v3287_v32  ;;  %v539_v45 = vpack.c.bf16 %v408_v35, %v408_v35 }
 0x11e   :  { %4592 = vst.msk [vmem:[%s7504_s3 + $0x248] sm:$0xf] %vm584_vm1, %v2459_v38  ;;  %v2803_v46 = vsel %vm649_vm2, %v2722_v40, 0.0  ;;  %v3566_v47 = vadd.f32 %v3565_v43, %v3564_v15  ;;  %v687_v48 = vsel %vm649_vm2, %v408_v35, 0.0  ;;  %v803_v49 = vmul.f32 %v408_v35, %v408_v35 }
 0x11f   :  { %v2804_v51 = vadd.f32 %v2803_v46, %v2802_v18  ;;  %4886 = vst.msk [vmem:[%s7504_s3 + $0x348] sm:$0xf] %vm584_vm1, %v3419_v41  ;;  %v3763_v52 = vsel %vm649_vm2, %v3682_v44, 0.0  ;;  %v688_v53 = vadd.f32 %v687_v48, %v686_v20  ;;  %v1500_v54 = vpack.c.bf16 %v1369_v37, %v1369_v37 }
 0x120   :  { %v3764_v55 = vadd.f32 %v3763_v52, %v3762_v22  ;;  %604 = vst.msk [vmem:[%s7504_s3 + $0x4c] sm:$0xf] %vm584_vm1, %v539_v45  ;;  %v885_v56 = vsel %vm649_vm2, %v803_v49, 0.0  ;;  %v1647_v57 = vsel %vm649_vm2, %v1369_v37, 0.0  ;;  %v1763_v58 = vmul.f32 %v1369_v37, %v1369_v37 }
 0x121   :  { %v886_v59 = vadd.f32 %v885_v56, %v884_v26  ;;  %4299 = vst.msk [vmem:[%s7504_s3 + $0x14c] sm:$0xf] %vm584_vm1, %v1500_v54  ;;  %v1648_v60 = vadd.f32 %v1647_v57, %v1646_v27  ;;  %v2328_v61 = vpop.f32.mrf.mxu2  ;;  %v3288_v62 = vpop.f32.mrf.mxu3 }
 0x122   :  { %v1845_v1 = vsel %vm649_vm2, %v1763_v58, 0.0  ;;  %v2329_v2 = vadd.f32 %v5766_v50, %v2328_v61  ;;  %v3289_v3 = vadd.f32 %v5766_v50, %v3288_v62  ;;  %v410_v4 = vpop.f32.mrf.mxu0  ;;  %v1371_v5 = vpop.f32.mrf.mxu1 }
 0x123   :  { %v1846_v8 = vadd.f32 %v1845_v1, %v1844_v34  ;;  %v411_v9 = vadd.f32 %v5766_v50, %v410_v4  ;;  %v1372_v10 = vadd.f32 %v5766_v50, %v1371_v5  ;;  %v4951_v4 = vld [vmem:[%s7501_s0 + $0x98] sm:$0xff] }
 0x124   :  { %v2460_v11 = vpack.c.bf16 %v2329_v2, %v2329_v2  ;;  %v2607_v12 = vsel %vm649_vm2, %v2329_v2, 0.0  ;;  %v2723_v13 = vmul.f32 %v2329_v2, %v2329_v2  ;;  %v3420_v14 = vpack.c.bf16 %v3289_v3, %v3289_v3  ;;  %v4984_v5 = vld [vmem:[%s7501_s0 + $0x198] sm:$0xff] }
 0x125   :  { %v2608_v15 = vadd.f32 %v2607_v12, %v2606_v42  ;;  %v3567_v16 = vsel %vm649_vm2, %v3289_v3, 0.0  ;;  %v3683_v17 = vmul.f32 %v3289_v3, %v3289_v3  ;;  %v540_v18 = vpack.c.bf16 %v411_v9, %v411_v9  ;;  %4036 = vmatmul.msk.bf16.gmra.mxu0 %vm254_vm0, %v4950_v63  ;;  %4266 = vmatmul.msk.bf16.gmra.mxu1 %vm254_vm0, %v4983_v0  ;;  %v5050_v12 = vld [vmem:[%s7501_s0 + $0x398] sm:$0xff] }
 0x126   :  { %4593 = vst.msk [vmem:[%s7504_s3 + $0x24c] sm:$0xf] %vm584_vm1, %v2460_v11  ;;  %v2805_v19 = vsel %vm649_vm2, %v2723_v13, 0.0  ;;  %v3568_v20 = vadd.f32 %v3567_v16, %v3566_v47  ;;  %v689_v21 = vsel %vm649_vm2, %v411_v9, 0.0  ;;  %v804_v22 = vmul.f32 %v411_v9, %v411_v9  ;;  %4560 = vmatmul.msk.bf16.gmra.mxu2 %vm254_vm0, %v5016_v6  ;;  %4854 = vmatmul.msk.bf16.gmra.mxu3 %vm254_vm0, %v5049_v7  ;;  %v5017_v11 = vld [vmem:[%s7501_s0 + $0x298] sm:$0xff] }
 0x127   :  { %v2806_v23 = vadd.f32 %v2805_v19, %v2804_v51  ;;  %4887 = vst.msk [vmem:[%s7504_s3 + $0x34c] sm:$0xf] %vm584_vm1, %v3420_v14  ;;  %v3765_v24 = vsel %vm649_vm2, %v3683_v17, 0.0  ;;  %v690_v25 = vadd.f32 %v689_v21, %v688_v53  ;;  %v1501_v26 = vpack.c.bf16 %v1372_v10, %v1372_v10 }
 0x128   :  { %v3766_v27 = vadd.f32 %v3765_v24, %v3764_v55  ;;  %605 = vst.msk [vmem:[%s7504_s3 + $0x50] sm:$0xf] %vm584_vm1, %v540_v18  ;;  %v887_v28 = vsel %vm649_vm2, %v804_v22, 0.0  ;;  %v1649_v29 = vsel %vm649_vm2, %v1372_v10, 0.0  ;;  %v1764_v30 = vmul.f32 %v1372_v10, %v1372_v10 }
 0x129   :  { %v888_v31 = vadd.f32 %v887_v28, %v886_v59  ;;  %4300 = vst.msk [vmem:[%s7504_s3 + $0x150] sm:$0xf] %vm584_vm1, %v1501_v26  ;;  %v1650_v32 = vadd.f32 %v1649_v29, %v1648_v60  ;;  %v2331_v36 = vpop.f32.mrf.mxu2  ;;  %v3291_v33 = vpop.f32.mrf.mxu3 }
 0x12a   :  { %v1847_v34 = vsel %vm649_vm2, %v1764_v30, 0.0  ;;  %v2332_v35 = vadd.f32 %v5766_v50, %v2331_v36  ;;  %v3292_v37 = vadd.f32 %v5766_v50, %v3291_v33  ;;  %v412_v38 = vpop.f32.mrf.mxu0  ;;  %v1373_v39 = vpop.f32.mrf.mxu1 }
 0x12b   :  { %v1848_v40 = vadd.f32 %v1847_v34, %v1846_v8  ;;  %v413_v41 = vadd.f32 %v5766_v50, %v412_v38  ;;  %v1374_v42 = vadd.f32 %v5766_v50, %v1373_v39 }
 0x12c   :  { %v2461_v43 = vpack.c.bf16 %v2332_v35, %v2332_v35  ;;  %v2609_v44 = vsel %vm649_vm2, %v2332_v35, 0.0  ;;  %v2724_v45 = vmul.f32 %v2332_v35, %v2332_v35  ;;  %v3421_v46 = vpack.c.bf16 %v3292_v37, %v3292_v37 }
 0x12d   :  { %v2610_v47 = vadd.f32 %v2609_v44, %v2608_v15  ;;  %v3569_v48 = vsel %vm649_vm2, %v3292_v37, 0.0  ;;  %v3684_v49 = vmul.f32 %v3292_v37, %v3292_v37  ;;  %v541_v51 = vpack.c.bf16 %v413_v41, %v413_v41 }
 0x12e   :  { %4594 = vst.msk [vmem:[%s7504_s3 + $0x250] sm:$0xf] %vm584_vm1, %v2461_v43  ;;  %v2807_v52 = vsel %vm649_vm2, %v2724_v45, 0.0  ;;  %v3570_v53 = vadd.f32 %v3569_v48, %v3568_v20  ;;  %v691_v54 = vsel %vm649_vm2, %v413_v41, 0.0  ;;  %v805_v55 = vmul.f32 %v413_v41, %v413_v41 }
 0x12f   :  { %v2808_v56 = vadd.f32 %v2807_v52, %v2806_v23  ;;  %4888 = vst.msk [vmem:[%s7504_s3 + $0x350] sm:$0xf] %vm584_vm1, %v3421_v46  ;;  %v3767_v57 = vsel %vm649_vm2, %v3684_v49, 0.0  ;;  %v692_v58 = vadd.f32 %v691_v54, %v690_v25  ;;  %v1502_v59 = vpack.c.bf16 %v1374_v42, %v1374_v42 }
 0x130   :  { %v3768_v60 = vadd.f32 %v3767_v57, %v3766_v27  ;;  %606 = vst.msk [vmem:[%s7504_s3 + $0x54] sm:$0xf] %vm584_vm1, %v541_v51  ;;  %v889_v61 = vsel %vm649_vm2, %v805_v55, 0.0  ;;  %v1651_v62 = vsel %vm649_vm2, %v1374_v42, 0.0  ;;  %v1765_v63 = vmul.f32 %v1374_v42, %v1374_v42 }
 0x131   :  { %v890_v0 = vadd.f32 %v889_v61, %v888_v31  ;;  %4301 = vst.msk [vmem:[%s7504_s3 + $0x154] sm:$0xf] %vm584_vm1, %v1502_v59  ;;  %v1652_v1 = vadd.f32 %v1651_v62, %v1650_v32  ;;  %v2333_v2 = vpop.f32.mrf.mxu2  ;;  %v3293_v3 = vpop.f32.mrf.mxu3 }
 0x132   :  { %v1849_v6 = vsel %vm649_vm2, %v1765_v63, 0.0  ;;  %v2334_v7 = vadd.f32 %v5766_v50, %v2333_v2  ;;  %v3294_v8 = vadd.f32 %v5766_v50, %v3293_v3  ;;  %v415_v9 = vpop.f32.mrf.mxu0  ;;  %v1376_v10 = vpop.f32.mrf.mxu1 }
 0x133   :  { %v1850_v13 = vadd.f32 %v1849_v6, %v1848_v40  ;;  %v416_v14 = vadd.f32 %v5766_v50, %v415_v9  ;;  %v1377_v15 = vadd.f32 %v5766_v50, %v1376_v10  ;;  %v4952_v9 = vld [vmem:[%s7501_s0 + $0xa0] sm:$0xff] }
 0x134   :  { %v2462_v16 = vpack.c.bf16 %v2334_v7, %v2334_v7  ;;  %v2611_v17 = vsel %vm649_vm2, %v2334_v7, 0.0  ;;  %v2725_v18 = vmul.f32 %v2334_v7, %v2334_v7  ;;  %v3422_v19 = vpack.c.bf16 %v3294_v8, %v3294_v8  ;;  %v4985_v10 = vld [vmem:[%s7501_s0 + $0x1a0] sm:$0xff] }
 0x135   :  { %v2612_v20 = vadd.f32 %v2611_v17, %v2610_v47  ;;  %v3571_v21 = vsel %vm649_vm2, %v3294_v8, 0.0  ;;  %v3685_v22 = vmul.f32 %v3294_v8, %v3294_v8  ;;  %v542_v23 = vpack.c.bf16 %v416_v14, %v416_v14  ;;  %4037 = vmatmul.msk.bf16.gmra.mxu0 %vm254_vm0, %v4951_v4  ;;  %4267 = vmatmul.msk.bf16.gmra.mxu1 %vm254_vm0, %v4984_v5  ;;  %v5051_v17 = vld [vmem:[%s7501_s0 + $0x3a0] sm:$0xff] }
 0x136   :  { %4595 = vst.msk [vmem:[%s7504_s3 + $0x254] sm:$0xf] %vm584_vm1, %v2462_v16  ;;  %v2809_v24 = vsel %vm649_vm2, %v2725_v18, 0.0  ;;  %v3572_v25 = vadd.f32 %v3571_v21, %v3570_v53  ;;  %v693_v26 = vsel %vm649_vm2, %v416_v14, 0.0  ;;  %v806_v27 = vmul.f32 %v416_v14, %v416_v14  ;;  %4561 = vmatmul.msk.bf16.gmra.mxu2 %vm254_vm0, %v5017_v11  ;;  %4855 = vmatmul.msk.bf16.gmra.mxu3 %vm254_vm0, %v5050_v12  ;;  %v5018_v16 = vld [vmem:[%s7501_s0 + $0x2a0] sm:$0xff] }
 0x137   :  { %v2810_v28 = vadd.f32 %v2809_v24, %v2808_v56  ;;  %4889 = vst.msk [vmem:[%s7504_s3 + $0x354] sm:$0xf] %vm584_vm1, %v3422_v19  ;;  %v3769_v29 = vsel %vm649_vm2, %v3685_v22, 0.0  ;;  %v694_v30 = vadd.f32 %v693_v26, %v692_v58  ;;  %v1503_v31 = vpack.c.bf16 %v1377_v15, %v1377_v15 }
 0x138   :  { %v3770_v32 = vadd.f32 %v3769_v29, %v3768_v60  ;;  %607 = vst.msk [vmem:[%s7504_s3 + $0x58] sm:$0xf] %vm584_vm1, %v542_v23  ;;  %v891_v36 = vsel %vm649_vm2, %v806_v27, 0.0  ;;  %v1653_v33 = vsel %vm649_vm2, %v1377_v15, 0.0  ;;  %v1766_v34 = vmul.f32 %v1377_v15, %v1377_v15 }
 0x139   :  { %v892_v35 = vadd.f32 %v891_v36, %v890_v0  ;;  %4302 = vst.msk [vmem:[%s7504_s3 + $0x158] sm:$0xf] %vm584_vm1, %v1503_v31  ;;  %v1654_v37 = vadd.f32 %v1653_v33, %v1652_v1  ;;  %v2336_v38 = vpop.f32.mrf.mxu2  ;;  %v3296_v39 = vpop.f32.mrf.mxu3 }
 0x13a   :  { %v1851_v40 = vsel %vm649_vm2, %v1766_v34, 0.0  ;;  %v2337_v41 = vadd.f32 %v5766_v50, %v2336_v38  ;;  %v3297_v42 = vadd.f32 %v5766_v50, %v3296_v39  ;;  %v417_v43 = vpop.f32.mrf.mxu0  ;;  %v1378_v44 = vpop.f32.mrf.mxu1 }
 0x13b   :  { %v1852_v45 = vadd.f32 %v1851_v40, %v1850_v13  ;;  %v418_v46 = vadd.f32 %v5766_v50, %v417_v43  ;;  %v1379_v47 = vadd.f32 %v5766_v50, %v1378_v44 }
 0x13c   :  { %v2463_v48 = vpack.c.bf16 %v2337_v41, %v2337_v41  ;;  %v2613_v49 = vsel %vm649_vm2, %v2337_v41, 0.0  ;;  %v2726_v51 = vmul.f32 %v2337_v41, %v2337_v41  ;;  %v3423_v52 = vpack.c.bf16 %v3297_v42, %v3297_v42 }
 0x13d   :  { %v2614_v53 = vadd.f32 %v2613_v49, %v2612_v20  ;;  %v3573_v54 = vsel %vm649_vm2, %v3297_v42, 0.0  ;;  %v3686_v55 = vmul.f32 %v3297_v42, %v3297_v42  ;;  %v543_v56 = vpack.c.bf16 %v418_v46, %v418_v46 }
 0x13e   :  { %4596 = vst.msk [vmem:[%s7504_s3 + $0x258] sm:$0xf] %vm584_vm1, %v2463_v48  ;;  %v2811_v57 = vsel %vm649_vm2, %v2726_v51, 0.0  ;;  %v3574_v58 = vadd.f32 %v3573_v54, %v3572_v25  ;;  %v695_v59 = vsel %vm649_vm2, %v418_v46, 0.0  ;;  %v807_v60 = vmul.f32 %v418_v46, %v418_v46 }
 0x13f   :  { %v2812_v61 = vadd.f32 %v2811_v57, %v2810_v28  ;;  %4890 = vst.msk [vmem:[%s7504_s3 + $0x358] sm:$0xf] %vm584_vm1, %v3423_v52  ;;  %v3771_v62 = vsel %vm649_vm2, %v3686_v55, 0.0  ;;  %v696_v63 = vadd.f32 %v695_v59, %v694_v30  ;;  %v1504_v0 = vpack.c.bf16 %v1379_v47, %v1379_v47 }
 0x140   :  { %v3772_v1 = vadd.f32 %v3771_v62, %v3770_v32  ;;  %608 = vst.msk [vmem:[%s7504_s3 + $0x5c] sm:$0xf] %vm584_vm1, %v543_v56  ;;  %v893_v2 = vsel %vm649_vm2, %v807_v60, 0.0  ;;  %v1655_v3 = vsel %vm649_vm2, %v1379_v47, 0.0  ;;  %v1767_v4 = vmul.f32 %v1379_v47, %v1379_v47 }
 0x141   :  { %v894_v5 = vadd.f32 %v893_v2, %v892_v35  ;;  %4303 = vst.msk [vmem:[%s7504_s3 + $0x15c] sm:$0xf] %vm584_vm1, %v1504_v0  ;;  %v1656_v6 = vadd.f32 %v1655_v3, %v1654_v37  ;;  %v2338_v7 = vpop.f32.mrf.mxu2  ;;  %v3298_v8 = vpop.f32.mrf.mxu3 }
 0x142   :  { %v1853_v11 = vsel %vm649_vm2, %v1767_v4, 0.0  ;;  %v2339_v12 = vadd.f32 %v5766_v50, %v2338_v7  ;;  %v3299_v13 = vadd.f32 %v5766_v50, %v3298_v8  ;;  %v420_v14 = vpop.f32.mrf.mxu0  ;;  %v1381_v15 = vpop.f32.mrf.mxu1 }
 0x143   :  { %v1854_v18 = vadd.f32 %v1853_v11, %v1852_v45  ;;  %v421_v19 = vadd.f32 %v5766_v50, %v420_v14  ;;  %v1382_v20 = vadd.f32 %v5766_v50, %v1381_v15  ;;  %v4953_v14 = vld [vmem:[%s7501_s0 + $0xa8] sm:$0xff] }
 0x144   :  { %v2464_v21 = vpack.c.bf16 %v2339_v12, %v2339_v12  ;;  %v2615_v22 = vsel %vm649_vm2, %v2339_v12, 0.0  ;;  %v2727_v23 = vmul.f32 %v2339_v12, %v2339_v12  ;;  %v3424_v24 = vpack.c.bf16 %v3299_v13, %v3299_v13  ;;  %v4986_v15 = vld [vmem:[%s7501_s0 + $0x1a8] sm:$0xff] }
 0x145   :  { %v2616_v25 = vadd.f32 %v2615_v22, %v2614_v53  ;;  %v3575_v26 = vsel %vm649_vm2, %v3299_v13, 0.0  ;;  %v3687_v27 = vmul.f32 %v3299_v13, %v3299_v13  ;;  %v544_v28 = vpack.c.bf16 %v421_v19, %v421_v19  ;;  %4038 = vmatmul.msk.bf16.gmra.mxu0 %vm254_vm0, %v4952_v9  ;;  %4268 = vmatmul.msk.bf16.gmra.mxu1 %vm254_vm0, %v4985_v10  ;;  %v5052_v22 = vld [vmem:[%s7501_s0 + $0x3a8] sm:$0xff] }
 0x146   :  { %4597 = vst.msk [vmem:[%s7504_s3 + $0x25c] sm:$0xf] %vm584_vm1, %v2464_v21  ;;  %v2813_v29 = vsel %vm649_vm2, %v2727_v23, 0.0  ;;  %v3576_v30 = vadd.f32 %v3575_v26, %v3574_v58  ;;  %v697_v31 = vsel %vm649_vm2, %v421_v19, 0.0  ;;  %v808_v32 = vmul.f32 %v421_v19, %v421_v19  ;;  %4562 = vmatmul.msk.bf16.gmra.mxu2 %vm254_vm0, %v5018_v16  ;;  %4856 = vmatmul.msk.bf16.gmra.mxu3 %vm254_vm0, %v5051_v17  ;;  %v5019_v21 = vld [vmem:[%s7501_s0 + $0x2a8] sm:$0xff] }
 0x147   :  { %v2814_v36 = vadd.f32 %v2813_v29, %v2812_v61  ;;  %4891 = vst.msk [vmem:[%s7504_s3 + $0x35c] sm:$0xf] %vm584_vm1, %v3424_v24  ;;  %v3773_v33 = vsel %vm649_vm2, %v3687_v27, 0.0  ;;  %v698_v34 = vadd.f32 %v697_v31, %v696_v63  ;;  %v1505_v35 = vpack.c.bf16 %v1382_v20, %v1382_v20 }
 0x148   :  { %v3774_v37 = vadd.f32 %v3773_v33, %v3772_v1  ;;  %609 = vst.msk [vmem:[%s7504_s3 + $0x60] sm:$0xf] %vm584_vm1, %v544_v28  ;;  %v895_v38 = vsel %vm649_vm2, %v808_v32, 0.0  ;;  %v1657_v39 = vsel %vm649_vm2, %v1382_v20, 0.0  ;;  %v1768_v40 = vmul.f32 %v1382_v20, %v1382_v20 }
 0x149   :  { %v896_v41 = vadd.f32 %v895_v38, %v894_v5  ;;  %4304 = vst.msk [vmem:[%s7504_s3 + $0x160] sm:$0xf] %vm584_vm1, %v1505_v35  ;;  %v1658_v42 = vadd.f32 %v1657_v39, %v1656_v6  ;;  %v2341_v43 = vpop.f32.mrf.mxu2  ;;  %v3301_v44 = vpop.f32.mrf.mxu3 }
 0x14a   :  { %v1855_v45 = vsel %vm649_vm2, %v1768_v40, 0.0  ;;  %v2342_v46 = vadd.f32 %v5766_v50, %v2341_v43  ;;  %v3302_v47 = vadd.f32 %v5766_v50, %v3301_v44  ;;  %v422_v48 = vpop.f32.mrf.mxu0  ;;  %v1383_v49 = vpop.f32.mrf.mxu1 }
 0x14b   :  { %v1856_v51 = vadd.f32 %v1855_v45, %v1854_v18  ;;  %v423_v52 = vadd.f32 %v5766_v50, %v422_v48  ;;  %v1384_v53 = vadd.f32 %v5766_v50, %v1383_v49 }
 0x14c   :  { %v2465_v54 = vpack.c.bf16 %v2342_v46, %v2342_v46  ;;  %v2617_v55 = vsel %vm649_vm2, %v2342_v46, 0.0  ;;  %v2728_v56 = vmul.f32 %v2342_v46, %v2342_v46  ;;  %v3425_v57 = vpack.c.bf16 %v3302_v47, %v3302_v47 }
 0x14d   :  { %v2618_v58 = vadd.f32 %v2617_v55, %v2616_v25  ;;  %v3577_v59 = vsel %vm649_vm2, %v3302_v47, 0.0  ;;  %v3688_v60 = vmul.f32 %v3302_v47, %v3302_v47  ;;  %v545_v61 = vpack.c.bf16 %v423_v52, %v423_v52 }
 0x14e   :  { %4598 = vst.msk [vmem:[%s7504_s3 + $0x260] sm:$0xf] %vm584_vm1, %v2465_v54  ;;  %v2815_v62 = vsel %vm649_vm2, %v2728_v56, 0.0  ;;  %v3578_v63 = vadd.f32 %v3577_v59, %v3576_v30  ;;  %v699_v0 = vsel %vm649_vm2, %v423_v52, 0.0  ;;  %v809_v1 = vmul.f32 %v423_v52, %v423_v52 }
 0x14f   :  { %v2816_v2 = vadd.f32 %v2815_v62, %v2814_v36  ;;  %4892 = vst.msk [vmem:[%s7504_s3 + $0x360] sm:$0xf] %vm584_vm1, %v3425_v57  ;;  %v3775_v3 = vsel %vm649_vm2, %v3688_v60, 0.0  ;;  %v700_v4 = vadd.f32 %v699_v0, %v698_v34  ;;  %v1506_v5 = vpack.c.bf16 %v1384_v53, %v1384_v53 }
 0x150   :  { %v3776_v6 = vadd.f32 %v3775_v3, %v3774_v37  ;;  %610 = vst.msk [vmem:[%s7504_s3 + $0x64] sm:$0xf] %vm584_vm1, %v545_v61  ;;  %v897_v7 = vsel %vm649_vm2, %v809_v1, 0.0  ;;  %v1659_v8 = vsel %vm649_vm2, %v1384_v53, 0.0  ;;  %v1769_v9 = vmul.f32 %v1384_v53, %v1384_v53 }
 0x151   :  { %v898_v10 = vadd.f32 %v897_v7, %v896_v41  ;;  %4305 = vst.msk [vmem:[%s7504_s3 + $0x164] sm:$0xf] %vm584_vm1, %v1506_v5  ;;  %v1660_v11 = vadd.f32 %v1659_v8, %v1658_v42  ;;  %v2343_v12 = vpop.f32.mrf.mxu2  ;;  %v3303_v13 = vpop.f32.mrf.mxu3 }
 0x152   :  { %v1857_v16 = vsel %vm649_vm2, %v1769_v9, 0.0  ;;  %v2344_v17 = vadd.f32 %v5766_v50, %v2343_v12  ;;  %v3304_v18 = vadd.f32 %v5766_v50, %v3303_v13  ;;  %v425_v19 = vpop.f32.mrf.mxu0  ;;  %v1386_v20 = vpop.f32.mrf.mxu1 }
 0x153   :  { %v1858_v23 = vadd.f32 %v1857_v16, %v1856_v51  ;;  %v426_v24 = vadd.f32 %v5766_v50, %v425_v19  ;;  %v1387_v25 = vadd.f32 %v5766_v50, %v1386_v20  ;;  %v6241_v51 = vld [vmem:[%s7503_s2] ss:$0 sm:$0xff]  ;;  %v4954_v19 = vld [vmem:[%s7501_s0 + $0xb0] sm:$0xff] }
 0x154   :  { %v2466_v26 = vpack.c.bf16 %v2344_v17, %v2344_v17  ;;  %v2619_v27 = vsel %vm649_vm2, %v2344_v17, 0.0  ;;  %v2729_v28 = vmul.f32 %v2344_v17, %v2344_v17  ;;  %v3426_v29 = vpack.c.bf16 %v3304_v18, %v3304_v18  ;;  %v4987_v20 = vld [vmem:[%s7501_s0 + $0x1b0] sm:$0xff] }
 0x155   :  { %v2620_v30 = vadd.f32 %v2619_v27, %v2618_v58  ;;  %v3579_v31 = vsel %vm649_vm2, %v3304_v18, 0.0  ;;  %v3689_v32 = vmul.f32 %v3304_v18, %v3304_v18  ;;  %v546_v36 = vpack.c.bf16 %v426_v24, %v426_v24  ;;  %4039 = vmatmul.msk.bf16.gmra.mxu0 %vm254_vm0, %v4953_v14  ;;  %4269 = vmatmul.msk.bf16.gmra.mxu1 %vm254_vm0, %v4986_v15  ;;  %v5053_v27 = vld [vmem:[%s7501_s0 + $0x3b0] sm:$0xff] }
 0x156   :  { %4599 = vst.msk [vmem:[%s7504_s3 + $0x264] sm:$0xf] %vm584_vm1, %v2466_v26  ;;  %v2817_v50 = vsel %vm649_vm2, %v2729_v28, 0.0  ;;  %v3580_v33 = vadd.f32 %v3579_v31, %v3578_v63  ;;  %v701_v34 = vsel %vm649_vm2, %v426_v24, 0.0  ;;  %v810_v35 = vmul.f32 %v426_v24, %v426_v24  ;;  %4563 = vmatmul.msk.bf16.gmra.mxu2 %vm254_vm0, %v5019_v21  ;;  %4857 = vmatmul.msk.bf16.gmra.mxu3 %vm254_vm0, %v5052_v22  ;;  %v5020_v26 = vld [vmem:[%s7501_s0 + $0x2b0] sm:$0xff] }
 0x157   :  { %v2818_v37 = vadd.f32 %v2817_v50, %v2816_v2  ;;  %4893 = vst.msk [vmem:[%s7504_s3 + $0x364] sm:$0xf] %vm584_vm1, %v3426_v29  ;;  %v3777_v38 = vsel %vm649_vm2, %v3689_v32, 0.0  ;;  %v702_v39 = vadd.f32 %v701_v34, %v700_v4  ;;  %v1507_v40 = vpack.c.bf16 %v1387_v25, %v1387_v25 }
 0x158   :  { %v3778_v41 = vadd.f32 %v3777_v38, %v3776_v6  ;;  %611 = vst.msk [vmem:[%s7504_s3 + $0x68] sm:$0xf] %vm584_vm1, %v546_v36  ;;  %v899_v42 = vsel %vm649_vm2, %v810_v35, 0.0  ;;  %v1661_v43 = vsel %vm649_vm2, %v1387_v25, 0.0  ;;  %v1770_v44 = vmul.f32 %v1387_v25, %v1387_v25 }
 0x159   :  { %v900_v45 = vadd.f32 %v899_v42, %v898_v10  ;;  %4306 = vst.msk [vmem:[%s7504_s3 + $0x168] sm:$0xf] %vm584_vm1, %v1507_v40  ;;  %v1662_v46 = vadd.f32 %v1661_v43, %v1660_v11  ;;  %v2346_v47 = vpop.f32.mrf.mxu2  ;;  %v3306_v48 = vpop.f32.mrf.mxu3 }
 0x15a   :  { %v1859_v49 = vsel %vm649_vm2, %v1770_v44, 0.0  ;;  %v2347_v52 = vadd.f32 %v6241_v51, %v2346_v47  ;;  %v3307_v53 = vadd.f32 %v6241_v51, %v3306_v48  ;;  %v427_v54 = vpop.f32.mrf.mxu0  ;;  %v1388_v55 = vpop.f32.mrf.mxu1 }
 0x15b   :  { %v1860_v56 = vadd.f32 %v1859_v49, %v1858_v23  ;;  %v428_v57 = vadd.f32 %v6241_v51, %v427_v54  ;;  %v1389_v58 = vadd.f32 %v6241_v51, %v1388_v55 }
 0x15c   :  { %v2467_v59 = vpack.c.bf16 %v2347_v52, %v2347_v52  ;;  %v2621_v60 = vsel %vm649_vm2, %v2347_v52, 0.0  ;;  %v2730_v61 = vmul.f32 %v2347_v52, %v2347_v52  ;;  %v3427_v62 = vpack.c.bf16 %v3307_v53, %v3307_v53 }
 0x15d   :  { %v2622_v63 = vadd.f32 %v2621_v60, %v2620_v30  ;;  %v3581_v0 = vsel %vm649_vm2, %v3307_v53, 0.0  ;;  %v3690_v1 = vmul.f32 %v3307_v53, %v3307_v53  ;;  %v547_v2 = vpack.c.bf16 %v428_v57, %v428_v57 }
 0x15e   :  { %4600 = vst.msk [vmem:[%s7504_s3 + $0x268] sm:$0xf] %vm584_vm1, %v2467_v59  ;;  %v2819_v3 = vsel %vm649_vm2, %v2730_v61, 0.0  ;;  %v3582_v4 = vadd.f32 %v3581_v0, %v3580_v33  ;;  %v703_v5 = vsel %vm649_vm2, %v428_v57, 0.0  ;;  %v811_v6 = vmul.f32 %v428_v57, %v428_v57 }
 0x15f   :  { %v2820_v7 = vadd.f32 %v2819_v3, %v2818_v37  ;;  %4894 = vst.msk [vmem:[%s7504_s3 + $0x368] sm:$0xf] %vm584_vm1, %v3427_v62  ;;  %v3779_v8 = vsel %vm649_vm2, %v3690_v1, 0.0  ;;  %v704_v9 = vadd.f32 %v703_v5, %v702_v39  ;;  %v1508_v10 = vpack.c.bf16 %v1389_v58, %v1389_v58 }
 0x160   :  { %v3780_v11 = vadd.f32 %v3779_v8, %v3778_v41  ;;  %612 = vst.msk [vmem:[%s7504_s3 + $0x6c] sm:$0xf] %vm584_vm1, %v547_v2  ;;  %v901_v12 = vsel %vm649_vm2, %v811_v6, 0.0  ;;  %v1663_v13 = vsel %vm649_vm2, %v1389_v58, 0.0  ;;  %v1771_v14 = vmul.f32 %v1389_v58, %v1389_v58 }
 0x161   :  { %v902_v15 = vadd.f32 %v901_v12, %v900_v45  ;;  %4307 = vst.msk [vmem:[%s7504_s3 + $0x16c] sm:$0xf] %vm584_vm1, %v1508_v10  ;;  %v1664_v16 = vadd.f32 %v1663_v13, %v1662_v46  ;;  %v2348_v17 = vpop.f32.mrf.mxu2  ;;  %v3308_v18 = vpop.f32.mrf.mxu3 }
 0x162   :  { %v1861_v21 = vsel %vm649_vm2, %v1771_v14, 0.0  ;;  %v2349_v22 = vadd.f32 %v6241_v51, %v2348_v17  ;;  %v3309_v23 = vadd.f32 %v6241_v51, %v3308_v18  ;;  %v430_v24 = vpop.f32.mrf.mxu0  ;;  %v1391_v25 = vpop.f32.mrf.mxu1 }
 0x163   :  { %v1862_v28 = vadd.f32 %v1861_v21, %v1860_v56  ;;  %v431_v29 = vadd.f32 %v6241_v51, %v430_v24  ;;  %v1392_v30 = vadd.f32 %v6241_v51, %v1391_v25  ;;  %v4955_v24 = vld [vmem:[%s7501_s0 + $0xb8] sm:$0xff] }
 0x164   :  { %v2468_v31 = vpack.c.bf16 %v2349_v22, %v2349_v22  ;;  %v2623_v32 = vsel %vm649_vm2, %v2349_v22, 0.0  ;;  %v2731_v36 = vmul.f32 %v2349_v22, %v2349_v22  ;;  %v3428_v50 = vpack.c.bf16 %v3309_v23, %v3309_v23  ;;  %v4988_v25 = vld [vmem:[%s7501_s0 + $0x1b8] sm:$0xff] }
 0x165   :  { %v2624_v33 = vadd.f32 %v2623_v32, %v2622_v63  ;;  %v3583_v34 = vsel %vm649_vm2, %v3309_v23, 0.0  ;;  %v3691_v35 = vmul.f32 %v3309_v23, %v3309_v23  ;;  %v548_v37 = vpack.c.bf16 %v431_v29, %v431_v29  ;;  %4040 = vmatmul.msk.bf16.gmra.mxu0 %vm254_vm0, %v4954_v19  ;;  %4270 = vmatmul.msk.bf16.gmra.mxu1 %vm254_vm0, %v4987_v20  ;;  %v5054_v32 = vld [vmem:[%s7501_s0 + $0x3b8] sm:$0xff] }
 0x166   :  { %4601 = vst.msk [vmem:[%s7504_s3 + $0x26c] sm:$0xf] %vm584_vm1, %v2468_v31  ;;  %v2821_v38 = vsel %vm649_vm2, %v2731_v36, 0.0  ;;  %v3584_v39 = vadd.f32 %v3583_v34, %v3582_v4  ;;  %v705_v40 = vsel %vm649_vm2, %v431_v29, 0.0  ;;  %v812_v41 = vmul.f32 %v431_v29, %v431_v29  ;;  %4564 = vmatmul.msk.bf16.gmra.mxu2 %vm254_vm0, %v5020_v26  ;;  %4858 = vmatmul.msk.bf16.gmra.mxu3 %vm254_vm0, %v5053_v27  ;;  %v5021_v31 = vld [vmem:[%s7501_s0 + $0x2b8] sm:$0xff] }
 0x167   :  { %v2822_v42 = vadd.f32 %v2821_v38, %v2820_v7  ;;  %4895 = vst.msk [vmem:[%s7504_s3 + $0x36c] sm:$0xf] %vm584_vm1, %v3428_v50  ;;  %v3781_v43 = vsel %vm649_vm2, %v3691_v35, 0.0  ;;  %v706_v44 = vadd.f32 %v705_v40, %v704_v9  ;;  %v1509_v45 = vpack.c.bf16 %v1392_v30, %v1392_v30 }
 0x168   :  { %v3782_v46 = vadd.f32 %v3781_v43, %v3780_v11  ;;  %613 = vst.msk [vmem:[%s7504_s3 + $0x70] sm:$0xf] %vm584_vm1, %v548_v37  ;;  %v903_v47 = vsel %vm649_vm2, %v812_v41, 0.0  ;;  %v1665_v48 = vsel %vm649_vm2, %v1392_v30, 0.0  ;;  %v1772_v49 = vmul.f32 %v1392_v30, %v1392_v30 }
 0x169   :  { %v904_v52 = vadd.f32 %v903_v47, %v902_v15  ;;  %4308 = vst.msk [vmem:[%s7504_s3 + $0x170] sm:$0xf] %vm584_vm1, %v1509_v45  ;;  %v1666_v53 = vadd.f32 %v1665_v48, %v1664_v16  ;;  %v2351_v54 = vpop.f32.mrf.mxu2  ;;  %v3311_v55 = vpop.f32.mrf.mxu3 }
 0x16a   :  { %v1863_v56 = vsel %vm649_vm2, %v1772_v49, 0.0  ;;  %v2352_v57 = vadd.f32 %v6241_v51, %v2351_v54  ;;  %v3312_v58 = vadd.f32 %v6241_v51, %v3311_v55  ;;  %v432_v59 = vpop.f32.mrf.mxu0  ;;  %v1393_v60 = vpop.f32.mrf.mxu1 }
 0x16b   :  { %v1864_v61 = vadd.f32 %v1863_v56, %v1862_v28  ;;  %v433_v62 = vadd.f32 %v6241_v51, %v432_v59  ;;  %v1394_v63 = vadd.f32 %v6241_v51, %v1393_v60 }
 0x16c   :  { %v2469_v0 = vpack.c.bf16 %v2352_v57, %v2352_v57  ;;  %v2625_v1 = vsel %vm649_vm2, %v2352_v57, 0.0  ;;  %v2732_v2 = vmul.f32 %v2352_v57, %v2352_v57  ;;  %v3429_v3 = vpack.c.bf16 %v3312_v58, %v3312_v58 }
 0x16d   :  { %v2626_v4 = vadd.f32 %v2625_v1, %v2624_v33  ;;  %v3585_v5 = vsel %vm649_vm2, %v3312_v58, 0.0  ;;  %v3692_v6 = vmul.f32 %v3312_v58, %v3312_v58  ;;  %v549_v7 = vpack.c.bf16 %v433_v62, %v433_v62 }
 0x16e   :  { %4602 = vst.msk [vmem:[%s7504_s3 + $0x270] sm:$0xf] %vm584_vm1, %v2469_v0  ;;  %v2823_v8 = vsel %vm649_vm2, %v2732_v2, 0.0  ;;  %v3586_v9 = vadd.f32 %v3585_v5, %v3584_v39  ;;  %v707_v10 = vsel %vm649_vm2, %v433_v62, 0.0  ;;  %v813_v11 = vmul.f32 %v433_v62, %v433_v62 }
 0x16f   :  { %v2824_v12 = vadd.f32 %v2823_v8, %v2822_v42  ;;  %4896 = vst.msk [vmem:[%s7504_s3 + $0x370] sm:$0xf] %vm584_vm1, %v3429_v3  ;;  %v3783_v13 = vsel %vm649_vm2, %v3692_v6, 0.0  ;;  %v708_v14 = vadd.f32 %v707_v10, %v706_v44  ;;  %v1510_v15 = vpack.c.bf16 %v1394_v63, %v1394_v63 }
 0x170   :  { %v3784_v16 = vadd.f32 %v3783_v13, %v3782_v46  ;;  %614 = vst.msk [vmem:[%s7504_s3 + $0x74] sm:$0xf] %vm584_vm1, %v549_v7  ;;  %v905_v17 = vsel %vm649_vm2, %v813_v11, 0.0  ;;  %v1667_v18 = vsel %vm649_vm2, %v1394_v63, 0.0  ;;  %v1773_v19 = vmul.f32 %v1394_v63, %v1394_v63 }
 0x171   :  { %v906_v20 = vadd.f32 %v905_v17, %v904_v52  ;;  %4309 = vst.msk [vmem:[%s7504_s3 + $0x174] sm:$0xf] %vm584_vm1, %v1510_v15  ;;  %v1668_v21 = vadd.f32 %v1667_v18, %v1666_v53  ;;  %v2353_v22 = vpop.f32.mrf.mxu2  ;;  %v3313_v23 = vpop.f32.mrf.mxu3 }
 0x172   :  { %v1865_v26 = vsel %vm649_vm2, %v1773_v19, 0.0  ;;  %v2354_v27 = vadd.f32 %v6241_v51, %v2353_v22  ;;  %v3314_v28 = vadd.f32 %v6241_v51, %v3313_v23  ;;  %v435_v29 = vpop.f32.mrf.mxu0  ;;  %v1396_v30 = vpop.f32.mrf.mxu1 }
 0x173   :  { %v1866_v36 = vadd.f32 %v1865_v26, %v1864_v61  ;;  %v436_v50 = vadd.f32 %v6241_v51, %v435_v29  ;;  %v1397_v33 = vadd.f32 %v6241_v51, %v1396_v30  ;;  %v4956_v29 = vld [vmem:[%s7501_s0 + $0xc0] sm:$0xff] }
 0x174   :  { %v2470_v34 = vpack.c.bf16 %v2354_v27, %v2354_v27  ;;  %v2627_v35 = vsel %vm649_vm2, %v2354_v27, 0.0  ;;  %v2733_v37 = vmul.f32 %v2354_v27, %v2354_v27  ;;  %v3430_v38 = vpack.c.bf16 %v3314_v28, %v3314_v28  ;;  %v4989_v30 = vld [vmem:[%s7501_s0 + $0x1c0] sm:$0xff] }
 0x175   :  { %v2628_v39 = vadd.f32 %v2627_v35, %v2626_v4  ;;  %v3587_v40 = vsel %vm649_vm2, %v3314_v28, 0.0  ;;  %v3693_v41 = vmul.f32 %v3314_v28, %v3314_v28  ;;  %v550_v42 = vpack.c.bf16 %v436_v50, %v436_v50  ;;  %4041 = vmatmul.msk.bf16.gmra.mxu0 %vm254_vm0, %v4955_v24  ;;  %4271 = vmatmul.msk.bf16.gmra.mxu1 %vm254_vm0, %v4988_v25  ;;  %v5055_v35 = vld [vmem:[%s7501_s0 + $0x3c0] sm:$0xff] }
 0x176   :  { %4603 = vst.msk [vmem:[%s7504_s3 + $0x274] sm:$0xf] %vm584_vm1, %v2470_v34  ;;  %v2825_v43 = vsel %vm649_vm2, %v2733_v37, 0.0  ;;  %v3588_v44 = vadd.f32 %v3587_v40, %v3586_v9  ;;  %v709_v45 = vsel %vm649_vm2, %v436_v50, 0.0  ;;  %v814_v46 = vmul.f32 %v436_v50, %v436_v50  ;;  %4565 = vmatmul.msk.bf16.gmra.mxu2 %vm254_vm0, %v5021_v31  ;;  %4859 = vmatmul.msk.bf16.gmra.mxu3 %vm254_vm0, %v5054_v32  ;;  %v5022_v34 = vld [vmem:[%s7501_s0 + $0x2c0] sm:$0xff] }
 0x177   :  { %v2826_v47 = vadd.f32 %v2825_v43, %v2824_v12  ;;  %4897 = vst.msk [vmem:[%s7504_s3 + $0x374] sm:$0xf] %vm584_vm1, %v3430_v38  ;;  %v3785_v48 = vsel %vm649_vm2, %v3693_v41, 0.0  ;;  %v710_v49 = vadd.f32 %v709_v45, %v708_v14  ;;  %v1511_v52 = vpack.c.bf16 %v1397_v33, %v1397_v33 }
 0x178   :  { %v3786_v53 = vadd.f32 %v3785_v48, %v3784_v16  ;;  %615 = vst.msk [vmem:[%s7504_s3 + $0x78] sm:$0xf] %vm584_vm1, %v550_v42  ;;  %v907_v54 = vsel %vm649_vm2, %v814_v46, 0.0  ;;  %v1669_v55 = vsel %vm649_vm2, %v1397_v33, 0.0  ;;  %v1774_v56 = vmul.f32 %v1397_v33, %v1397_v33 }
 0x179   :  { %v908_v57 = vadd.f32 %v907_v54, %v906_v20  ;;  %4310 = vst.msk [vmem:[%s7504_s3 + $0x178] sm:$0xf] %vm584_vm1, %v1511_v52  ;;  %v1670_v58 = vadd.f32 %v1669_v55, %v1668_v21  ;;  %v2356_v59 = vpop.f32.mrf.mxu2  ;;  %v3316_v60 = vpop.f32.mrf.mxu3 }
 0x17a   :  { %v1867_v61 = vsel %vm649_vm2, %v1774_v56, 0.0  ;;  %v2357_v62 = vadd.f32 %v6241_v51, %v2356_v59  ;;  %v3317_v63 = vadd.f32 %v6241_v51, %v3316_v60  ;;  %v437_v0 = vpop.f32.mrf.mxu0  ;;  %v1398_v1 = vpop.f32.mrf.mxu1 }
 0x17b   :  { %v1868_v2 = vadd.f32 %v1867_v61, %v1866_v36  ;;  %v438_v3 = vadd.f32 %v6241_v51, %v437_v0  ;;  %v1399_v4 = vadd.f32 %v6241_v51, %v1398_v1 }
 0x17c   :  { %v2471_v5 = vpack.c.bf16 %v2357_v62, %v2357_v62  ;;  %v2629_v6 = vsel %vm649_vm2, %v2357_v62, 0.0  ;;  %v2734_v7 = vmul.f32 %v2357_v62, %v2357_v62  ;;  %v3431_v8 = vpack.c.bf16 %v3317_v63, %v3317_v63 }
 0x17d   :  { %v2630_v9 = vadd.f32 %v2629_v6, %v2628_v39  ;;  %v3589_v10 = vsel %vm649_vm2, %v3317_v63, 0.0  ;;  %v3694_v11 = vmul.f32 %v3317_v63, %v3317_v63  ;;  %v551_v12 = vpack.c.bf16 %v438_v3, %v438_v3 }
 0x17e   :  { %4604 = vst.msk [vmem:[%s7504_s3 + $0x278] sm:$0xf] %vm584_vm1, %v2471_v5  ;;  %v2827_v13 = vsel %vm649_vm2, %v2734_v7, 0.0  ;;  %v3590_v14 = vadd.f32 %v3589_v10, %v3588_v44  ;;  %v711_v15 = vsel %vm649_vm2, %v438_v3, 0.0  ;;  %v815_v16 = vmul.f32 %v438_v3, %v438_v3 }
 0x17f   :  { %v2828_v17 = vadd.f32 %v2827_v13, %v2826_v47  ;;  %4898 = vst.msk [vmem:[%s7504_s3 + $0x378] sm:$0xf] %vm584_vm1, %v3431_v8  ;;  %v3787_v18 = vsel %vm649_vm2, %v3694_v11, 0.0  ;;  %v712_v19 = vadd.f32 %v711_v15, %v710_v49  ;;  %v1512_v20 = vpack.c.bf16 %v1399_v4, %v1399_v4 }
 0x180   :  { %v3788_v21 = vadd.f32 %v3787_v18, %v3786_v53  ;;  %616 = vst.msk [vmem:[%s7504_s3 + $0x7c] sm:$0xf] %vm584_vm1, %v551_v12  ;;  %v909_v22 = vsel %vm649_vm2, %v815_v16, 0.0  ;;  %v1671_v23 = vsel %vm649_vm2, %v1399_v4, 0.0  ;;  %v1775_v24 = vmul.f32 %v1399_v4, %v1399_v4 }
 0x181   :  { %v910_v25 = vadd.f32 %v909_v22, %v908_v57  ;;  %4311 = vst.msk [vmem:[%s7504_s3 + $0x17c] sm:$0xf] %vm584_vm1, %v1512_v20  ;;  %v1672_v26 = vadd.f32 %v1671_v23, %v1670_v58  ;;  %v2358_v27 = vpop.f32.mrf.mxu2  ;;  %v3318_v28 = vpop.f32.mrf.mxu3 }
 0x182   :  { %v1869_v31 = vsel %vm649_vm2, %v1775_v24, 0.0  ;;  %v2359_v32 = vadd.f32 %v6241_v51, %v2358_v27  ;;  %v3319_v36 = vadd.f32 %v6241_v51, %v3318_v28  ;;  %v440_v50 = vpop.f32.mrf.mxu0  ;;  %v1401_v33 = vpop.f32.mrf.mxu1 }
 0x183   :  { %v1870_v37 = vadd.f32 %v1869_v31, %v1868_v2  ;;  %v441_v38 = vadd.f32 %v6241_v51, %v440_v50  ;;  %v1402_v39 = vadd.f32 %v6241_v51, %v1401_v33  ;;  %v4957_v50 = vld [vmem:[%s7501_s0 + $0xc8] sm:$0xff] }
 0x184   :  { %v2472_v40 = vpack.c.bf16 %v2359_v32, %v2359_v32  ;;  %v2631_v41 = vsel %vm649_vm2, %v2359_v32, 0.0  ;;  %v2735_v42 = vmul.f32 %v2359_v32, %v2359_v32  ;;  %v3432_v43 = vpack.c.bf16 %v3319_v36, %v3319_v36  ;;  %v4990_v33 = vld [vmem:[%s7501_s0 + $0x1c8] sm:$0xff] }
 0x185   :  { %v2632_v44 = vadd.f32 %v2631_v41, %v2630_v9  ;;  %v3591_v45 = vsel %vm649_vm2, %v3319_v36, 0.0  ;;  %v3695_v46 = vmul.f32 %v3319_v36, %v3319_v36  ;;  %v552_v47 = vpack.c.bf16 %v441_v38, %v441_v38  ;;  %4042 = vmatmul.msk.bf16.gmra.mxu0 %vm254_vm0, %v4956_v29  ;;  %4272 = vmatmul.msk.bf16.gmra.mxu1 %vm254_vm0, %v4989_v30  ;;  %v5056_v41 = vld [vmem:[%s7501_s0 + $0x3c8] sm:$0xff] }
 0x186   :  { %4605 = vst.msk [vmem:[%s7504_s3 + $0x27c] sm:$0xf] %vm584_vm1, %v2472_v40  ;;  %v2829_v48 = vsel %vm649_vm2, %v2735_v42, 0.0  ;;  %v3592_v49 = vadd.f32 %v3591_v45, %v3590_v14  ;;  %v713_v52 = vsel %vm649_vm2, %v441_v38, 0.0  ;;  %v816_v53 = vmul.f32 %v441_v38, %v441_v38  ;;  %4566 = vmatmul.msk.bf16.gmra.mxu2 %vm254_vm0, %v5022_v34  ;;  %4860 = vmatmul.msk.bf16.gmra.mxu3 %vm254_vm0, %v5055_v35  ;;  %v5023_v40 = vld [vmem:[%s7501_s0 + $0x2c8] sm:$0xff] }
 0x187   :  { %v2830_v54 = vadd.f32 %v2829_v48, %v2828_v17  ;;  %4899 = vst.msk [vmem:[%s7504_s3 + $0x37c] sm:$0xf] %vm584_vm1, %v3432_v43  ;;  %v3789_v55 = vsel %vm649_vm2, %v3695_v46, 0.0  ;;  %v714_v56 = vadd.f32 %v713_v52, %v712_v19  ;;  %v1513_v57 = vpack.c.bf16 %v1402_v39, %v1402_v39 }
 0x188   :  { %v3790_v58 = vadd.f32 %v3789_v55, %v3788_v21  ;;  %617 = vst.msk [vmem:[%s7504_s3 + $0x80] sm:$0xf] %vm584_vm1, %v552_v47  ;;  %v911_v59 = vsel %vm649_vm2, %v816_v53, 0.0  ;;  %v1673_v60 = vsel %vm649_vm2, %v1402_v39, 0.0  ;;  %v1776_v61 = vmul.f32 %v1402_v39, %v1402_v39 }
 0x189   :  { %v912_v62 = vadd.f32 %v911_v59, %v910_v25  ;;  %4312 = vst.msk [vmem:[%s7504_s3 + $0x180] sm:$0xf] %vm584_vm1, %v1513_v57  ;;  %v1674_v63 = vadd.f32 %v1673_v60, %v1672_v26  ;;  %v2361_v0 = vpop.f32.mrf.mxu2  ;;  %v3321_v1 = vpop.f32.mrf.mxu3 }
 0x18a   :  { %v1871_v2 = vsel %vm649_vm2, %v1776_v61, 0.0  ;;  %v2362_v3 = vadd.f32 %v6241_v51, %v2361_v0  ;;  %v3322_v4 = vadd.f32 %v6241_v51, %v3321_v1  ;;  %v442_v5 = vpop.f32.mrf.mxu0  ;;  %v1403_v6 = vpop.f32.mrf.mxu1 }
 0x18b   :  { %v1872_v7 = vadd.f32 %v1871_v2, %v1870_v37  ;;  %v443_v8 = vadd.f32 %v6241_v51, %v442_v5  ;;  %v1404_v9 = vadd.f32 %v6241_v51, %v1403_v6 }
 0x18c   :  { %v2473_v10 = vpack.c.bf16 %v2362_v3, %v2362_v3  ;;  %v2633_v11 = vsel %vm649_vm2, %v2362_v3, 0.0  ;;  %v2736_v12 = vmul.f32 %v2362_v3, %v2362_v3  ;;  %v3433_v13 = vpack.c.bf16 %v3322_v4, %v3322_v4 }
 0x18d   :  { %v2634_v14 = vadd.f32 %v2633_v11, %v2632_v44  ;;  %v3593_v15 = vsel %vm649_vm2, %v3322_v4, 0.0  ;;  %v3696_v16 = vmul.f32 %v3322_v4, %v3322_v4  ;;  %v553_v17 = vpack.c.bf16 %v443_v8, %v443_v8 }
 0x18e   :  { %4606 = vst.msk [vmem:[%s7504_s3 + $0x280] sm:$0xf] %vm584_vm1, %v2473_v10  ;;  %v2831_v18 = vsel %vm649_vm2, %v2736_v12, 0.0  ;;  %v3594_v19 = vadd.f32 %v3593_v15, %v3592_v49  ;;  %v715_v20 = vsel %vm649_vm2, %v443_v8, 0.0  ;;  %v817_v21 = vmul.f32 %v443_v8, %v443_v8 }
 0x18f   :  { %v2832_v22 = vadd.f32 %v2831_v18, %v2830_v54  ;;  %4900 = vst.msk [vmem:[%s7504_s3 + $0x380] sm:$0xf] %vm584_vm1, %v3433_v13  ;;  %v3791_v23 = vsel %vm649_vm2, %v3696_v16, 0.0  ;;  %v716_v24 = vadd.f32 %v715_v20, %v714_v56  ;;  %v1514_v25 = vpack.c.bf16 %v1404_v9, %v1404_v9 }
 0x190   :  { %v3792_v26 = vadd.f32 %v3791_v23, %v3790_v58  ;;  %618 = vst.msk [vmem:[%s7504_s3 + $0x84] sm:$0xf] %vm584_vm1, %v553_v17  ;;  %v913_v27 = vsel %vm649_vm2, %v817_v21, 0.0  ;;  %v1675_v28 = vsel %vm649_vm2, %v1404_v9, 0.0  ;;  %v1777_v29 = vmul.f32 %v1404_v9, %v1404_v9 }
 0x191   :  { %v914_v30 = vadd.f32 %v913_v27, %v912_v62  ;;  %4313 = vst.msk [vmem:[%s7504_s3 + $0x184] sm:$0xf] %vm584_vm1, %v1514_v25  ;;  %v1676_v31 = vadd.f32 %v1675_v28, %v1674_v63  ;;  %v2363_v32 = vpop.f32.mrf.mxu2  ;;  %v3323_v36 = vpop.f32.mrf.mxu3 }
 0x192   :  { %v1873_v34 = vsel %vm649_vm2, %v1777_v29, 0.0  ;;  %v2364_v35 = vadd.f32 %v6241_v51, %v2363_v32  ;;  %v3324_v37 = vadd.f32 %v6241_v51, %v3323_v36  ;;  %v445_v38 = vpop.f32.mrf.mxu0  ;;  %v1406_v39 = vpop.f32.mrf.mxu1 }
 0x193   :  { %v1874_v42 = vadd.f32 %v1873_v34, %v1872_v7  ;;  %v446_v43 = vadd.f32 %v6241_v51, %v445_v38  ;;  %v1407_v44 = vadd.f32 %v6241_v51, %v1406_v39  ;;  %v4958_v38 = vld [vmem:[%s7501_s0 + $0xd0] sm:$0xff] }
 0x194   :  { %v2474_v45 = vpack.c.bf16 %v2364_v35, %v2364_v35  ;;  %v2635_v46 = vsel %vm649_vm2, %v2364_v35, 0.0  ;;  %v2737_v47 = vmul.f32 %v2364_v35, %v2364_v35  ;;  %v3434_v48 = vpack.c.bf16 %v3324_v37, %v3324_v37  ;;  %v4991_v39 = vld [vmem:[%s7501_s0 + $0x1d0] sm:$0xff] }
 0x195   :  { %v2636_v49 = vadd.f32 %v2635_v46, %v2634_v14  ;;  %v3595_v52 = vsel %vm649_vm2, %v3324_v37, 0.0  ;;  %v3697_v53 = vmul.f32 %v3324_v37, %v3324_v37  ;;  %v554_v54 = vpack.c.bf16 %v446_v43, %v446_v43  ;;  %4043 = vmatmul.msk.bf16.gmra.mxu0 %vm254_vm0, %v4957_v50  ;;  %4273 = vmatmul.msk.bf16.gmra.mxu1 %vm254_vm0, %v4990_v33  ;;  %v5057_v46 = vld [vmem:[%s7501_s0 + $0x3d0] sm:$0xff] }
 0x196   :  { %4607 = vst.msk [vmem:[%s7504_s3 + $0x284] sm:$0xf] %vm584_vm1, %v2474_v45  ;;  %v2833_v55 = vsel %vm649_vm2, %v2737_v47, 0.0  ;;  %v3596_v56 = vadd.f32 %v3595_v52, %v3594_v19  ;;  %v717_v57 = vsel %vm649_vm2, %v446_v43, 0.0  ;;  %v818_v58 = vmul.f32 %v446_v43, %v446_v43  ;;  %4567 = vmatmul.msk.bf16.gmra.mxu2 %vm254_vm0, %v5023_v40  ;;  %4861 = vmatmul.msk.bf16.gmra.mxu3 %vm254_vm0, %v5056_v41  ;;  %v5024_v45 = vld [vmem:[%s7501_s0 + $0x2d0] sm:$0xff] }
 0x197   :  { %v2834_v59 = vadd.f32 %v2833_v55, %v2832_v22  ;;  %4901 = vst.msk [vmem:[%s7504_s3 + $0x384] sm:$0xf] %vm584_vm1, %v3434_v48  ;;  %v3793_v60 = vsel %vm649_vm2, %v3697_v53, 0.0  ;;  %v718_v61 = vadd.f32 %v717_v57, %v716_v24  ;;  %v1515_v62 = vpack.c.bf16 %v1407_v44, %v1407_v44 }
 0x198   :  { %v3794_v63 = vadd.f32 %v3793_v60, %v3792_v26  ;;  %619 = vst.msk [vmem:[%s7504_s3 + $0x88] sm:$0xf] %vm584_vm1, %v554_v54  ;;  %v915_v0 = vsel %vm649_vm2, %v818_v58, 0.0  ;;  %v1677_v1 = vsel %vm649_vm2, %v1407_v44, 0.0  ;;  %v1778_v2 = vmul.f32 %v1407_v44, %v1407_v44 }
 0x199   :  { %v916_v3 = vadd.f32 %v915_v0, %v914_v30  ;;  %4314 = vst.msk [vmem:[%s7504_s3 + $0x188] sm:$0xf] %vm584_vm1, %v1515_v62  ;;  %v1678_v4 = vadd.f32 %v1677_v1, %v1676_v31  ;;  %v2366_v5 = vpop.f32.mrf.mxu2  ;;  %v3326_v6 = vpop.f32.mrf.mxu3 }
 0x19a   :  { %v1875_v7 = vsel %vm649_vm2, %v1778_v2, 0.0  ;;  %v2367_v8 = vadd.f32 %v6241_v51, %v2366_v5  ;;  %v3327_v9 = vadd.f32 %v6241_v51, %v3326_v6  ;;  %v447_v10 = vpop.f32.mrf.mxu0  ;;  %v1408_v11 = vpop.f32.mrf.mxu1 }
 0x19b   :  { %v1876_v12 = vadd.f32 %v1875_v7, %v1874_v42  ;;  %v448_v13 = vadd.f32 %v6241_v51, %v447_v10  ;;  %v1409_v14 = vadd.f32 %v6241_v51, %v1408_v11 }
 0x19c   :  { %v2475_v15 = vpack.c.bf16 %v2367_v8, %v2367_v8  ;;  %v2637_v16 = vsel %vm649_vm2, %v2367_v8, 0.0  ;;  %v2738_v17 = vmul.f32 %v2367_v8, %v2367_v8  ;;  %v3435_v18 = vpack.c.bf16 %v3327_v9, %v3327_v9 }
 0x19d   :  { %v2638_v19 = vadd.f32 %v2637_v16, %v2636_v49  ;;  %v3597_v20 = vsel %vm649_vm2, %v3327_v9, 0.0  ;;  %v3698_v21 = vmul.f32 %v3327_v9, %v3327_v9  ;;  %v555_v22 = vpack.c.bf16 %v448_v13, %v448_v13 }
 0x19e   :  { %4608 = vst.msk [vmem:[%s7504_s3 + $0x288] sm:$0xf] %vm584_vm1, %v2475_v15  ;;  %v2835_v23 = vsel %vm649_vm2, %v2738_v17, 0.0  ;;  %v3598_v24 = vadd.f32 %v3597_v20, %v3596_v56  ;;  %v719_v25 = vsel %vm649_vm2, %v448_v13, 0.0  ;;  %v819_v26 = vmul.f32 %v448_v13, %v448_v13 }
 0x19f   :  { %v2836_v27 = vadd.f32 %v2835_v23, %v2834_v59  ;;  %4902 = vst.msk [vmem:[%s7504_s3 + $0x388] sm:$0xf] %vm584_vm1, %v3435_v18  ;;  %v3795_v28 = vsel %vm649_vm2, %v3698_v21, 0.0  ;;  %v720_v29 = vadd.f32 %v719_v25, %v718_v61  ;;  %v1516_v30 = vpack.c.bf16 %v1409_v14, %v1409_v14 }
 0x1a0   :  { %v3796_v31 = vadd.f32 %v3795_v28, %v3794_v63  ;;  %620 = vst.msk [vmem:[%s7504_s3 + $0x8c] sm:$0xf] %vm584_vm1, %v555_v22  ;;  %v917_v32 = vsel %vm649_vm2, %v819_v26, 0.0  ;;  %v1679_v36 = vsel %vm649_vm2, %v1409_v14, 0.0  ;;  %v1779_v50 = vmul.f32 %v1409_v14, %v1409_v14 }
 0x1a1   :  { %v918_v33 = vadd.f32 %v917_v32, %v916_v3  ;;  %4315 = vst.msk [vmem:[%s7504_s3 + $0x18c] sm:$0xf] %vm584_vm1, %v1516_v30  ;;  %v1680_v34 = vadd.f32 %v1679_v36, %v1678_v4  ;;  %v2368_v35 = vpop.f32.mrf.mxu2  ;;  %v3328_v37 = vpop.f32.mrf.mxu3 }
 0x1a2   :  { %v1877_v40 = vsel %vm649_vm2, %v1779_v50, 0.0  ;;  %v2369_v41 = vadd.f32 %v6241_v51, %v2368_v35  ;;  %v3329_v42 = vadd.f32 %v6241_v51, %v3328_v37  ;;  %v450_v43 = vpop.f32.mrf.mxu0  ;;  %v1411_v44 = vpop.f32.mrf.mxu1 }
 0x1a3   :  { %v1878_v47 = vadd.f32 %v1877_v40, %v1876_v12  ;;  %v451_v48 = vadd.f32 %v6241_v51, %v450_v43  ;;  %v1412_v49 = vadd.f32 %v6241_v51, %v1411_v44  ;;  %v4959_v43 = vld [vmem:[%s7501_s0 + $0xd8] sm:$0xff] }
 0x1a4   :  { %v2476_v52 = vpack.c.bf16 %v2369_v41, %v2369_v41  ;;  %v2639_v53 = vsel %vm649_vm2, %v2369_v41, 0.0  ;;  %v2739_v54 = vmul.f32 %v2369_v41, %v2369_v41  ;;  %v3436_v55 = vpack.c.bf16 %v3329_v42, %v3329_v42  ;;  %v4992_v44 = vld [vmem:[%s7501_s0 + $0x1d8] sm:$0xff] }
 0x1a5   :  { %v2640_v56 = vadd.f32 %v2639_v53, %v2638_v19  ;;  %v3599_v57 = vsel %vm649_vm2, %v3329_v42, 0.0  ;;  %v3699_v58 = vmul.f32 %v3329_v42, %v3329_v42  ;;  %v556_v59 = vpack.c.bf16 %v451_v48, %v451_v48  ;;  %4044 = vmatmul.msk.bf16.gmra.mxu0 %vm254_vm0, %v4958_v38  ;;  %4274 = vmatmul.msk.bf16.gmra.mxu1 %vm254_vm0, %v4991_v39  ;;  %v5058_v53 = vld [vmem:[%s7501_s0 + $0x3d8] sm:$0xff] }
 0x1a6   :  { %4609 = vst.msk [vmem:[%s7504_s3 + $0x28c] sm:$0xf] %vm584_vm1, %v2476_v52  ;;  %v2837_v60 = vsel %vm649_vm2, %v2739_v54, 0.0  ;;  %v3600_v61 = vadd.f32 %v3599_v57, %v3598_v24  ;;  %v721_v62 = vsel %vm649_vm2, %v451_v48, 0.0  ;;  %v820_v63 = vmul.f32 %v451_v48, %v451_v48  ;;  %4568 = vmatmul.msk.bf16.gmra.mxu2 %vm254_vm0, %v5024_v45  ;;  %4862 = vmatmul.msk.bf16.gmra.mxu3 %vm254_vm0, %v5057_v46  ;;  %v5025_v52 = vld [vmem:[%s7501_s0 + $0x2d8] sm:$0xff] }
 0x1a7   :  { %v2838_v0 = vadd.f32 %v2837_v60, %v2836_v27  ;;  %4903 = vst.msk [vmem:[%s7504_s3 + $0x38c] sm:$0xf] %vm584_vm1, %v3436_v55  ;;  %v3797_v1 = vsel %vm649_vm2, %v3699_v58, 0.0  ;;  %v722_v2 = vadd.f32 %v721_v62, %v720_v29  ;;  %v1517_v3 = vpack.c.bf16 %v1412_v49, %v1412_v49 }
 0x1a8   :  { %v3798_v4 = vadd.f32 %v3797_v1, %v3796_v31  ;;  %621 = vst.msk [vmem:[%s7504_s3 + $0x90] sm:$0xf] %vm584_vm1, %v556_v59  ;;  %v919_v5 = vsel %vm649_vm2, %v820_v63, 0.0  ;;  %v1681_v6 = vsel %vm649_vm2, %v1412_v49, 0.0  ;;  %v1780_v7 = vmul.f32 %v1412_v49, %v1412_v49 }
 0x1a9   :  { %v920_v8 = vadd.f32 %v919_v5, %v918_v33  ;;  %4316 = vst.msk [vmem:[%s7504_s3 + $0x190] sm:$0xf] %vm584_vm1, %v1517_v3  ;;  %v1682_v9 = vadd.f32 %v1681_v6, %v1680_v34  ;;  %v2371_v10 = vpop.f32.mrf.mxu2  ;;  %v3331_v11 = vpop.f32.mrf.mxu3 }
 0x1aa   :  { %v1879_v12 = vsel %vm649_vm2, %v1780_v7, 0.0  ;;  %v2372_v13 = vadd.f32 %v6241_v51, %v2371_v10  ;;  %v3332_v14 = vadd.f32 %v6241_v51, %v3331_v11  ;;  %v452_v15 = vpop.f32.mrf.mxu0  ;;  %v1413_v16 = vpop.f32.mrf.mxu1 }
 0x1ab   :  { %v1880_v17 = vadd.f32 %v1879_v12, %v1878_v47  ;;  %v453_v18 = vadd.f32 %v6241_v51, %v452_v15  ;;  %v1414_v19 = vadd.f32 %v6241_v51, %v1413_v16 }
 0x1ac   :  { %v2477_v20 = vpack.c.bf16 %v2372_v13, %v2372_v13  ;;  %v2641_v21 = vsel %vm649_vm2, %v2372_v13, 0.0  ;;  %v2740_v22 = vmul.f32 %v2372_v13, %v2372_v13  ;;  %v3437_v23 = vpack.c.bf16 %v3332_v14, %v3332_v14 }
 0x1ad   :  { %v2642_v24 = vadd.f32 %v2641_v21, %v2640_v56  ;;  %v3601_v25 = vsel %vm649_vm2, %v3332_v14, 0.0  ;;  %v3700_v26 = vmul.f32 %v3332_v14, %v3332_v14  ;;  %v557_v27 = vpack.c.bf16 %v453_v18, %v453_v18 }
 0x1ae   :  { %4610 = vst.msk [vmem:[%s7504_s3 + $0x290] sm:$0xf] %vm584_vm1, %v2477_v20  ;;  %v2839_v28 = vsel %vm649_vm2, %v2740_v22, 0.0  ;;  %v3602_v29 = vadd.f32 %v3601_v25, %v3600_v61  ;;  %v723_v30 = vsel %vm649_vm2, %v453_v18, 0.0  ;;  %v821_v31 = vmul.f32 %v453_v18, %v453_v18 }
 0x1af   :  { %v2840_v32 = vadd.f32 %v2839_v28, %v2838_v0  ;;  %4904 = vst.msk [vmem:[%s7504_s3 + $0x390] sm:$0xf] %vm584_vm1, %v3437_v23  ;;  %v3799_v36 = vsel %vm649_vm2, %v3700_v26, 0.0  ;;  %v724_v50 = vadd.f32 %v723_v30, %v722_v2  ;;  %v1518_v33 = vpack.c.bf16 %v1414_v19, %v1414_v19 }
 0x1b0   :  { %v3800_v34 = vadd.f32 %v3799_v36, %v3798_v4  ;;  %622 = vst.msk [vmem:[%s7504_s3 + $0x94] sm:$0xf] %vm584_vm1, %v557_v27  ;;  %v921_v35 = vsel %vm649_vm2, %v821_v31, 0.0  ;;  %v1683_v37 = vsel %vm649_vm2, %v1414_v19, 0.0  ;;  %v1781_v38 = vmul.f32 %v1414_v19, %v1414_v19 }
 0x1b1   :  { %v922_v39 = vadd.f32 %v921_v35, %v920_v8  ;;  %4317 = vst.msk [vmem:[%s7504_s3 + $0x194] sm:$0xf] %vm584_vm1, %v1518_v33  ;;  %v1684_v40 = vadd.f32 %v1683_v37, %v1682_v9  ;;  %v2373_v41 = vpop.f32.mrf.mxu2  ;;  %v3333_v42 = vpop.f32.mrf.mxu3 }
 0x1b2   :  { %v1881_v45 = vsel %vm649_vm2, %v1781_v38, 0.0  ;;  %v2374_v46 = vadd.f32 %v6241_v51, %v2373_v41  ;;  %v3334_v47 = vadd.f32 %v6241_v51, %v3333_v42  ;;  %v455_v48 = vpop.f32.mrf.mxu0  ;;  %v1416_v49 = vpop.f32.mrf.mxu1 }
 0x1b3   :  { %v1882_v54 = vadd.f32 %v1881_v45, %v1880_v17  ;;  %v456_v55 = vadd.f32 %v6241_v51, %v455_v48  ;;  %v1417_v56 = vadd.f32 %v6241_v51, %v1416_v49  ;;  %v4993_v48 = vld [vmem:[%s7501_s0 + $0x1e0] sm:$0xff] }
 0x1b4   :  { %v2478_v57 = vpack.c.bf16 %v2374_v46, %v2374_v46  ;;  %v2643_v58 = vsel %vm649_vm2, %v2374_v46, 0.0  ;;  %v2741_v59 = vmul.f32 %v2374_v46, %v2374_v46  ;;  %v3438_v60 = vpack.c.bf16 %v3334_v47, %v3334_v47 }
 0x1b5   :  { %v2644_v61 = vadd.f32 %v2643_v58, %v2642_v24  ;;  %v3603_v62 = vsel %vm649_vm2, %v3334_v47, 0.0  ;;  %v3701_v63 = vmul.f32 %v3334_v47, %v3334_v47  ;;  %v558_v0 = vpack.c.bf16 %v456_v55, %v456_v55  ;;  %4045 = vmatmul.msk.bf16.gmra.mxu0 %vm254_vm0, %v4959_v43  ;;  %4275 = vmatmul.msk.bf16.gmra.mxu1 %vm254_vm0, %v4992_v44  ;;  %v4960_v47 = vld [vmem:[%s7501_s0 + $0xe0] sm:$0xff] }
 0x1b6   :  { %4611 = vst.msk [vmem:[%s7504_s3 + $0x294] sm:$0xf] %vm584_vm1, %v2478_v57  ;;  %v2841_v1 = vsel %vm649_vm2, %v2741_v59, 0.0  ;;  %v3604_v2 = vadd.f32 %v3603_v62, %v3602_v29  ;;  %v725_v3 = vsel %vm649_vm2, %v456_v55, 0.0  ;;  %v822_v4 = vmul.f32 %v456_v55, %v456_v55  ;;  %4569 = vmatmul.msk.bf16.gmra.mxu2 %vm254_vm0, %v5025_v52  ;;  %4863 = vmatmul.msk.bf16.gmra.mxu3 %vm254_vm0, %v5058_v53  ;;  %v6712_v52 = vld [vmem:[%s7503_s2] ss:$0 sm:$0xff] }
 0x1b7   :  { %v2842_v5 = vadd.f32 %v2841_v1, %v2840_v32  ;;  %4905 = vst.msk [vmem:[%s7504_s3 + $0x394] sm:$0xf] %vm584_vm1, %v3438_v60  ;;  %v3801_v6 = vsel %vm649_vm2, %v3701_v63, 0.0  ;;  %v726_v7 = vadd.f32 %v725_v3, %v724_v50  ;;  %v1519_v8 = vpack.c.bf16 %v1417_v56, %v1417_v56  ;;  %v5026_v57 = vld [vmem:[%s7501_s0 + $0x2e0] sm:$0xff] }
 0x1b8   :  { %v3802_v9 = vadd.f32 %v3801_v6, %v3800_v34  ;;  %623 = vst.msk [vmem:[%s7504_s3 + $0x98] sm:$0xf] %vm584_vm1, %v558_v0  ;;  %v923_v10 = vsel %vm649_vm2, %v822_v4, 0.0  ;;  %v1685_v11 = vsel %vm649_vm2, %v1417_v56, 0.0  ;;  %v1782_v12 = vmul.f32 %v1417_v56, %v1417_v56  ;;  %v5059_v58 = vld [vmem:[%s7501_s0 + $0x3e0] sm:$0xff] }
 0x1b9   :  { %v924_v13 = vadd.f32 %v923_v10, %v922_v39  ;;  %4318 = vst.msk [vmem:[%s7504_s3 + $0x198] sm:$0xf] %vm584_vm1, %v1519_v8  ;;  %v1686_v14 = vadd.f32 %v1685_v11, %v1684_v40  ;;  %v2376_v15 = vpop.f32.mrf.mxu2  ;;  %v3336_v16 = vpop.f32.mrf.mxu3 }
 0x1ba   :  { %v1883_v17 = vsel %vm649_vm2, %v1782_v12, 0.0  ;;  %v2377_v18 = vadd.f32 %v6241_v51, %v2376_v15  ;;  %v3337_v19 = vadd.f32 %v6241_v51, %v3336_v16  ;;  %v457_v20 = vpop.f32.mrf.mxu0  ;;  %v1418_v21 = vpop.f32.mrf.mxu1 }
 0x1bb   :  { %v1884_v22 = vadd.f32 %v1883_v17, %v1882_v54  ;;  %v458_v23 = vadd.f32 %v6241_v51, %v457_v20  ;;  %v1419_v24 = vadd.f32 %v6241_v51, %v1418_v21 }
 0x1bc   :  { %v2479_v25 = vpack.c.bf16 %v2377_v18, %v2377_v18  ;;  %v2645_v26 = vsel %vm649_vm2, %v2377_v18, 0.0  ;;  %v2742_v27 = vmul.f32 %v2377_v18, %v2377_v18  ;;  %v3439_v28 = vpack.c.bf16 %v3337_v19, %v3337_v19 }
 0x1bd   :  { %v2646_v29 = vadd.f32 %v2645_v26, %v2644_v61  ;;  %v3605_v30 = vsel %vm649_vm2, %v3337_v19, 0.0  ;;  %v3702_v31 = vmul.f32 %v3337_v19, %v3337_v19  ;;  %v559_v32 = vpack.c.bf16 %v458_v23, %v458_v23 }
 0x1be   :  { %4612 = vst.msk [vmem:[%s7504_s3 + $0x298] sm:$0xf] %vm584_vm1, %v2479_v25  ;;  %v2843_v36 = vsel %vm649_vm2, %v2742_v27, 0.0  ;;  %v3606_v50 = vadd.f32 %v3605_v30, %v3604_v2  ;;  %v727_v51 = vsel %vm649_vm2, %v458_v23, 0.0  ;;  %v823_v33 = vmul.f32 %v458_v23, %v458_v23 }
 0x1bf   :  { %v2844_v34 = vadd.f32 %v2843_v36, %v2842_v5  ;;  %4906 = vst.msk [vmem:[%s7504_s3 + $0x398] sm:$0xf] %vm584_vm1, %v3439_v28  ;;  %v3803_v35 = vsel %vm649_vm2, %v3702_v31, 0.0  ;;  %v728_v37 = vadd.f32 %v727_v51, %v726_v7  ;;  %v1520_v38 = vpack.c.bf16 %v1419_v24, %v1419_v24 }
 0x1c0   :  { %v3804_v39 = vadd.f32 %v3803_v35, %v3802_v9  ;;  %624 = vst.msk [vmem:[%s7504_s3 + $0x9c] sm:$0xf] %vm584_vm1, %v559_v32  ;;  %v925_v40 = vsel %vm649_vm2, %v823_v33, 0.0  ;;  %v1687_v41 = vsel %vm649_vm2, %v1419_v24, 0.0  ;;  %v1783_v42 = vmul.f32 %v1419_v24, %v1419_v24 }
 0x1c1   :  { %v926_v43 = vadd.f32 %v925_v40, %v924_v13  ;;  %4319 = vst.msk [vmem:[%s7504_s3 + $0x19c] sm:$0xf] %vm584_vm1, %v1520_v38  ;;  %v1688_v44 = vadd.f32 %v1687_v41, %v1686_v14  ;;  %v2378_v45 = vpop.f32.mrf.mxu2  ;;  %v3338_v46 = vpop.f32.mrf.mxu3 }
 0x1c2   :  { %v1885_v49 = vsel %vm649_vm2, %v1783_v42, 0.0  ;;  %v2379_v53 = vadd.f32 %v6712_v52, %v2378_v45  ;;  %v3339_v54 = vadd.f32 %v6712_v52, %v3338_v46  ;;  %v460_v55 = vpop.f32.mrf.mxu0  ;;  %v1421_v56 = vpop.f32.mrf.mxu1 }
 0x1c3   :  { %v1886_v59 = vadd.f32 %v1885_v49, %v1884_v22  ;;  %v461_v60 = vadd.f32 %v6712_v52, %v460_v55  ;;  %v1422_v61 = vadd.f32 %v6712_v52, %v1421_v56  ;;  %v4961_v55 = vld [vmem:[%s7501_s0 + $0xe8] sm:$0xff] }
 0x1c4   :  { %v2480_v62 = vpack.c.bf16 %v2379_v53, %v2379_v53  ;;  %v2647_v63 = vsel %vm649_vm2, %v2379_v53, 0.0  ;;  %v2743_v0 = vmul.f32 %v2379_v53, %v2379_v53  ;;  %v3440_v1 = vpack.c.bf16 %v3339_v54, %v3339_v54  ;;  %v4994_v56 = vld [vmem:[%s7501_s0 + $0x1e8] sm:$0xff] }
 0x1c5   :  { %v2648_v2 = vadd.f32 %v2647_v63, %v2646_v29  ;;  %v3607_v3 = vsel %vm649_vm2, %v3339_v54, 0.0  ;;  %v3703_v4 = vmul.f32 %v3339_v54, %v3339_v54  ;;  %v560_v5 = vpack.c.bf16 %v461_v60, %v461_v60  ;;  %4046 = vmatmul.msk.bf16.gmra.mxu0 %vm254_vm0, %v4960_v47  ;;  %4276 = vmatmul.msk.bf16.gmra.mxu1 %vm254_vm0, %v4993_v48  ;;  %v5060_v63 = vld [vmem:[%s7501_s0 + $0x3e8] sm:$0xff] }
 0x1c6   :  { %4613 = vst.msk [vmem:[%s7504_s3 + $0x29c] sm:$0xf] %vm584_vm1, %v2480_v62  ;;  %v2845_v6 = vsel %vm649_vm2, %v2743_v0, 0.0  ;;  %v3608_v7 = vadd.f32 %v3607_v3, %v3606_v50  ;;  %v729_v8 = vsel %vm649_vm2, %v461_v60, 0.0  ;;  %v824_v9 = vmul.f32 %v461_v60, %v461_v60  ;;  %4570 = vmatmul.msk.bf16.gmra.mxu2 %vm254_vm0, %v5026_v57  ;;  %4864 = vmatmul.msk.bf16.gmra.mxu3 %vm254_vm0, %v5059_v58  ;;  %v5027_v62 = vld [vmem:[%s7501_s0 + $0x2e8] sm:$0xff] }
 0x1c7   :  { %v2846_v10 = vadd.f32 %v2845_v6, %v2844_v34  ;;  %4907 = vst.msk [vmem:[%s7504_s3 + $0x39c] sm:$0xf] %vm584_vm1, %v3440_v1  ;;  %v3805_v11 = vsel %vm649_vm2, %v3703_v4, 0.0  ;;  %v730_v12 = vadd.f32 %v729_v8, %v728_v37  ;;  %v1521_v13 = vpack.c.bf16 %v1422_v61, %v1422_v61 }
 0x1c8   :  { %v3806_v14 = vadd.f32 %v3805_v11, %v3804_v39  ;;  %625 = vst.msk [vmem:[%s7504_s3 + $0xa0] sm:$0xf] %vm584_vm1, %v560_v5  ;;  %v927_v15 = vsel %vm649_vm2, %v824_v9, 0.0  ;;  %v1689_v16 = vsel %vm649_vm2, %v1422_v61, 0.0  ;;  %v1784_v17 = vmul.f32 %v1422_v61, %v1422_v61 }
 0x1c9   :  { %v928_v18 = vadd.f32 %v927_v15, %v926_v43  ;;  %4320 = vst.msk [vmem:[%s7504_s3 + $0x1a0] sm:$0xf] %vm584_vm1, %v1521_v13  ;;  %v1690_v19 = vadd.f32 %v1689_v16, %v1688_v44  ;;  %v2381_v20 = vpop.f32.mrf.mxu2  ;;  %v3341_v21 = vpop.f32.mrf.mxu3 }
 0x1ca   :  { %v1887_v22 = vsel %vm649_vm2, %v1784_v17, 0.0  ;;  %v2382_v23 = vadd.f32 %v6712_v52, %v2381_v20  ;;  %v3342_v24 = vadd.f32 %v6712_v52, %v3341_v21  ;;  %v462_v25 = vpop.f32.mrf.mxu0  ;;  %v1423_v26 = vpop.f32.mrf.mxu1 }
 0x1cb   :  { %v1888_v27 = vadd.f32 %v1887_v22, %v1886_v59  ;;  %v463_v28 = vadd.f32 %v6712_v52, %v462_v25  ;;  %v1424_v29 = vadd.f32 %v6712_v52, %v1423_v26 }
 0x1cc   :  { %v2481_v30 = vpack.c.bf16 %v2382_v23, %v2382_v23  ;;  %v2649_v31 = vsel %vm649_vm2, %v2382_v23, 0.0  ;;  %v2744_v32 = vmul.f32 %v2382_v23, %v2382_v23  ;;  %v3441_v36 = vpack.c.bf16 %v3342_v24, %v3342_v24 }
 0x1cd   :  { %v2650_v50 = vadd.f32 %v2649_v31, %v2648_v2  ;;  %v3609_v51 = vsel %vm649_vm2, %v3342_v24, 0.0  ;;  %v3704_v33 = vmul.f32 %v3342_v24, %v3342_v24  ;;  %v561_v34 = vpack.c.bf16 %v463_v28, %v463_v28 }
 0x1ce   :  { %4614 = vst.msk [vmem:[%s7504_s3 + $0x2a0] sm:$0xf] %vm584_vm1, %v2481_v30  ;;  %v2847_v35 = vsel %vm649_vm2, %v2744_v32, 0.0  ;;  %v3610_v37 = vadd.f32 %v3609_v51, %v3608_v7  ;;  %v731_v38 = vsel %vm649_vm2, %v463_v28, 0.0  ;;  %v825_v39 = vmul.f32 %v463_v28, %v463_v28 }
 0x1cf   :  { %v2848_v40 = vadd.f32 %v2847_v35, %v2846_v10  ;;  %4908 = vst.msk [vmem:[%s7504_s3 + $0x3a0] sm:$0xf] %vm584_vm1, %v3441_v36  ;;  %v3807_v41 = vsel %vm649_vm2, %v3704_v33, 0.0  ;;  %v732_v42 = vadd.f32 %v731_v38, %v730_v12  ;;  %v1522_v43 = vpack.c.bf16 %v1424_v29, %v1424_v29 }
 0x1d0   :  { %v3808_v44 = vadd.f32 %v3807_v41, %v3806_v14  ;;  %626 = vst.msk [vmem:[%s7504_s3 + $0xa4] sm:$0xf] %vm584_vm1, %v561_v34  ;;  %v929_v45 = vsel %vm649_vm2, %v825_v39, 0.0  ;;  %v1691_v46 = vsel %vm649_vm2, %v1424_v29, 0.0  ;;  %v1785_v47 = vmul.f32 %v1424_v29, %v1424_v29 }
 0x1d1   :  { %v930_v48 = vadd.f32 %v929_v45, %v928_v18  ;;  %4321 = vst.msk [vmem:[%s7504_s3 + $0x1a4] sm:$0xf] %vm584_vm1, %v1522_v43  ;;  %v1692_v49 = vadd.f32 %v1691_v46, %v1690_v19  ;;  %v2383_v53 = vpop.f32.mrf.mxu2  ;;  %v3343_v54 = vpop.f32.mrf.mxu3 }
 0x1d2   :  { %v1889_v57 = vsel %vm649_vm2, %v1785_v47, 0.0  ;;  %v2384_v58 = vadd.f32 %v6712_v52, %v2383_v53  ;;  %v3344_v59 = vadd.f32 %v6712_v52, %v3343_v54  ;;  %v465_v60 = vpop.f32.mrf.mxu0  ;;  %v1426_v61 = vpop.f32.mrf.mxu1 }
 0x1d3   :  { %v1890_v0 = vadd.f32 %v1889_v57, %v1888_v27  ;;  %v466_v1 = vadd.f32 %v6712_v52, %v465_v60  ;;  %v1427_v2 = vadd.f32 %v6712_v52, %v1426_v61  ;;  %v4962_v60 = vld [vmem:[%s7501_s0 + $0xf0] sm:$0xff] }
 0x1d4   :  { %v2482_v3 = vpack.c.bf16 %v2384_v58, %v2384_v58  ;;  %v2651_v4 = vsel %vm649_vm2, %v2384_v58, 0.0  ;;  %v2745_v5 = vmul.f32 %v2384_v58, %v2384_v58  ;;  %v3442_v6 = vpack.c.bf16 %v3344_v59, %v3344_v59  ;;  %v4995_v61 = vld [vmem:[%s7501_s0 + $0x1f0] sm:$0xff] }
 0x1d5   :  { %v2652_v7 = vadd.f32 %v2651_v4, %v2650_v50  ;;  %v3611_v8 = vsel %vm649_vm2, %v3344_v59, 0.0  ;;  %v3705_v9 = vmul.f32 %v3344_v59, %v3344_v59  ;;  %v562_v10 = vpack.c.bf16 %v466_v1, %v466_v1  ;;  %4047 = vmatmul.msk.bf16.gmra.mxu0 %vm254_vm0, %v4961_v55  ;;  %4277 = vmatmul.msk.bf16.gmra.mxu1 %vm254_vm0, %v4994_v56  ;;  %v5061_v4 = vld [vmem:[%s7501_s0 + $0x3f0] sm:$0xff] }
 0x1d6   :  { %4615 = vst.msk [vmem:[%s7504_s3 + $0x2a4] sm:$0xf] %vm584_vm1, %v2482_v3  ;;  %v2849_v11 = vsel %vm649_vm2, %v2745_v5, 0.0  ;;  %v3612_v12 = vadd.f32 %v3611_v8, %v3610_v37  ;;  %v733_v13 = vsel %vm649_vm2, %v466_v1, 0.0  ;;  %v826_v14 = vmul.f32 %v466_v1, %v466_v1  ;;  %4571 = vmatmul.msk.bf16.gmra.mxu2 %vm254_vm0, %v5027_v62  ;;  %4865 = vmatmul.msk.bf16.gmra.mxu3 %vm254_vm0, %v5060_v63  ;;  %v5028_v3 = vld [vmem:[%s7501_s0 + $0x2f0] sm:$0xff] }
 0x1d7   :  { %v2850_v15 = vadd.f32 %v2849_v11, %v2848_v40  ;;  %4909 = vst.msk [vmem:[%s7504_s3 + $0x3a4] sm:$0xf] %vm584_vm1, %v3442_v6  ;;  %v3809_v16 = vsel %vm649_vm2, %v3705_v9, 0.0  ;;  %v734_v17 = vadd.f32 %v733_v13, %v732_v42  ;;  %v1523_v18 = vpack.c.bf16 %v1427_v2, %v1427_v2 }
 0x1d8   :  { %v3810_v19 = vadd.f32 %v3809_v16, %v3808_v44  ;;  %627 = vst.msk [vmem:[%s7504_s3 + $0xa8] sm:$0xf] %vm584_vm1, %v562_v10  ;;  %v931_v20 = vsel %vm649_vm2, %v826_v14, 0.0  ;;  %v1693_v21 = vsel %vm649_vm2, %v1427_v2, 0.0  ;;  %v1786_v22 = vmul.f32 %v1427_v2, %v1427_v2 }
 0x1d9   :  { %v932_v23 = vadd.f32 %v931_v20, %v930_v48  ;;  %4322 = vst.msk [vmem:[%s7504_s3 + $0x1a8] sm:$0xf] %vm584_vm1, %v1523_v18  ;;  %v1694_v24 = vadd.f32 %v1693_v21, %v1692_v49  ;;  %v2386_v25 = vpop.f32.mrf.mxu2  ;;  %v3346_v26 = vpop.f32.mrf.mxu3 }
 0x1da   :  { %v1891_v27 = vsel %vm649_vm2, %v1786_v22, 0.0  ;;  %v2387_v28 = vadd.f32 %v6712_v52, %v2386_v25  ;;  %v3347_v29 = vadd.f32 %v6712_v52, %v3346_v26  ;;  %v467_v30 = vpop.f32.mrf.mxu0  ;;  %v1428_v31 = vpop.f32.mrf.mxu1 }
 0x1db   :  { %v1892_v32 = vadd.f32 %v1891_v27, %v1890_v0  ;;  %v468_v36 = vadd.f32 %v6712_v52, %v467_v30  ;;  %v1429_v50 = vadd.f32 %v6712_v52, %v1428_v31 }
 0x1dc   :  { %v2483_v51 = vpack.c.bf16 %v2387_v28, %v2387_v28  ;;  %v2653_v33 = vsel %vm649_vm2, %v2387_v28, 0.0  ;;  %v2746_v34 = vmul.f32 %v2387_v28, %v2387_v28  ;;  %v3443_v35 = vpack.c.bf16 %v3347_v29, %v3347_v29 }
 0x1dd   :  { %v2654_v37 = vadd.f32 %v2653_v33, %v2652_v7  ;;  %v3613_v38 = vsel %vm649_vm2, %v3347_v29, 0.0  ;;  %v3706_v39 = vmul.f32 %v3347_v29, %v3347_v29  ;;  %v563_v40 = vpack.c.bf16 %v468_v36, %v468_v36 }
 0x1de   :  { %4616 = vst.msk [vmem:[%s7504_s3 + $0x2a8] sm:$0xf] %vm584_vm1, %v2483_v51  ;;  %v2851_v41 = vsel %vm649_vm2, %v2746_v34, 0.0  ;;  %v3614_v42 = vadd.f32 %v3613_v38, %v3612_v12  ;;  %v735_v43 = vsel %vm649_vm2, %v468_v36, 0.0  ;;  %v827_v44 = vmul.f32 %v468_v36, %v468_v36 }
 0x1df   :  { %v2852_v45 = vadd.f32 %v2851_v41, %v2850_v15  ;;  %4910 = vst.msk [vmem:[%s7504_s3 + $0x3a8] sm:$0xf] %vm584_vm1, %v3443_v35  ;;  %v3811_v46 = vsel %vm649_vm2, %v3706_v39, 0.0  ;;  %v736_v47 = vadd.f32 %v735_v43, %v734_v17  ;;  %v1524_v48 = vpack.c.bf16 %v1429_v50, %v1429_v50 }
 0x1e0   :  { %v3812_v49 = vadd.f32 %v3811_v46, %v3810_v19  ;;  %628 = vst.msk [vmem:[%s7504_s3 + $0xac] sm:$0xf] %vm584_vm1, %v563_v40  ;;  %v933_v53 = vsel %vm649_vm2, %v827_v44, 0.0  ;;  %v1695_v54 = vsel %vm649_vm2, %v1429_v50, 0.0  ;;  %v1787_v55 = vmul.f32 %v1429_v50, %v1429_v50 }
 0x1e1   :  { %v934_v56 = vadd.f32 %v933_v53, %v932_v23  ;;  %4323 = vst.msk [vmem:[%s7504_s3 + $0x1ac] sm:$0xf] %vm584_vm1, %v1524_v48  ;;  %v1696_v57 = vadd.f32 %v1695_v54, %v1694_v24  ;;  %v2388_v58 = vpop.f32.mrf.mxu2  ;;  %v3348_v59 = vpop.f32.mrf.mxu3 }
 0x1e2   :  { %v1893_v62 = vsel %vm649_vm2, %v1787_v55, 0.0  ;;  %v2389_v63 = vadd.f32 %v6712_v52, %v2388_v58  ;;  %v3349_v0 = vadd.f32 %v6712_v52, %v3348_v59  ;;  %v470_v1 = vpop.f32.mrf.mxu0  ;;  %v1431_v2 = vpop.f32.mrf.mxu1 }
 0x1e3   :  { %v1894_v5 = vadd.f32 %v1893_v62, %v1892_v32  ;;  %v471_v6 = vadd.f32 %v6712_v52, %v470_v1  ;;  %v1432_v7 = vadd.f32 %v6712_v52, %v1431_v2  ;;  %v4963_v1 = vld [vmem:[%s7501_s0 + $0xf8] sm:$0xff] }
 0x1e4   :  { %v2484_v8 = vpack.c.bf16 %v2389_v63, %v2389_v63  ;;  %v2655_v9 = vsel %vm649_vm2, %v2389_v63, 0.0  ;;  %v2747_v10 = vmul.f32 %v2389_v63, %v2389_v63  ;;  %v3444_v11 = vpack.c.bf16 %v3349_v0, %v3349_v0  ;;  %v4996_v2 = vld [vmem:[%s7501_s0 + $0x1f8] sm:$0xff] }
 0x1e5   :  { %v2656_v12 = vadd.f32 %v2655_v9, %v2654_v37  ;;  %v3615_v13 = vsel %vm649_vm2, %v3349_v0, 0.0  ;;  %v3707_v14 = vmul.f32 %v3349_v0, %v3349_v0  ;;  %v564_v15 = vpack.c.bf16 %v471_v6, %v471_v6  ;;  %4048 = vmatmul.msk.bf16.gmra.mxu0 %vm254_vm0, %v4962_v60  ;;  %4278 = vmatmul.msk.bf16.gmra.mxu1 %vm254_vm0, %v4995_v61  ;;  %v5062_v9 = vld [vmem:[%s7501_s0 + $0x3f8] sm:$0xff] }
 0x1e6   :  { %4617 = vst.msk [vmem:[%s7504_s3 + $0x2ac] sm:$0xf] %vm584_vm1, %v2484_v8  ;;  %v2853_v16 = vsel %vm649_vm2, %v2747_v10, 0.0  ;;  %v3616_v17 = vadd.f32 %v3615_v13, %v3614_v42  ;;  %v737_v18 = vsel %vm649_vm2, %v471_v6, 0.0  ;;  %v828_v19 = vmul.f32 %v471_v6, %v471_v6  ;;  %4572 = vmatmul.msk.bf16.gmra.mxu2 %vm254_vm0, %v5028_v3  ;;  %4866 = vmatmul.msk.bf16.gmra.mxu3 %vm254_vm0, %v5061_v4  ;;  %v5029_v8 = vld [vmem:[%s7501_s0 + $0x2f8] sm:$0xff] }
 0x1e7   :  { %v2854_v20 = vadd.f32 %v2853_v16, %v2852_v45  ;;  %4911 = vst.msk [vmem:[%s7504_s3 + $0x3ac] sm:$0xf] %vm584_vm1, %v3444_v11  ;;  %v3813_v21 = vsel %vm649_vm2, %v3707_v14, 0.0  ;;  %v738_v22 = vadd.f32 %v737_v18, %v736_v47  ;;  %v1525_v23 = vpack.c.bf16 %v1432_v7, %v1432_v7 }
 0x1e8   :  { %v3814_v24 = vadd.f32 %v3813_v21, %v3812_v49  ;;  %629 = vst.msk [vmem:[%s7504_s3 + $0xb0] sm:$0xf] %vm584_vm1, %v564_v15  ;;  %v935_v25 = vsel %vm649_vm2, %v828_v19, 0.0  ;;  %v1697_v26 = vsel %vm649_vm2, %v1432_v7, 0.0  ;;  %v1788_v27 = vmul.f32 %v1432_v7, %v1432_v7 }
 0x1e9   :  { %v936_v28 = vadd.f32 %v935_v25, %v934_v56  ;;  %4324 = vst.msk [vmem:[%s7504_s3 + $0x1b0] sm:$0xf] %vm584_vm1, %v1525_v23  ;;  %v1698_v29 = vadd.f32 %v1697_v26, %v1696_v57  ;;  %v2391_v30 = vpop.f32.mrf.mxu2  ;;  %v3351_v31 = vpop.f32.mrf.mxu3 }
 0x1ea   :  { %v1895_v32 = vsel %vm649_vm2, %v1788_v27, 0.0  ;;  %v2392_v36 = vadd.f32 %v6712_v52, %v2391_v30  ;;  %v3352_v50 = vadd.f32 %v6712_v52, %v3351_v31  ;;  %v472_v51 = vpop.f32.mrf.mxu0  ;;  %v1433_v33 = vpop.f32.mrf.mxu1 }
 0x1eb   :  { %v1896_v34 = vadd.f32 %v1895_v32, %v1894_v5  ;;  %v473_v35 = vadd.f32 %v6712_v52, %v472_v51  ;;  %v1434_v37 = vadd.f32 %v6712_v52, %v1433_v33 }
 0x1ec   :  { %v2485_v38 = vpack.c.bf16 %v2392_v36, %v2392_v36  ;;  %v2657_v39 = vsel %vm649_vm2, %v2392_v36, 0.0  ;;  %v2748_v40 = vmul.f32 %v2392_v36, %v2392_v36  ;;  %v3445_v41 = vpack.c.bf16 %v3352_v50, %v3352_v50 }
 0x1ed   :  { %v2658_v42 = vadd.f32 %v2657_v39, %v2656_v12  ;;  %v3617_v43 = vsel %vm649_vm2, %v3352_v50, 0.0  ;;  %v3708_v44 = vmul.f32 %v3352_v50, %v3352_v50  ;;  %v565_v45 = vpack.c.bf16 %v473_v35, %v473_v35 }
 0x1ee   :  { %4618 = vst.msk [vmem:[%s7504_s3 + $0x2b0] sm:$0xf] %vm584_vm1, %v2485_v38  ;;  %v2855_v46 = vsel %vm649_vm2, %v2748_v40, 0.0  ;;  %v3618_v47 = vadd.f32 %v3617_v43, %v3616_v17  ;;  %v739_v48 = vsel %vm649_vm2, %v473_v35, 0.0  ;;  %v829_v49 = vmul.f32 %v473_v35, %v473_v35 }
 0x1ef   :  { %v2856_v53 = vadd.f32 %v2855_v46, %v2854_v20  ;;  %4912 = vst.msk [vmem:[%s7504_s3 + $0x3b0] sm:$0xf] %vm584_vm1, %v3445_v41  ;;  %v3815_v54 = vsel %vm649_vm2, %v3708_v44, 0.0  ;;  %v740_v55 = vadd.f32 %v739_v48, %v738_v22  ;;  %v1526_v56 = vpack.c.bf16 %v1434_v37, %v1434_v37 }
 0x1f0   :  { %v3816_v57 = vadd.f32 %v3815_v54, %v3814_v24  ;;  %630 = vst.msk [vmem:[%s7504_s3 + $0xb4] sm:$0xf] %vm584_vm1, %v565_v45  ;;  %v937_v58 = vsel %vm649_vm2, %v829_v49, 0.0  ;;  %v1699_v59 = vsel %vm649_vm2, %v1434_v37, 0.0  ;;  %v1789_v60 = vmul.f32 %v1434_v37, %v1434_v37 }
 0x1f1   :  { %v938_v61 = vadd.f32 %v937_v58, %v936_v28  ;;  %4325 = vst.msk [vmem:[%s7504_s3 + $0x1b4] sm:$0xf] %vm584_vm1, %v1526_v56  ;;  %v1700_v62 = vadd.f32 %v1699_v59, %v1698_v29  ;;  %v2393_v63 = vpop.f32.mrf.mxu2  ;;  %v3353_v0 = vpop.f32.mrf.mxu3 }
 0x1f2   :  { %v1897_v3 = vsel %vm649_vm2, %v1789_v60, 0.0  ;;  %v2394_v4 = vadd.f32 %v6712_v52, %v2393_v63  ;;  %v3354_v5 = vadd.f32 %v6712_v52, %v3353_v0  ;;  %v475_v6 = vpop.f32.mrf.mxu0  ;;  %v1436_v7 = vpop.f32.mrf.mxu1 }
 0x1f3   :  { %v1898_v10 = vadd.f32 %v1897_v3, %v1896_v34  ;;  %v476_v11 = vadd.f32 %v6712_v52, %v475_v6  ;;  %v1437_v12 = vadd.f32 %v6712_v52, %v1436_v7 }
 0x1f4   :  { %v2486_v13 = vpack.c.bf16 %v2394_v4, %v2394_v4  ;;  %v2659_v14 = vsel %vm649_vm2, %v2394_v4, 0.0  ;;  %v2749_v15 = vmul.f32 %v2394_v4, %v2394_v4  ;;  %v3446_v16 = vpack.c.bf16 %v3354_v5, %v3354_v5 }
 0x1f5   :  { %v2660_v17 = vadd.f32 %v2659_v14, %v2658_v42  ;;  %v3619_v18 = vsel %vm649_vm2, %v3354_v5, 0.0  ;;  %v3709_v19 = vmul.f32 %v3354_v5, %v3354_v5  ;;  %v566_v20 = vpack.c.bf16 %v476_v11, %v476_v11  ;;  %4049 = vmatmul.msk.bf16.gmra.mxu0 %vm254_vm0, %v4963_v1  ;;  %4279 = vmatmul.msk.bf16.gmra.mxu1 %vm254_vm0, %v4996_v2 }
 0x1f6   :  { %4619 = vst.msk [vmem:[%s7504_s3 + $0x2b4] sm:$0xf] %vm584_vm1, %v2486_v13  ;;  %v2857_v21 = vsel %vm649_vm2, %v2749_v15, 0.0  ;;  %v3620_v22 = vadd.f32 %v3619_v18, %v3618_v47  ;;  %v741_v23 = vsel %vm649_vm2, %v476_v11, 0.0  ;;  %v830_v24 = vmul.f32 %v476_v11, %v476_v11  ;;  %4573 = vmatmul.msk.bf16.gmra.mxu2 %vm254_vm0, %v5029_v8  ;;  %4867 = vmatmul.msk.bf16.gmra.mxu3 %vm254_vm0, %v5062_v9 }
 0x1f7   :  { %v2858_v25 = vadd.f32 %v2857_v21, %v2856_v53  ;;  %4913 = vst.msk [vmem:[%s7504_s3 + $0x3b4] sm:$0xf] %vm584_vm1, %v3446_v16  ;;  %v3817_v26 = vsel %vm649_vm2, %v3709_v19, 0.0  ;;  %v742_v27 = vadd.f32 %v741_v23, %v740_v55  ;;  %v1527_v28 = vpack.c.bf16 %v1437_v12, %v1437_v12 }
 0x1f8   :  { %v3818_v29 = vadd.f32 %v3817_v26, %v3816_v57  ;;  %631 = vst.msk [vmem:[%s7504_s3 + $0xb8] sm:$0xf] %vm584_vm1, %v566_v20  ;;  %v939_v30 = vsel %vm649_vm2, %v830_v24, 0.0  ;;  %v1701_v31 = vsel %vm649_vm2, %v1437_v12, 0.0  ;;  %v1790_v32 = vmul.f32 %v1437_v12, %v1437_v12 }
 0x1f9   :  { %v940_v36 = vadd.f32 %v939_v30, %v938_v61  ;;  %4326 = vst.msk [vmem:[%s7504_s3 + $0x1b8] sm:$0xf] %vm584_vm1, %v1527_v28  ;;  %v1702_v50 = vadd.f32 %v1701_v31, %v1700_v62  ;;  %v2396_v51 = vpop.f32.mrf.mxu2  ;;  %v3356_v33 = vpop.f32.mrf.mxu3 }
 0x1fa   :  { %v1899_v34 = vsel %vm649_vm2, %v1790_v32, 0.0  ;;  %v2397_v35 = vadd.f32 %v6712_v52, %v2396_v51  ;;  %v3357_v37 = vadd.f32 %v6712_v52, %v3356_v33  ;;  %v477_v38 = vpop.f32.mrf.mxu0  ;;  %v1438_v39 = vpop.f32.mrf.mxu1 }
 0x1fb   :  { %v1900_v40 = vadd.f32 %v1899_v34, %v1898_v10  ;;  %v478_v41 = vadd.f32 %v6712_v52, %v477_v38  ;;  %v1439_v42 = vadd.f32 %v6712_v52, %v1438_v39 }
 0x1fc   :  { %v2487_v43 = vpack.c.bf16 %v2397_v35, %v2397_v35  ;;  %v2661_v44 = vsel %vm649_vm2, %v2397_v35, 0.0  ;;  %v2750_v45 = vmul.f32 %v2397_v35, %v2397_v35  ;;  %v3447_v46 = vpack.c.bf16 %v3357_v37, %v3357_v37 }
 0x1fd   :  { %v2662_v47 = vadd.f32 %v2661_v44, %v2660_v17  ;;  %v3621_v48 = vsel %vm649_vm2, %v3357_v37, 0.0  ;;  %v3710_v49 = vmul.f32 %v3357_v37, %v3357_v37  ;;  %v567_v53 = vpack.c.bf16 %v478_v41, %v478_v41 }
 0x1fe   :  { %4620 = vst.msk [vmem:[%s7504_s3 + $0x2b8] sm:$0xf] %vm584_vm1, %v2487_v43  ;;  %v2859_v54 = vsel %vm649_vm2, %v2750_v45, 0.0  ;;  %v3622_v55 = vadd.f32 %v3621_v48, %v3620_v22  ;;  %v743_v56 = vsel %vm649_vm2, %v478_v41, 0.0  ;;  %v831_v57 = vmul.f32 %v478_v41, %v478_v41 }
 0x1ff   :  { %v2860_v58 = vadd.f32 %v2859_v54, %v2858_v25  ;;  %4914 = vst.msk [vmem:[%s7504_s3 + $0x3b8] sm:$0xf] %vm584_vm1, %v3447_v46  ;;  %v3819_v59 = vsel %vm649_vm2, %v3710_v49, 0.0  ;;  %v744_v60 = vadd.f32 %v743_v56, %v742_v27  ;;  %v1528_v61 = vpack.c.bf16 %v1439_v42, %v1439_v42 }
 0x200   :  { %v3820_v62 = vadd.f32 %v3819_v59, %v3818_v29  ;;  %632 = vst.msk [vmem:[%s7504_s3 + $0xbc] sm:$0xf] %vm584_vm1, %v567_v53  ;;  %v941_v63 = vsel %vm649_vm2, %v831_v57, 0.0  ;;  %v1703_v0 = vsel %vm649_vm2, %v1439_v42, 0.0  ;;  %v1791_v1 = vmul.f32 %v1439_v42, %v1439_v42 }
 0x201   :  { %v942_v2 = vadd.f32 %v941_v63, %v940_v36  ;;  %4327 = vst.msk [vmem:[%s7504_s3 + $0x1bc] sm:$0xf] %vm584_vm1, %v1528_v61  ;;  %v1704_v3 = vadd.f32 %v1703_v0, %v1702_v50  ;;  %v2398_v4 = vpop.f32.mrf.mxu2  ;;  %v3358_v5 = vpop.f32.mrf.mxu3 }
 0x202   :  { %v1901_v6 = vsel %vm649_vm2, %v1791_v1, 0.0  ;;  %v2399_v7 = vadd.f32 %v6712_v52, %v2398_v4  ;;  %v3359_v8 = vadd.f32 %v6712_v52, %v3358_v5  ;;  %v480_v9 = vpop.f32.mrf.mxu0  ;;  %v1441_v10 = vpop.f32.mrf.mxu1 }
 0x203   :  { %v1902_v11 = vadd.f32 %v1901_v6, %v1900_v40  ;;  %v481_v12 = vadd.f32 %v6712_v52, %v480_v9  ;;  %v1442_v13 = vadd.f32 %v6712_v52, %v1441_v10 }
 0x204   :  { %v2488_v14 = vpack.c.bf16 %v2399_v7, %v2399_v7  ;;  %v2663_v15 = vsel %vm649_vm2, %v2399_v7, 0.0  ;;  %v2751_v16 = vmul.f32 %v2399_v7, %v2399_v7  ;;  %v3448_v17 = vpack.c.bf16 %v3359_v8, %v3359_v8 }
 0x205   :  { %v2664_v18 = vadd.f32 %v2663_v15, %v2662_v47  ;;  %v3623_v19 = vsel %vm649_vm2, %v3359_v8, 0.0  ;;  %v3711_v20 = vmul.f32 %v3359_v8, %v3359_v8  ;;  %v568_v21 = vpack.c.bf16 %v481_v12, %v481_v12 }
 0x206   :  { %4621 = vst.msk [vmem:[%s7504_s3 + $0x2bc] sm:$0xf] %vm584_vm1, %v2488_v14  ;;  %v2861_v22 = vsel %vm649_vm2, %v2751_v16, 0.0  ;;  %v3624_v23 = vadd.f32 %v3623_v19, %v3622_v55  ;;  %v745_v24 = vsel %vm649_vm2, %v481_v12, 0.0  ;;  %v832_v25 = vmul.f32 %v481_v12, %v481_v12 }
 0x207   :  { %v2862_v26 = vadd.f32 %v2861_v22, %v2860_v58  ;;  %4915 = vst.msk [vmem:[%s7504_s3 + $0x3bc] sm:$0xf] %vm584_vm1, %v3448_v17  ;;  %v3821_v27 = vsel %vm649_vm2, %v3711_v20, 0.0  ;;  %v746_v28 = vadd.f32 %v745_v24, %v744_v60  ;;  %v1529_v29 = vpack.c.bf16 %v1442_v13, %v1442_v13 }
 0x208   :  { %v3822_v30 = vadd.f32 %v3821_v27, %v3820_v62  ;;  %633 = vst.msk [vmem:[%s7504_s3 + $0xc0] sm:$0xf] %vm584_vm1, %v568_v21  ;;  %v943_v31 = vsel %vm649_vm2, %v832_v25, 0.0  ;;  %v1705_v32 = vsel %vm649_vm2, %v1442_v13, 0.0  ;;  %v1792_v36 = vmul.f32 %v1442_v13, %v1442_v13 }
 0x209   :  { %v944_v50 = vadd.f32 %v943_v31, %v942_v2  ;;  %4328 = vst.msk [vmem:[%s7504_s3 + $0x1c0] sm:$0xf] %vm584_vm1, %v1529_v29  ;;  %v1706_v51 = vadd.f32 %v1705_v32, %v1704_v3  ;;  %v2401_v33 = vpop.f32.mrf.mxu2  ;;  %v3361_v34 = vpop.f32.mrf.mxu3 }
 0x20a   :  { %v1903_v35 = vsel %vm649_vm2, %v1792_v36, 0.0  ;;  %v2402_v37 = vadd.f32 %v6712_v52, %v2401_v33  ;;  %v3362_v38 = vadd.f32 %v6712_v52, %v3361_v34  ;;  %v482_v39 = vpop.f32.mrf.mxu0  ;;  %v1443_v40 = vpop.f32.mrf.mxu1 }
 0x20b   :  { %v1904_v41 = vadd.f32 %v1903_v35, %v1902_v11  ;;  %v483_v42 = vadd.f32 %v6712_v52, %v482_v39  ;;  %v1444_v43 = vadd.f32 %v6712_v52, %v1443_v40 }
 0x20c   :  { %v2489_v44 = vpack.c.bf16 %v2402_v37, %v2402_v37  ;;  %v2665_v45 = vsel %vm649_vm2, %v2402_v37, 0.0  ;;  %v2752_v46 = vmul.f32 %v2402_v37, %v2402_v37  ;;  %v3449_v47 = vpack.c.bf16 %v3362_v38, %v3362_v38 }
 0x20d   :  { %v2666_v48 = vadd.f32 %v2665_v45, %v2664_v18  ;;  %v3625_v49 = vsel %vm649_vm2, %v3362_v38, 0.0  ;;  %v3712_v53 = vmul.f32 %v3362_v38, %v3362_v38  ;;  %v569_v54 = vpack.c.bf16 %v483_v42, %v483_v42 }
 0x20e   :  { %4622 = vst.msk [vmem:[%s7504_s3 + $0x2c0] sm:$0xf] %vm584_vm1, %v2489_v44  ;;  %v2863_v55 = vsel %vm649_vm2, %v2752_v46, 0.0  ;;  %v3626_v56 = vadd.f32 %v3625_v49, %v3624_v23  ;;  %v747_v57 = vsel %vm649_vm2, %v483_v42, 0.0  ;;  %v833_v58 = vmul.f32 %v483_v42, %v483_v42 }
 0x20f   :  { %v2864_v59 = vadd.f32 %v2863_v55, %v2862_v26  ;;  %4916 = vst.msk [vmem:[%s7504_s3 + $0x3c0] sm:$0xf] %vm584_vm1, %v3449_v47  ;;  %v3823_v60 = vsel %vm649_vm2, %v3712_v53, 0.0  ;;  %v748_v61 = vadd.f32 %v747_v57, %v746_v28  ;;  %v1530_v62 = vpack.c.bf16 %v1444_v43, %v1444_v43 }
 0x210   :  { %v3824_v63 = vadd.f32 %v3823_v60, %v3822_v30  ;;  %634 = vst.msk [vmem:[%s7504_s3 + $0xc4] sm:$0xf] %vm584_vm1, %v569_v54  ;;  %v945_v0 = vsel %vm649_vm2, %v833_v58, 0.0  ;;  %v1707_v1 = vsel %vm649_vm2, %v1444_v43, 0.0  ;;  %v1793_v2 = vmul.f32 %v1444_v43, %v1444_v43 }
 0x211   :  { %v946_v3 = vadd.f32 %v945_v0, %v944_v50  ;;  %4329 = vst.msk [vmem:[%s7504_s3 + $0x1c4] sm:$0xf] %vm584_vm1, %v1530_v62  ;;  %v1708_v4 = vadd.f32 %v1707_v1, %v1706_v51  ;;  %v2403_v5 = vpop.f32.mrf.mxu2  ;;  %v3363_v6 = vpop.f32.mrf.mxu3 }
 0x212   :  { %v1905_v7 = vsel %vm649_vm2, %v1793_v2, 0.0  ;;  %v2404_v8 = vadd.f32 %v6712_v52, %v2403_v5  ;;  %v3364_v9 = vadd.f32 %v6712_v52, %v3363_v6  ;;  %v485_v10 = vpop.f32.mrf.mxu0  ;;  %v1446_v11 = vpop.f32.mrf.mxu1 }
 0x213   :  { %v1906_v12 = vadd.f32 %v1905_v7, %v1904_v41  ;;  %v486_v13 = vadd.f32 %v6712_v52, %v485_v10  ;;  %v1447_v14 = vadd.f32 %v6712_v52, %v1446_v11 }
 0x214   :  { %v2490_v15 = vpack.c.bf16 %v2404_v8, %v2404_v8  ;;  %v2667_v16 = vsel %vm649_vm2, %v2404_v8, 0.0  ;;  %v2753_v17 = vmul.f32 %v2404_v8, %v2404_v8  ;;  %v3450_v18 = vpack.c.bf16 %v3364_v9, %v3364_v9 }
 0x215   :  { %v2668_v19 = vadd.f32 %v2667_v16, %v2666_v48  ;;  %v3627_v20 = vsel %vm649_vm2, %v3364_v9, 0.0  ;;  %v3713_v21 = vmul.f32 %v3364_v9, %v3364_v9  ;;  %v570_v22 = vpack.c.bf16 %v486_v13, %v486_v13 }
 0x216   :  { %4623 = vst.msk [vmem:[%s7504_s3 + $0x2c4] sm:$0xf] %vm584_vm1, %v2490_v15  ;;  %v2865_v23 = vsel %vm649_vm2, %v2753_v17, 0.0  ;;  %v3628_v24 = vadd.f32 %v3627_v20, %v3626_v56  ;;  %v749_v25 = vsel %vm649_vm2, %v486_v13, 0.0  ;;  %v834_v26 = vmul.f32 %v486_v13, %v486_v13 }
 0x217   :  { %v2866_v27 = vadd.f32 %v2865_v23, %v2864_v59  ;;  %4917 = vst.msk [vmem:[%s7504_s3 + $0x3c4] sm:$0xf] %vm584_vm1, %v3450_v18  ;;  %v3825_v28 = vsel %vm649_vm2, %v3713_v21, 0.0  ;;  %v750_v29 = vadd.f32 %v749_v25, %v748_v61  ;;  %v1531_v30 = vpack.c.bf16 %v1447_v14, %v1447_v14 }
 0x218   :  { %v3826_v31 = vadd.f32 %v3825_v28, %v3824_v63  ;;  %635 = vst.msk [vmem:[%s7504_s3 + $0xc8] sm:$0xf] %vm584_vm1, %v570_v22  ;;  %v947_v32 = vsel %vm649_vm2, %v834_v26, 0.0  ;;  %v1709_v36 = vsel %vm649_vm2, %v1447_v14, 0.0  ;;  %v1794_v50 = vmul.f32 %v1447_v14, %v1447_v14 }
 0x219   :  { %v948_v51 = vadd.f32 %v947_v32, %v946_v3  ;;  %4330 = vst.msk [vmem:[%s7504_s3 + $0x1c8] sm:$0xf] %vm584_vm1, %v1531_v30  ;;  %v1710_v33 = vadd.f32 %v1709_v36, %v1708_v4  ;;  %v2406_v34 = vpop.f32.mrf.mxu2  ;;  %v3366_v35 = vpop.f32.mrf.mxu3 }
 0x21a   :  { %v1907_v37 = vsel %vm649_vm2, %v1794_v50, 0.0  ;;  %v2407_v38 = vadd.f32 %v6712_v52, %v2406_v34  ;;  %v3367_v39 = vadd.f32 %v6712_v52, %v3366_v35  ;;  %v487_v40 = vpop.f32.mrf.mxu0  ;;  %v1448_v41 = vpop.f32.mrf.mxu1 }
 0x21b   :  { %v1908_v42 = vadd.f32 %v1907_v37, %v1906_v12  ;;  %v488_v43 = vadd.f32 %v6712_v52, %v487_v40  ;;  %v1449_v44 = vadd.f32 %v6712_v52, %v1448_v41 }
 0x21c   :  { %v2491_v45 = vpack.c.bf16 %v2407_v38, %v2407_v38  ;;  %v2669_v46 = vsel %vm649_vm2, %v2407_v38, 0.0  ;;  %v2754_v47 = vmul.f32 %v2407_v38, %v2407_v38  ;;  %v3451_v48 = vpack.c.bf16 %v3367_v39, %v3367_v39 }
 0x21d   :  { %v2670_v49 = vadd.f32 %v2669_v46, %v2668_v19  ;;  %v3629_v53 = vsel %vm649_vm2, %v3367_v39, 0.0  ;;  %v3714_v54 = vmul.f32 %v3367_v39, %v3367_v39  ;;  %v571_v55 = vpack.c.bf16 %v488_v43, %v488_v43 }
 0x21e   :  { %4624 = vst.msk [vmem:[%s7504_s3 + $0x2c8] sm:$0xf] %vm584_vm1, %v2491_v45  ;;  %v2867_v56 = vsel %vm649_vm2, %v2754_v47, 0.0  ;;  %v3630_v57 = vadd.f32 %v3629_v53, %v3628_v24  ;;  %v751_v58 = vsel %vm649_vm2, %v488_v43, 0.0  ;;  %v835_v59 = vmul.f32 %v488_v43, %v488_v43 }
 0x21f   :  { %v2868_v60 = vadd.f32 %v2867_v56, %v2866_v27  ;;  %4918 = vst.msk [vmem:[%s7504_s3 + $0x3c8] sm:$0xf] %vm584_vm1, %v3451_v48  ;;  %v3827_v61 = vsel %vm649_vm2, %v3714_v54, 0.0  ;;  %v752_v62 = vadd.f32 %v751_v58, %v750_v29  ;;  %v1532_v63 = vpack.c.bf16 %v1449_v44, %v1449_v44 }
 0x220   :  { %v3828_v0 = vadd.f32 %v3827_v61, %v3826_v31  ;;  %636 = vst.msk [vmem:[%s7504_s3 + $0xcc] sm:$0xf] %vm584_vm1, %v571_v55  ;;  %v949_v1 = vsel %vm649_vm2, %v835_v59, 0.0  ;;  %v1711_v2 = vsel %vm649_vm2, %v1449_v44, 0.0  ;;  %v1795_v3 = vmul.f32 %v1449_v44, %v1449_v44 }
 0x221   :  { %v950_v4 = vadd.f32 %v949_v1, %v948_v51  ;;  %4331 = vst.msk [vmem:[%s7504_s3 + $0x1cc] sm:$0xf] %vm584_vm1, %v1532_v63  ;;  %v1712_v5 = vadd.f32 %v1711_v2, %v1710_v33  ;;  %v2408_v6 = vpop.f32.mrf.mxu2  ;;  %v3368_v7 = vpop.f32.mrf.mxu3 }
 0x222   :  { %v1909_v8 = vsel %vm649_vm2, %v1795_v3, 0.0  ;;  %v2409_v9 = vadd.f32 %v6712_v52, %v2408_v6  ;;  %v3369_v10 = vadd.f32 %v6712_v52, %v3368_v7  ;;  %v490_v11 = vpop.f32.mrf.mxu0  ;;  %v1451_v12 = vpop.f32.mrf.mxu1 }
 0x223   :  { %v1910_v13 = vadd.f32 %v1909_v8, %v1908_v42  ;;  %v491_v14 = vadd.f32 %v6712_v52, %v490_v11  ;;  %v1452_v15 = vadd.f32 %v6712_v52, %v1451_v12 }
 0x224   :  { %v2492_v16 = vpack.c.bf16 %v2409_v9, %v2409_v9  ;;  %v2671_v17 = vsel %vm649_vm2, %v2409_v9, 0.0  ;;  %v2755_v18 = vmul.f32 %v2409_v9, %v2409_v9  ;;  %v3452_v19 = vpack.c.bf16 %v3369_v10, %v3369_v10  ;;  %v7177_v9 = vld [vmem:[%s7503_s2] ss:$0 sm:$0xff]  ;;  %s3875_s2 = sshll.u32 %s7505_s4, 4  ;;  %s3876_s2 = int_to_ptr.hbm [resolvable:$true] %s3875_s2 }
 0x225   :  { %v2672_v20 = vadd.f32 %v2671_v17, %v2670_v49  ;;  %v3631_v21 = vsel %vm649_vm2, %v3369_v10, 0.0  ;;  %v3715_v22 = vmul.f32 %v3369_v10, %v3369_v10  ;;  %v572_v23 = vpack.c.bf16 %v491_v14, %v491_v14 }
 0x226   :  { %4625 = vst.msk [vmem:[%s7504_s3 + $0x2cc] sm:$0xf] %vm584_vm1, %v2492_v16  ;;  %v2869_v24 = vsel %vm649_vm2, %v2755_v18, 0.0  ;;  %v3632_v25 = vadd.f32 %v3631_v21, %v3630_v57  ;;  %v753_v26 = vsel %vm649_vm2, %v491_v14, 0.0  ;;  %v836_v27 = vmul.f32 %v491_v14, %v491_v14 }
 0x227   :  { %v2870_v28 = vadd.f32 %v2869_v24, %v2868_v60  ;;  %4919 = vst.msk [vmem:[%s7504_s3 + $0x3cc] sm:$0xf] %vm584_vm1, %v3452_v19  ;;  %v3829_v29 = vsel %vm649_vm2, %v3715_v22, 0.0  ;;  %v754_v30 = vadd.f32 %v753_v26, %v752_v62  ;;  %v1533_v31 = vpack.c.bf16 %v1452_v15, %v1452_v15 }
 0x228   :  { %v3830_v32 = vadd.f32 %v3829_v29, %v3828_v0  ;;  %637 = vst.msk [vmem:[%s7504_s3 + $0xd0] sm:$0xf] %vm584_vm1, %v572_v23  ;;  %v951_v36 = vsel %vm649_vm2, %v836_v27, 0.0  ;;  %v1713_v50 = vsel %vm649_vm2, %v1452_v15, 0.0  ;;  %v1796_v51 = vmul.f32 %v1452_v15, %v1452_v15 }
 0x229   :  { %v952_v33 = vadd.f32 %v951_v36, %v950_v4  ;;  %4332 = vst.msk [vmem:[%s7504_s3 + $0x1d0] sm:$0xf] %vm584_vm1, %v1533_v31  ;;  %v1714_v34 = vadd.f32 %v1713_v50, %v1712_v5  ;;  %v2411_v35 = vpop.f32.mrf.mxu2  ;;  %v3371_v37 = vpop.f32.mrf.mxu3 }
 0x22a   :  { %v1911_v38 = vsel %vm649_vm2, %v1796_v51, 0.0  ;;  %v2412_v39 = vadd.f32 %v6712_v52, %v2411_v35  ;;  %v3372_v40 = vadd.f32 %v6712_v52, %v3371_v37  ;;  %v492_v41 = vpop.f32.mrf.mxu0  ;;  %v1453_v42 = vpop.f32.mrf.mxu1 }
 0x22b   :  { %v1912_v43 = vadd.f32 %v1911_v38, %v1910_v13  ;;  %v493_v44 = vadd.f32 %v6712_v52, %v492_v41  ;;  %v1454_v45 = vadd.f32 %v6712_v52, %v1453_v42 }
 0x22c   :  { %v2493_v46 = vpack.c.bf16 %v2412_v39, %v2412_v39  ;;  %v2673_v47 = vsel %vm649_vm2, %v2412_v39, 0.0  ;;  %v2756_v48 = vmul.f32 %v2412_v39, %v2412_v39  ;;  %v3453_v49 = vpack.c.bf16 %v3372_v40, %v3372_v40 }
 0x22d   :  { %v2674_v53 = vadd.f32 %v2673_v47, %v2672_v20  ;;  %v3633_v54 = vsel %vm649_vm2, %v3372_v40, 0.0  ;;  %v3716_v55 = vmul.f32 %v3372_v40, %v3372_v40  ;;  %v573_v56 = vpack.c.bf16 %v493_v44, %v493_v44 }
 0x22e   :  { %4626 = vst.msk [vmem:[%s7504_s3 + $0x2d0] sm:$0xf] %vm584_vm1, %v2493_v46  ;;  %v2871_v57 = vsel %vm649_vm2, %v2756_v48, 0.0  ;;  %v3634_v58 = vadd.f32 %v3633_v54, %v3632_v25  ;;  %v755_v52 = vsel %vm649_vm2, %v493_v44, 0.0  ;;  %v837_v59 = vmul.f32 %v493_v44, %v493_v44 }
 0x22f   :  { %v7148_v60 = vadd.f32 %v2871_v57, %v2870_v28  ;;  %4920 = vst.msk [vmem:[%s7504_s3 + $0x3d0] sm:$0xf] %vm584_vm1, %v3453_v49  ;;  %v3831_v61 = vsel %vm649_vm2, %v3716_v55, 0.0  ;;  %v7155_v62 = vadd.f32 %v755_v52, %v754_v30  ;;  %v1534_v63 = vpack.c.bf16 %v1454_v45, %v1454_v45 }
 0x230   :  { %v7157_v0 = vadd.f32 %v3831_v61, %v3830_v32  ;;  %638 = vst.msk [vmem:[%s7504_s3 + $0xd4] sm:$0xf] %vm584_vm1, %v573_v56  ;;  %v953_v1 = vsel %vm649_vm2, %v837_v59, 0.0  ;;  %v1715_v2 = vsel %vm649_vm2, %v1454_v45, 0.0  ;;  %v1797_v3 = vmul.f32 %v1454_v45, %v1454_v45 }
 0x231   :  { %v7165_v4 = vadd.f32 %v953_v1, %v952_v33  ;;  %4333 = vst.msk [vmem:[%s7504_s3 + $0x1d4] sm:$0xf] %vm584_vm1, %v1534_v63  ;;  %v7171_v5 = vadd.f32 %v1715_v2, %v1714_v34  ;;  %v2413_v6 = vpop.f32.mrf.mxu2  ;;  %v3373_v7 = vpop.f32.mrf.mxu3 }
 0x232   :  { %v1913_v8 = vsel %vm649_vm2, %v1797_v3, 0.0  ;;  %v2414_v10 = vadd.f32 %v7177_v9, %v2413_v6  ;;  %v3374_v11 = vadd.f32 %v7177_v9, %v3373_v7  ;;  %v495_v12 = vpop.f32.mrf.mxu0  ;;  %v1456_v13 = vpop.f32.mrf.mxu1 }
 0x233   :  { %v7181_v14 = vadd.f32 %v1913_v8, %v1912_v43  ;;  %v496_v15 = vadd.f32 %v7177_v9, %v495_v12  ;;  %v1457_v22 = vadd.f32 %v7177_v9, %v1456_v13 }
 0x234   :  { %v2494_v16 = vpack.c.bf16 %v2414_v10, %v2414_v10  ;;  %v2675_v17 = vsel %vm649_vm2, %v2414_v10, 0.0  ;;  %v3454_v18 = vpack.c.bf16 %v3374_v11, %v3374_v11  ;;  %v3635_v20 = vsel %vm649_vm2, %v3374_v11, 0.0 }
 0x235   :  { %v7185_v19 = vadd.f32 %v2675_v17, %v2674_v53  ;;  %v574_v21 = vpack.c.bf16 %v496_v15, %v496_v15  ;;  %v3636_v23 = vadd.f32 %v3635_v20, %v3634_v58  ;;  %v1535_v24 = vpack.c.bf16 %v1457_v22, %v1457_v22 }
 0x236   :  { %4627 = vst.msk [vmem:[%s7504_s3 + $0x2d4] sm:$0xf] %vm584_vm1, %v2494_v16  ;;  %v2757_v33 = vmul.f32 %v2414_v10, %v2414_v10  ;;  %v3717_v35 = vmul.f32 %v3374_v11, %v3374_v11  ;;  %v838_v37 = vmul.f32 %v496_v15, %v496_v15  ;;  %v1798_v38 = vmul.f32 %v1457_v22, %v1457_v22 }
 0x237   :  { %4921 = vst.msk [vmem:[%s7504_s3 + $0x3d4] sm:$0xf] %vm584_vm1, %v3454_v18  ;;  %v757_v46 = vsel %vm649_vm2, %v496_v15, 0.0  ;;  %v1717_v56 = vsel %vm649_vm2, %v1457_v22, 0.0 }
 0x238   :  { %639 = vst.msk [vmem:[%s7504_s3 + $0xd8] sm:$0xf] %vm584_vm1, %v574_v21  ;;  %v2873_v45 = vsel %vm649_vm2, %v2757_v33, 0.0  ;;  %v3833_v49 = vsel %vm649_vm2, %v3717_v35, 0.0  ;;  %v955_v53 = vsel %vm649_vm2, %v838_v37, 0.0  ;;  %v1915_v57 = vsel %vm649_vm2, %v1798_v38, 0.0 }
 0x239   :  { %4334 = vst.msk [vmem:[%s7504_s3 + $0x1d8] sm:$0xf] %vm584_vm1, %v1535_v24  ;;  %v2416_v25 = vpop.f32.mrf.mxu2  ;;  %v3376_v26 = vpop.f32.mrf.mxu3  ;;  %v2874_v59 = vadd.f32 %v2873_v45, %v7148_v60  ;;  %v758_v61 = vadd.f32 %v757_v46, %v7155_v62  ;;  %v3834_v62 = vadd.f32 %v3833_v49, %v7157_v0  ;;  %v956_v7 = vadd.f32 %v955_v53, %v7165_v4 }
 0x23a   :  { %v2417_v27 = vadd.f32 %v7177_v9, %v2416_v25  ;;  %v3377_v28 = vadd.f32 %v7177_v9, %v3376_v26  ;;  %v497_v29 = vpop.f32.mrf.mxu0  ;;  %v1458_v30 = vpop.f32.mrf.mxu1  ;;  %v1718_v8 = vadd.f32 %v1717_v56, %v7171_v5  ;;  %v1916_v10 = vadd.f32 %v1915_v57, %v7181_v14 }
 0x23b   :  { %v498_v31 = vadd.f32 %v7177_v9, %v497_v29  ;;  %v7209_v32 = vadd.f32 %v7177_v9, %v1458_v30 }
 0x23c   :  { %v2495_v36 = vpack.c.bf16 %v2417_v27, %v2417_v27  ;;  %v3455_v50 = vpack.c.bf16 %v3377_v28, %v3377_v28  ;;  %v2758_v47 = vmul.f32 %v2417_v27, %v2417_v27  ;;  %v2677_v63 = vsel %vm649_vm2, %v2417_v27, 0.0 }
 0x23d   :  { %v575_v51 = vpack.c.bf16 %v498_v31, %v498_v31  ;;  %v1536_v34 = vpack.c.bf16 %v7209_v32, %v7209_v32  ;;  %v3637_v1 = vsel %vm649_vm2, %v3377_v28, 0.0  ;;  %v3718_v3 = vmul.f32 %v3377_v28, %v3377_v28 }
 0x23e   :  { %4628 = vst.msk [vmem:[%s7504_s3 + $0x2d8] sm:$0xf] %vm584_vm1, %v2495_v36  ;;  %v2875_v2 = vsel %vm649_vm2, %v2758_v47, 0.0  ;;  %v839_v6 = vmul.f32 %v498_v31, %v498_v31  ;;  %v2678_v11 = vadd.f32 %v2677_v63, %v7185_v19  ;;  %v3638_v12 = vadd.f32 %v3637_v1, %v3636_v23 }
 0x23f   :  { %4922 = vst.msk [vmem:[%s7504_s3 + $0x3d8] sm:$0xf] %vm584_vm1, %v3455_v50  ;;  %v759_v13 = vsel %vm649_vm2, %v498_v31, 0.0  ;;  %v1799_v15 = vmul.f32 %v7209_v32, %v7209_v32  ;;  %v2876_v5 = vadd.f32 %v2875_v2, %v2874_v59  ;;  %v3835_v20 = vsel %vm649_vm2, %v3718_v3, 0.0 }
 0x240   :  { %640 = vst.msk [vmem:[%s7504_s3 + $0xdc] sm:$0xf] %vm584_vm1, %v575_v51  ;;  %v957_v21 = vsel %vm649_vm2, %v839_v6, 0.0  ;;  %v1719_v24 = vsel %vm649_vm2, %v7209_v32, 0.0  ;;  %v760_v28 = vadd.f32 %v759_v13, %v758_v61  ;;  %v3836_v36 = vadd.f32 %v3835_v20, %v3834_v62 }
 0x241   :  { %4335 = vst.msk [vmem:[%s7504_s3 + $0x1dc] sm:$0xf] %vm584_vm1, %v1536_v34  ;;  %v2418_v39 = vpop.f32.mrf.mxu2  ;;  %v3378_v40 = vpop.f32.mrf.mxu3  ;;  %v1917_v29 = vsel %vm649_vm2, %v1799_v15, 0.0  ;;  %v958_v32 = vadd.f32 %v957_v21, %v956_v7  ;;  %v1720_v34 = vadd.f32 %v1719_v24, %v1718_v8 }
 0x242   :  { %v2419_v41 = vadd.f32 %v7177_v9, %v2418_v39  ;;  %v3379_v42 = vadd.f32 %v7177_v9, %v3378_v40  ;;  %v500_v43 = vpop.f32.mrf.mxu0  ;;  %v1461_v44 = vpop.f32.mrf.mxu1  ;;  %v1918_v38 = vadd.f32 %v1917_v29, %v1916_v10 }
 0x243   :  { %v501_v48 = vadd.f32 %v7177_v9, %v500_v43  ;;  %v7239_v52 = vadd.f32 %v7177_v9, %v1461_v44 }
 0x244   :  { %v2496_v54 = vpack.c.bf16 %v2419_v41, %v2419_v41  ;;  %v3456_v55 = vpack.c.bf16 %v3379_v42, %v3379_v42  ;;  %v2759_v14 = vmul.f32 %v2419_v41, %v2419_v41  ;;  %v3719_v25 = vmul.f32 %v3379_v42, %v3379_v42 }
 0x245   :  { %v576_v58 = vpack.c.bf16 %v501_v48, %v501_v48  ;;  %v1537_v60 = vpack.c.bf16 %v7239_v52, %v7239_v52  ;;  %v2679_v30 = vsel %vm649_vm2, %v2419_v41, 0.0  ;;  %v3639_v51 = vsel %vm649_vm2, %v3379_v42, 0.0 }
 0x246   :  { %4629 = vst.msk [vmem:[%s7504_s3 + $0x2dc] sm:$0xf] %vm584_vm1, %v2496_v54  ;;  %v2877_v50 = vsel %vm649_vm2, %v2759_v14, 0.0  ;;  %v761_v33 = vsel %vm649_vm2, %v501_v48, 0.0  ;;  %v840_v35 = vmul.f32 %v501_v48, %v501_v48  ;;  %v2680_v39 = vadd.f32 %v2679_v30, %v2678_v11 }
 0x247   :  { %4923 = vst.msk [vmem:[%s7504_s3 + $0x3dc] sm:$0xf] %vm584_vm1, %v3456_v55  ;;  %v3837_v40 = vsel %vm649_vm2, %v3719_v25, 0.0  ;;  %v1800_v41 = vmul.f32 %v7239_v52, %v7239_v52  ;;  %v2878_v42 = vadd.f32 %v2877_v50, %v2876_v5  ;;  %v3640_v43 = vadd.f32 %v3639_v51, %v3638_v12 }
 0x248   :  { %641 = vst.msk [vmem:[%s7504_s3 + $0xe0] sm:$0xf] %vm584_vm1, %v576_v58  ;;  %v762_v44 = vadd.f32 %v761_v33, %v760_v28  ;;  %v3838_v57 = vadd.f32 %v3837_v40, %v3836_v36  ;;  %v959_v58 = vsel %vm649_vm2, %v840_v35, 0.0  ;;  %v1721_v59 = vsel %vm649_vm2, %v7239_v52, 0.0 }
 0x249   :  { %4336 = vst.msk [vmem:[%s7504_s3 + $0x1e0] sm:$0xf] %vm584_vm1, %v1537_v60  ;;  %v2421_v0 = vpop.f32.mrf.mxu2  ;;  %v3381_v4 = vpop.f32.mrf.mxu3  ;;  %v1919_v63 = vsel %vm649_vm2, %v1800_v41, 0.0  ;;  %v960_v8 = vadd.f32 %v959_v58, %v958_v32  ;;  %v1722_v12 = vadd.f32 %v1721_v59, %v1720_v34 }
 0x24a   :  { %v2422_v16 = vadd.f32 %v7177_v9, %v2421_v0  ;;  %v3382_v17 = vadd.f32 %v7177_v9, %v3381_v4  ;;  %v502_v18 = vpop.f32.mrf.mxu0  ;;  %v1463_v19 = vpop.f32.mrf.mxu1  ;;  %v1920_v13 = vadd.f32 %v1919_v63, %v1918_v38 }
 0x24b   :  { %v503_v22 = vadd.f32 %v7177_v9, %v502_v18  ;;  %v1464_v23 = vadd.f32 %v7177_v9, %v1463_v19 }
 0x24c   :  { %v2497_v26 = vpack.c.bf16 %v2422_v16, %v2422_v16  ;;  %v3457_v27 = vpack.c.bf16 %v3382_v17, %v3382_v17  ;;  %v2760_v45 = vmul.f32 %v2422_v16, %v2422_v16  ;;  %v3720_v48 = vmul.f32 %v3382_v17, %v3382_v17 }
 0x24d   :  { %v577_v31 = vpack.c.bf16 %v503_v22, %v503_v22  ;;  %v1538_v37 = vpack.c.bf16 %v1464_v23, %v1464_v23  ;;  %v841_v49 = vmul.f32 %v503_v22, %v503_v22  ;;  %v2681_v1 = vsel %vm649_vm2, %v2422_v16, 0.0 }
 0x24e   :  { %4630 = vst.msk [vmem:[%s7504_s3 + $0x2e0] sm:$0xf] %vm584_vm1, %v2497_v26  ;;  %v2879_v6 = vsel %vm649_vm2, %v2760_v45, 0.0  ;;  %v3641_v60 = vsel %vm649_vm2, %v3382_v17, 0.0  ;;  %v3839_v10 = vsel %vm649_vm2, %v3720_v48, 0.0  ;;  %v763_v52 = vsel %vm649_vm2, %v503_v22, 0.0 }
 0x24f   :  { %4924 = vst.msk [vmem:[%s7504_s3 + $0x3e0] sm:$0xf] %vm584_vm1, %v3457_v27  ;;  %v961_v11 = vsel %vm649_vm2, %v841_v49, 0.0  ;;  %v1801_v15 = vmul.f32 %v1464_v23, %v1464_v23  ;;  %v2682_v4 = vadd.f32 %v2681_v1, %v2680_v39  ;;  %v2880_v5 = vadd.f32 %v2879_v6, %v2878_v42 }
 0x250   :  { %642 = vst.msk [vmem:[%s7504_s3 + $0xe4] sm:$0xf] %vm584_vm1, %v577_v31  ;;  %v3642_v14 = vadd.f32 %v3641_v60, %v3640_v43  ;;  %v1723_v16 = vsel %vm649_vm2, %v1464_v23, 0.0  ;;  %v3840_v17 = vadd.f32 %v3839_v10, %v3838_v57  ;;  %v764_v18 = vadd.f32 %v763_v52, %v762_v44 }
 0x251   :  { %4337 = vst.msk [vmem:[%s7504_s3 + $0x1e4] sm:$0xf] %vm584_vm1, %v1538_v37  ;;  %v2423_v46 = vpop.f32.mrf.mxu2  ;;  %v3383_v47 = vpop.f32.mrf.mxu3  ;;  %v962_v19 = vadd.f32 %v961_v11, %v960_v8  ;;  %v1724_v29 = vadd.f32 %v1723_v16, %v1722_v12  ;;  %v1921_v30 = vsel %vm649_vm2, %v1801_v15, 0.0 }
 0x252   :  { %v2424_v53 = vadd.f32 %v7177_v9, %v2423_v46  ;;  %v3384_v54 = vadd.f32 %v7177_v9, %v3383_v47  ;;  %v505_v55 = vpop.f32.mrf.mxu0  ;;  %v1466_v56 = vpop.f32.mrf.mxu1  ;;  %v1922_v39 = vadd.f32 %v1921_v30, %v1920_v13 }
 0x253   :  { %v506_v61 = vadd.f32 %v7177_v9, %v505_v55  ;;  %v1467_v7 = vadd.f32 %v7177_v9, %v1466_v56 }
 0x254   :  { %v2498_v2 = vpack.c.bf16 %v2424_v53, %v2424_v53  ;;  %v3458_v3 = vpack.c.bf16 %v3384_v54, %v3384_v54  ;;  %v2761_v20 = vmul.f32 %v2424_v53, %v2424_v53  ;;  %v3721_v24 = vmul.f32 %v3384_v54, %v3384_v54 }
 0x255   :  { %v578_v62 = vpack.c.bf16 %v506_v61, %v506_v61  ;;  %v1539_v0 = vpack.c.bf16 %v1467_v7, %v1467_v7  ;;  %v842_v25 = vmul.f32 %v506_v61, %v506_v61  ;;  %v2683_v50 = vsel %vm649_vm2, %v2424_v53, 0.0 }
 0x256   :  { %4631 = vst.msk [vmem:[%s7504_s3 + $0x2e4] sm:$0xf] %vm584_vm1, %v2498_v2  ;;  %v3643_v51 = vsel %vm649_vm2, %v3384_v54, 0.0  ;;  %v2881_v34 = vsel %vm649_vm2, %v2761_v20, 0.0  ;;  %v765_v35 = vsel %vm649_vm2, %v506_v61, 0.0  ;;  %v1802_v37 = vmul.f32 %v1467_v7, %v1467_v7 }
 0x257   :  { %4925 = vst.msk [vmem:[%s7504_s3 + $0x3e4] sm:$0xf] %vm584_vm1, %v3458_v3  ;;  %v3841_v40 = vsel %vm649_vm2, %v3721_v24, 0.0  ;;  %v963_v41 = vsel %vm649_vm2, %v842_v25, 0.0  ;;  %v1725_v42 = vsel %vm649_vm2, %v1467_v7, 0.0  ;;  %v2684_v43 = vadd.f32 %v2683_v50, %v2682_v4 }
 0x258   :  { %643 = vst.msk [vmem:[%s7504_s3 + $0xe8] sm:$0xf] %vm584_vm1, %v578_v62  ;;  %v3644_v44 = vadd.f32 %v3643_v51, %v3642_v14  ;;  %v2882_v47 = vadd.f32 %v2881_v34, %v2880_v5  ;;  %v766_v48 = vadd.f32 %v765_v35, %v764_v18  ;;  %v3842_v54 = vadd.f32 %v3841_v40, %v3840_v17 }
 0x259   :  { %4338 = vst.msk [vmem:[%s7504_s3 + $0x1e8] sm:$0xf] %vm584_vm1, %v1539_v0  ;;  %v2426_v21 = vpop.f32.mrf.mxu2  ;;  %v3386_v22 = vpop.f32.mrf.mxu3  ;;  %v964_v55 = vadd.f32 %v963_v41, %v962_v19  ;;  %v1726_v56 = vadd.f32 %v1725_v42, %v1724_v29  ;;  %v1923_v57 = vsel %vm649_vm2, %v1802_v37, 0.0 }
 0x25a   :  { %v2427_v23 = vadd.f32 %v7177_v9, %v2426_v21  ;;  %v3387_v26 = vadd.f32 %v7177_v9, %v3386_v22  ;;  %v507_v27 = vpop.f32.mrf.mxu0  ;;  %v1468_v28 = vpop.f32.mrf.mxu1  ;;  %v1924_v5 = vadd.f32 %v1923_v57, %v1922_v39 }
 0x25b   :  { %v508_v31 = vadd.f32 %v7177_v9, %v507_v27  ;;  %v1469_v36 = vadd.f32 %v7177_v9, %v1468_v28 }
 0x25c   :  { %v2499_v33 = vpack.c.bf16 %v2427_v23, %v2427_v23  ;;  %v3459_v32 = vpack.c.bf16 %v3387_v26, %v3387_v26  ;;  %v2762_v45 = vmul.f32 %v2427_v23, %v2427_v23  ;;  %v3722_v49 = vmul.f32 %v3387_v26, %v3387_v26 }
 0x25d   :  { %v579_v38 = vpack.c.bf16 %v508_v31, %v508_v31  ;;  %v1540_v46 = vpack.c.bf16 %v1469_v36, %v1469_v36  ;;  %v843_v53 = vmul.f32 %v508_v31, %v508_v31  ;;  %v2685_v61 = vsel %vm649_vm2, %v2427_v23, 0.0 }
 0x25e   :  { %4632 = vst.msk [vmem:[%s7504_s3 + $0x2e8] sm:$0xf] %vm584_vm1, %v2499_v33  ;;  %v1803_v63 = vmul.f32 %v1469_v36, %v1469_v36  ;;  %v2883_v60 = vsel %vm649_vm2, %v2762_v45, 0.0  ;;  %v3645_v62 = vsel %vm649_vm2, %v3387_v26, 0.0  ;;  %v767_v7 = vsel %vm649_vm2, %v508_v31, 0.0 }
 0x25f   :  { %4926 = vst.msk [vmem:[%s7504_s3 + $0x3e8] sm:$0xf] %vm584_vm1, %v3459_v32  ;;  %v3843_v10 = vsel %vm649_vm2, %v3722_v49, 0.0  ;;  %v965_v52 = vsel %vm649_vm2, %v843_v53, 0.0  ;;  %v1727_v13 = vsel %vm649_vm2, %v1469_v36, 0.0  ;;  %v2686_v14 = vadd.f32 %v2685_v61, %v2684_v43 }
 0x260   :  { %644 = vst.msk [vmem:[%s7504_s3 + $0xec] sm:$0xf] %vm584_vm1, %v579_v38  ;;  %v3646_v16 = vadd.f32 %v3645_v62, %v3644_v44  ;;  %v1925_v17 = vsel %vm649_vm2, %v1803_v63, 0.0  ;;  %v2884_v18 = vadd.f32 %v2883_v60, %v2882_v47  ;;  %v768_v19 = vadd.f32 %v767_v7, %v766_v48 }
 0x261   :  { %4339 = vst.msk [vmem:[%s7504_s3 + $0x1ec] sm:$0xf] %vm584_vm1, %v1540_v46  ;;  %v2428_v58 = vpop.f32.mrf.mxu2  ;;  %v3388_v59 = vpop.f32.mrf.mxu3  ;;  %v3844_v22 = vadd.f32 %v3843_v10, %v3842_v54  ;;  %v966_v24 = vadd.f32 %v965_v52, %v964_v55  ;;  %v1728_v25 = vadd.f32 %v1727_v13, %v1726_v56  ;;  %v1926_v26 = vadd.f32 %v1925_v17, %v1924_v5 }
 0x262   :  { %v2429_v1 = vadd.f32 %v7177_v9, %v2428_v58  ;;  %v3389_v2 = vadd.f32 %v7177_v9, %v3388_v59  ;;  %v510_v3 = vpop.f32.mrf.mxu0  ;;  %v1471_v6 = vpop.f32.mrf.mxu1 }
 0x263   :  { %v511_v8 = vadd.f32 %v7177_v9, %v510_v3  ;;  %v1472_v4 = vadd.f32 %v7177_v9, %v1471_v6 }
 0x264   :  { %v2500_v11 = vpack.c.bf16 %v2429_v1, %v2429_v1  ;;  %v3460_v12 = vpack.c.bf16 %v3389_v2, %v3389_v2  ;;  %v2763_v15 = vmul.f32 %v2429_v1, %v2429_v1  ;;  %v2687_v20 = vsel %vm649_vm2, %v2429_v1, 0.0 }
 0x265   :  { %v580_v0 = vpack.c.bf16 %v511_v8, %v511_v8  ;;  %v1541_v21 = vpack.c.bf16 %v1472_v4, %v1472_v4  ;;  %v3647_v23 = vsel %vm649_vm2, %v3389_v2, 0.0  ;;  %v3723_v28 = vmul.f32 %v3389_v2, %v3389_v2 }
 0x266   :  { %4633 = vst.msk [vmem:[%s7504_s3 + $0x2ec] sm:$0xf] %vm584_vm1, %v2500_v11  ;;  %v2885_v27 = vsel %vm649_vm2, %v2763_v15, 0.0  ;;  %v844_v29 = vmul.f32 %v511_v8, %v511_v8  ;;  %v2688_v36 = vadd.f32 %v2687_v20, %v2686_v14  ;;  %v1804_v50 = vmul.f32 %v1472_v4, %v1472_v4 }
 0x267   :  { %4927 = vst.msk [vmem:[%s7504_s3 + $0x3ec] sm:$0xf] %vm584_vm1, %v3460_v12  ;;  %v3648_v35 = vadd.f32 %v3647_v23, %v3646_v16  ;;  %v769_v37 = vsel %vm649_vm2, %v511_v8, 0.0  ;;  %v2886_v40 = vadd.f32 %v2885_v27, %v2884_v18  ;;  %v3845_v44 = vsel %vm649_vm2, %v3723_v28, 0.0 }
 0x268   :  { %645 = vst.msk [vmem:[%s7504_s3 + $0xf0] sm:$0xf] %vm584_vm1, %v580_v0  ;;  %v967_v45 = vsel %vm649_vm2, %v844_v29, 0.0  ;;  %v1729_v46 = vsel %vm649_vm2, %v1472_v4, 0.0  ;;  %v1927_v48 = vsel %vm649_vm2, %v1804_v50, 0.0  ;;  %v770_v55 = vadd.f32 %v769_v37, %v768_v19 }
 0x269   :  { %4340 = vst.msk [vmem:[%s7504_s3 + $0x1f0] sm:$0xf] %vm584_vm1, %v1541_v21  ;;  %v2431_v30 = vpop.f32.mrf.mxu2  ;;  %v3391_v31 = vpop.f32.mrf.mxu3  ;;  %v3846_v59 = vadd.f32 %v3845_v44, %v3844_v22  ;;  %v968_v61 = vadd.f32 %v967_v45, %v966_v24  ;;  %v1730_v63 = vadd.f32 %v1729_v46, %v1728_v25  ;;  %v1928_v2 = vadd.f32 %v1927_v48, %v1926_v26 }
 0x26a   :  { %v2432_v51 = vadd.f32 %v7177_v9, %v2431_v30  ;;  %v3392_v33 = vadd.f32 %v7177_v9, %v3391_v31  ;;  %v512_v32 = vpop.f32.mrf.mxu0  ;;  %v1473_v34 = vpop.f32.mrf.mxu1 }
 0x26b   :  { %v513_v38 = vadd.f32 %v7177_v9, %v512_v32  ;;  %v1474_v39 = vadd.f32 %v7177_v9, %v1473_v34 }
 0x26c   :  { %v2501_v41 = vpack.c.bf16 %v2432_v51, %v2432_v51  ;;  %v2764_v42 = vmul.f32 %v2432_v51, %v2432_v51  ;;  %v3461_v43 = vpack.c.bf16 %v3392_v33, %v3392_v33  ;;  %v2689_v49 = vsel %vm649_vm2, %v2432_v51, 0.0 }
 0x26d   :  { %v581_v47 = vpack.c.bf16 %v513_v38, %v513_v38  ;;  %v3649_v53 = vsel %vm649_vm2, %v3392_v33, 0.0  ;;  %v3724_v54 = vmul.f32 %v3392_v33, %v3392_v33  ;;  %v845_v57 = vmul.f32 %v513_v38, %v513_v38 }
 0x26e   :  { %4634 = vst.msk [vmem:[%s7504_s3 + $0x2f0] sm:$0xf] %vm584_vm1, %v2501_v41  ;;  %v2887_v56 = vsel %vm649_vm2, %v2764_v42, 0.0  ;;  %v1542_v58 = vpack.c.bf16 %v1474_v39, %v1474_v39  ;;  %v771_v1 = vsel %vm649_vm2, %v513_v38, 0.0  ;;  %v2690_v3 = vadd.f32 %v2689_v49, %v2688_v36 }
 0x26f   :  { %4928 = vst.msk [vmem:[%s7504_s3 + $0x3f0] sm:$0xf] %vm584_vm1, %v3461_v43  ;;  %v3650_v6 = vadd.f32 %v3649_v53, %v3648_v35  ;;  %v1805_v60 = vmul.f32 %v1474_v39, %v1474_v39  ;;  %v2888_v8 = vadd.f32 %v2887_v56, %v2886_v40  ;;  %v3847_v10 = vsel %vm649_vm2, %v3724_v54, 0.0 }
 0x270   :  { %646 = vst.msk [vmem:[%s7504_s3 + $0xf4] sm:$0xf] %vm584_vm1, %v581_v47  ;;  %v772_v15 = vadd.f32 %v771_v1, %v770_v55  ;;  %v969_v0 = vsel %vm649_vm2, %v845_v57, 0.0  ;;  %v1731_v4 = vsel %vm649_vm2, %v1474_v39, 0.0  ;;  %v3848_v27 = vadd.f32 %v3847_v10, %v3846_v59 }
 0x271   :  { %4341 = vst.msk [vmem:[%s7504_s3 + $0x1f4] sm:$0xf] %vm584_vm1, %v1542_v58  ;;  %v2433_v62 = vpop.f32.mrf.mxu2  ;;  %v3393_v7 = vpop.f32.mrf.mxu3  ;;  %v1929_v19 = vsel %vm649_vm2, %v1805_v60, 0.0  ;;  %v970_v28 = vadd.f32 %v969_v0, %v968_v61  ;;  %v1732_v31 = vadd.f32 %v1731_v4, %v1730_v63 }
 0x272   :  { %v2434_v52 = vadd.f32 %v7177_v9, %v2433_v62  ;;  %v3394_v11 = vadd.f32 %v7177_v9, %v3393_v7  ;;  %v515_v12 = vpop.f32.mrf.mxu0  ;;  %v1476_v13 = vpop.f32.mrf.mxu1  ;;  %v1930_v36 = vadd.f32 %v1929_v19, %v1928_v2 }
 0x273   :  { %v516_v5 = vadd.f32 %v7177_v9, %v515_v12  ;;  %v1477_v18 = vadd.f32 %v7177_v9, %v1476_v13 }
 0x274   :  { %v2502_v14 = vpack.c.bf16 %v2434_v52, %v2434_v52  ;;  %v2765_v16 = vmul.f32 %v2434_v52, %v2434_v52  ;;  %v3462_v17 = vpack.c.bf16 %v3394_v11, %v3394_v11  ;;  %v2691_v20 = vsel %vm649_vm2, %v2434_v52, 0.0 }
 0x275   :  { %v3725_v21 = vmul.f32 %v3394_v11, %v3394_v11  ;;  %v582_v22 = vpack.c.bf16 %v516_v5, %v516_v5  ;;  %v3651_v25 = vsel %vm649_vm2, %v3394_v11, 0.0  ;;  %v773_v23 = vsel %vm649_vm2, %v516_v5, 0.0 }
 0x276   :  { %4635 = vst.msk [vmem:[%s7504_s3 + $0x2f4] sm:$0xf] %vm584_vm1, %v2502_v14  ;;  %v2889_v24 = vsel %vm649_vm2, %v2765_v16, 0.0  ;;  %v846_v26 = vmul.f32 %v516_v5, %v516_v5  ;;  %v1543_v30 = vpack.c.bf16 %v1477_v18, %v1477_v18  ;;  %v1806_v51 = vmul.f32 %v1477_v18, %v1477_v18 }
 0x277   :  { %4929 = vst.msk [vmem:[%s7504_s3 + $0x3f4] sm:$0xf] %vm584_vm1, %v3462_v17  ;;  %v3849_v29 = vsel %vm649_vm2, %v3725_v21, 0.0  ;;  %v2692_v33 = vadd.f32 %v2691_v20, %v2690_v3  ;;  %v2890_v32 = vadd.f32 %v2889_v24, %v2888_v8  ;;  %v3652_v34 = vadd.f32 %v3651_v25, %v3650_v6 }
 0x278   :  { %647 = vst.msk [vmem:[%s7504_s3 + $0xf8] sm:$0xf] %vm584_vm1, %v582_v22  ;;  %v971_v50 = vsel %vm649_vm2, %v846_v26, 0.0  ;;  %v774_v35 = vadd.f32 %v773_v23, %v772_v15  ;;  %v3850_v39 = vadd.f32 %v3849_v29, %v3848_v27  ;;  %v1733_v40 = vsel %vm649_vm2, %v1477_v18, 0.0 }
 0x279   :  { %4342 = vst.msk [vmem:[%s7504_s3 + $0x1f8] sm:$0xf] %vm584_vm1, %v1543_v30  ;;  %v2436_v37 = vpop.f32.mrf.mxu2  ;;  %v3396_v38 = vpop.f32.mrf.mxu3  ;;  %v972_v45 = vadd.f32 %v971_v50, %v970_v28  ;;  %v1931_v46 = vsel %vm649_vm2, %v1806_v51, 0.0  ;;  %v1734_v56 = vadd.f32 %v1733_v40, %v1732_v31 }
 0x27a   :  { %v2437_v41 = vadd.f32 %v7177_v9, %v2436_v37  ;;  %v3397_v42 = vadd.f32 %v7177_v9, %v3396_v38  ;;  %v517_v43 = vpop.f32.mrf.mxu0  ;;  %v1478_v44 = vpop.f32.mrf.mxu1  ;;  %v1932_v61 = vadd.f32 %v1931_v46, %v1930_v36 }
 0x27b   :  { %v518_v47 = vadd.f32 %v7177_v9, %v517_v43  ;;  %v1479_v48 = vadd.f32 %v7177_v9, %v1478_v44 }
 0x27c   :  { %v2503_v49 = vpack.c.bf16 %v2437_v41, %v2437_v41  ;;  %v2693_v53 = vsel %vm649_vm2, %v2437_v41, 0.0  ;;  %v2766_v54 = vmul.f32 %v2437_v41, %v2437_v41  ;;  %v3463_v55 = vpack.c.bf16 %v3397_v42, %v3397_v42 }
 0x27d   :  { %v3653_v57 = vsel %vm649_vm2, %v3397_v42, 0.0  ;;  %v3726_v58 = vmul.f32 %v3397_v42, %v3397_v42  ;;  %v583_v59 = vpack.c.bf16 %v518_v47, %v518_v47  ;;  %v775_v1 = vsel %vm649_vm2, %v518_v47, 0.0 }
 0x27e   :  { %4636 = vst.msk [vmem:[%s7504_s3 + $0x2f8] sm:$0xf] %vm584_vm1, %v2503_v49  ;;  %v2891_v63 = vsel %vm649_vm2, %v2766_v54, 0.0  ;;  %v847_v2 = vmul.f32 %v518_v47, %v518_v47  ;;  %v2694_v3 = vadd.f32 %v2693_v53, %v2692_v33  ;;  %v776_v60 = vadd.f32 %v775_v1, %v774_v35 }
 0x27f   :  { %4930 = vst.msk [vmem:[%s7504_s3 + $0x3f8] sm:$0xf] %vm584_vm1, %v3463_v55  ;;  %v3851_v6 = vsel %vm649_vm2, %v3726_v58, 0.0  ;;  %v1544_v62 = vpack.c.bf16 %v1479_v48, %v1479_v48  ;;  %v3654_v7 = vadd.f32 %v3653_v57, %v3652_v34  ;;  %v1735_v10 = vsel %vm649_vm2, %v1479_v48, 0.0 }
 0x280   :  { %648 = vst.msk [vmem:[%s7504_s3 + $0xfc] sm:$0xf] %vm584_vm1, %v583_v59  ;;  %v973_v8 = vsel %vm649_vm2, %v847_v2, 0.0  ;;  %v1807_v52 = vmul.f32 %v1479_v48, %v1479_v48  ;;  %v2892_v11 = vadd.f32 %v2891_v63, %v2890_v32  ;;  %v777_v12 = vrot.slane %v776_v60, 4 }
 0x281   :  { %v974_v13 = vadd.f32 %v973_v8, %v972_v45  ;;  %4343 = vst.msk [vmem:[%s7504_s3 + $0x1fc] sm:$0xf] %vm584_vm1, %v1544_v62  ;;  %v1736_v15 = vadd.f32 %v1735_v10, %v1734_v56  ;;  %v2438_v0 = vpop.f32.mrf.mxu2  ;;  %v3398_v4 = vpop.f32.mrf.mxu3  ;;  %v3852_v5 = vadd.f32 %v3851_v6, %v3850_v39 }
 0x282   :  { %v1933_v14 = vsel %vm649_vm2, %v1807_v52, 0.0  ;;  %v2439_v16 = vadd.f32 %v7177_v9, %v2438_v0  ;;  %v3399_v17 = vadd.f32 %v7177_v9, %v3398_v4  ;;  %v778_v18 = vadd.f32 %v777_v12, %v776_v60 }
 0x283   :  { %v975_v19 = vrot.slane %v974_v13, 4  ;;  %v1737_v20 = vrot.slane %v1736_v15, 4  ;;  %v1934_v21 = vadd.f32 %v1933_v14, %v1932_v61 }
 0x284   :  { %v2504_v22 = vpack.c.bf16 %v2439_v16, %v2439_v16  ;;  %v2695_v24 = vsel %vm649_vm2, %v2439_v16, 0.0  ;;  %v2767_v25 = vmul.f32 %v2439_v16, %v2439_v16  ;;  %v3464_v23 = vpack.c.bf16 %v3399_v17, %v3399_v17 }
 0x285   :  { %v779_v26 = vrot.slane %v778_v18, 2  ;;  %v976_v27 = vadd.f32 %v975_v19, %v974_v13  ;;  %v1738_v28 = vadd.f32 %v1737_v20, %v1736_v15  ;;  %v1935_v29 = vrot.slane %v1934_v21, 4 }
 0x286   :  { %4637 = vst.msk [vmem:[%s7504_s3 + $0x2fc] sm:$0xf] %vm584_vm1, %v2504_v22  ;;  %v2696_v30 = vadd.f32 %v2695_v24, %v2694_v3  ;;  %v2893_v9 = vsel %vm649_vm2, %v2767_v25, 0.0  ;;  %v3655_v31 = vsel %vm649_vm2, %v3399_v17, 0.0  ;;  %v3727_v36 = vmul.f32 %v3399_v17, %v3399_v17 }
 0x287   :  { %v780_v50 = vadd.f32 %v779_v26, %v778_v18  ;;  %v977_v51 = vrot.slane %v976_v27, 2  ;;  %v1739_v33 = vrot.slane %v1738_v28, 2  ;;  %v1936_v32 = vadd.f32 %v1935_v29, %v1934_v21  ;;  %4931 = vst.msk [vmem:[%s7504_s3 + $0x3fc] sm:$0xf] %vm584_vm1, %v3464_v23  ;;  %s5096_s3 = smov [#allocation2]  }
 0x288   :  { %v2697_v34 = vrot.slane %v2696_v30, 4  ;;  %v2894_v35 = vadd.f32 %v2893_v9, %v2892_v11  ;;  %v3656_v37 = vadd.f32 %v3655_v31, %v3654_v7  ;;  %v3853_v38 = vsel %vm649_vm2, %v3727_v36, 0.0  ;;  %s3873_s9 = sshll.u32 %s5096_s3, 4  ;;  %s3874_s9 = int_to_ptr.vmem [resolvable:$true] %s3873_s9 }
 0x289   :  { %v781_v39 = vrot.slane %v780_v50, 1  ;;  %v978_v40 = vadd.f32 %v977_v51, %v976_v27  ;;  %v1740_v41 = vadd.f32 %v1739_v33, %v1738_v28  ;;  %v1937_v42 = vrot.slane %v1936_v32, 2 }
 0x28a   :  { %v2698_v43 = vadd.f32 %v2697_v34, %v2696_v30  ;;  %v2895_v44 = vrot.slane %v2894_v35, 4  ;;  %v3657_v45 = vrot.slane %v3656_v37, 4  ;;  %v3854_v46 = vadd.f32 %v3853_v38, %v3852_v5 }
 0x28b   :  { %v782_v47 = vadd.f32 %v781_v39, %v780_v50  ;;  %v979_v48 = vrot.slane %v978_v40, 1  ;;  %v1741_v49 = vrot.slane %v1740_v41, 1  ;;  %v1938_v53 = vadd.f32 %v1937_v42, %v1936_v32 }
 0x28c   :  { %v2699_v54 = vrot.slane %v2698_v43, 2  ;;  %v2896_v55 = vadd.f32 %v2895_v44, %v2894_v35  ;;  %v3658_v56 = vadd.f32 %v3657_v45, %v3656_v37  ;;  %v3855_v57 = vrot.slane %v3854_v46, 4 }
 0x28d   :  { %v980_v58 = vadd.f32 %v979_v48, %v978_v40  ;;  %v1742_v59 = vadd.f32 %v1741_v49, %v1740_v41  ;;  %v1939_v61 = vrot.slane %v1938_v53, 1 }
 0x28e   :  { %v2700_v63 = vadd.f32 %v2699_v54, %v2698_v43  ;;  %v2897_v1 = vrot.slane %v2896_v55, 2  ;;  %v3659_v2 = vrot.slane %v3658_v56, 2  ;;  %v3856_v3 = vadd.f32 %v3855_v57, %v3854_v46 }
 0x28f   :  { %v1940_v6 = vadd.f32 %v1939_v61, %v1938_v53  ;;  %v1743_v60 = vadd.f32 %v1742_v59, %v782_v47 }
 0x290   :  { %v2701_v62 = vrot.slane %v2700_v63, 1  ;;  %v2898_v7 = vadd.f32 %v2897_v1, %v2896_v55  ;;  %v3660_v8 = vadd.f32 %v3659_v2, %v3658_v56  ;;  %v3857_v10 = vrot.slane %v3856_v3, 2 }
 0x291   :  { %v1941_v52 = vadd.f32 %v1940_v6, %v980_v58 }
 0x292   :  { %v2702_v11 = vadd.f32 %v2701_v62, %v2700_v63  ;;  %v2899_v12 = vrot.slane %v2898_v7, 1  ;;  %v3661_v13 = vrot.slane %v3660_v8, 1  ;;  %v3858_v15 = vadd.f32 %v3857_v10, %v3856_v3 }
 0x294   :  { %v2703_v0 = vadd.f32 %v2702_v11, %v1743_v60  ;;  %v2900_v4 = vadd.f32 %v2899_v12, %v2898_v7  ;;  %v3662_v5 = vadd.f32 %v3661_v13, %v3660_v8  ;;  %v3859_v14 = vrot.slane %v3858_v15, 1 }
 0x296   :  { %v2901_v16 = vadd.f32 %v2900_v4, %v1941_v52  ;;  %v3663_v17 = vadd.f32 %v3662_v5, %v2703_v0  ;;  %v3860_v18 = vadd.f32 %v3859_v14, %v3858_v15 }
 0x298   :  { %v3861_v19 = vadd.f32 %v3860_v18, %v2901_v16 }
 0x29a   :  { %v3863_v20 = vsel %vm3862_vm3, %v3663_v17, %v3861_v19 }
 0x29b   :  { %3865 = vst.msk [vmem:[#allocation2] sm:$0x3] %vm3864_vm4, %v3863_v20 }
 0x29c   :  { %3878 = dma.vmem_to_hbm [thread:$0]  %s3874_s9, 32, %s3876_s2, [#allocation3]  }
 0x29d   :  { %5094 = dma.done.wait [#allocation3], 32  }
 0x29e   :  { %5095 = vsyncadd [#allocation3], 4294967264 }
 0x29f   :  { %3885 = vsyncpa [#allocation3], 1 }

</bundles_post_ra>
